<compile_context>
chip_gen: v6e
topology: v6e:2x2x1
jax: 0.10.0
libtpu: 0.0.40
codegen_flags: <defaults>
</compile_context>

<pallas_src>
import functools
import math

import jax
import jax.numpy as jnp
from jax import lax
from jax.experimental import pallas as pl
from jax.experimental.pallas import tpu as pltpu

# Make the pure-JAX reference einsums and the in-kernel dots use the same
# (accurate) f32 matmul algorithm so the correctness check is tight.
jax.config.update("jax_default_matmul_precision", "highest")


def _tself_attention_kernel(qkv_ref, w_ref, b_ref, wfc_ref, bfc_ref,
                            hmask_ref, bbias_ref, out_ref, *, heads, scale):
    f32 = jnp.float32

    # One stacked q/k/v tile per grid step (single input DMA). qkv_ref: (3, S*T, E).
    # Per-head Linear folded into block-diagonal (E, E) matmuls (w_ref: (3, E, E)).
    q = jnp.dot(qkv_ref[0], w_ref[0], preferred_element_type=f32) + b_ref[0]
    k = jnp.dot(qkv_ref[1], w_ref[1], preferred_element_type=f32) + b_ref[1]
    v = jnp.dot(qkv_ref[2], w_ref[2], preferred_element_type=f32) + b_ref[2]

    bbias = bbias_ref[...]              # (S*T, S*T): 0 on same-slice blocks, -1e30 off
    ctx = jnp.zeros_like(q)             # (S*T, E) fc-input accumulator (no concat)

    for h in range(heads):              # static & tiny -> fully unrolled
        hm = hmask_ref[h]               # (1, E): 1.0 on head-h lanes, 0.0 elsewhere
        # Head-masked NT matmul over the full lane width: only head-h features
        # survive the contraction; the additive block bias then confines attention
        # to keys of the matching (B*N) slice.
        scores = lax.dot_general(q * hm, k, (((1,), (1,)), ((), ())),
                                 preferred_element_type=f32) * scale + bbias
        # torch.softmax(..., dim=2) on 'bnqkh' == softmax over the QUERY axis
        # (rows here); off-block entries underflow to exactly zero.
        m = jnp.max(scores, axis=0, keepdims=True)
        e = jnp.exp(scores - m)
        attn = e * pl.reciprocal(jnp.sum(e, axis=0, keepdims=True), approx=False)
        # attn is zero off the same-slice blocks, so the contraction only mixes keys
        # of the right slice; masking v writes only head h's output lanes.
        ctx = ctx + jnp.dot(attn, v * hm, preferred_element_type=f32)

    out = jnp.dot(ctx, wfc_ref[...], preferred_element_type=f32) + bfc_ref[...]
    out_ref[...] = out.astype(out_ref.dtype)


def tself_attention(value, key, query, params, *, heads):
    """value/key/query: (B, N, T, E) f32.  params holds raw PyTorch-layout weights."""
    B, N, T, E = query.shape
    assert E % heads == 0
    D = E // heads
    BN = B * N
    scale = 1.0 / math.sqrt(E)
    f32 = jnp.float32

    # Slices per grid step: batch as many (T, E) slices per step as possible
    # (amortizes per-step pipeline overhead) while keeping >= 2 parallel steps so
    # v7x's two TensorCores both get work (v5e/v6e have 1 TC, so 2 steps is fine).
    grid_n = 2 if (BN % 2 == 0 and BN >= 2) else 1
    S = BN // grid_n
    ST = S * T

    # nn.Linear: y = x @ W.T + b.  Fold the shared per-head (D, D) Linear into a
    # block-diagonal (E, E) matmul; tile the bias across heads.
    eye_h = jnp.eye(heads, dtype=f32)
    w_qkv = jnp.stack([jnp.kron(eye_h, params[n].T.astype(f32))
                       for n in ("wq", "wk", "wv")])                      # (3, E, E)
    b_qkv = jnp.stack([jnp.tile(params[n].astype(f32), heads)[None, :]
                       for n in ("bq", "bk", "bv")])                      # (3, 1, E)
    wfc_t = params["wfc"].T.astype(f32)                                   # (E, E)
    bfc = params["bfc"].astype(f32)[None, :]                              # (1, E)

    # Constant head lane-masks and same-slice block bias (stay resident in VMEM).
    lane = jnp.arange(E, dtype=jnp.int32)
    head_mask = (lane[None, :] // D ==
                 jnp.arange(heads, dtype=jnp.int32)[:, None]).astype(f32)[:, None, :]
    row = jnp.arange(ST, dtype=jnp.int32)
    block_bias = jnp.where((row[:, None] // T) == (row[None, :] // T),
                           0.0, -1e30).astype(f32)                        # (ST, ST)

    # Pack (B,N,T,E) -> (grid_n, S*T, E) (pure reshape, no transpose) and stack
    # q/k/v so each grid step issues a single input DMA.
    pack = lambda x: x.astype(f32).reshape(BN, T, E).reshape(grid_n, ST, E)
    qkv = jnp.stack([pack(query), pack(key), pack(value)], axis=1)        # (g,3,ST,E)

    def resident(a):
        nd = a.ndim
        return pl.BlockSpec(a.shape, lambda i: (0,) * nd)   # DMA'd once, stays in VMEM

    kernel = functools.partial(_tself_attention_kernel, heads=heads, scale=scale)

    out = pl.pallas_call(
        kernel,
        out_shape=jax.ShapeDtypeStruct((grid_n, ST, E), f32),
        grid=(grid_n,),
        in_specs=[
            pl.BlockSpec((None, 3, ST, E), lambda i: (i, 0, 0, 0)),
            resident(w_qkv), resident(b_qkv),
            resident(wfc_t), resident(bfc),
            resident(head_mask), resident(block_bias),
        ],
        out_specs=pl.BlockSpec((None, ST, E), lambda i: (i, 0, 0)),
        compiler_params=pltpu.CompilerParams(
            dimension_semantics=("parallel",)),
    )(qkv, w_qkv, b_qkv, wfc_t, bfc, head_mask, block_bias)

    # (grid_n, S*T, E) -> (B, N, T, E): pure reshape (row order is bn-major already).
    return out.reshape(B, N, T, E)


def _reference(value, key, query, params, *, heads):
    """Pure-JAX transcription of the PyTorch forward."""
    B, N, T, E = query.shape
    D = E // heads
    lin = lambda x, w, b: x @ w.T + b
    q = lin(query.reshape(B, N, T, heads, D), params["wq"], params["bq"])
    k = lin(key.reshape(B, N, T, heads, D), params["wk"], params["bk"])
    v = lin(value.reshape(B, N, T, heads, D), params["wv"], params["bv"])
    scores = jnp.einsum('bnqhd,bnkhd->bnqkh', q, k)
    attn = jax.nn.softmax(scores / math.sqrt(E), axis=2)   # dim=2 == query axis
    out = jnp.einsum('bnqkh,bnkhd->bnqhd', attn, v).reshape(B, N, T, E)
    return lin(out, params["wfc"], params["bfc"])


if __name__ == "__main__":
    root = jax.random.PRNGKey(0)
    ks = jax.random.split(root, 11)

    # Small shapes consistent with the module.
    B, N, T, E, H = 2, 4, 8, 32, 4
    D = E // H

    value = jax.random.normal(ks[0], (B, N, T, E), jnp.float32)
    key_in = jax.random.normal(ks[1], (B, N, T, E), jnp.float32)
    query = jax.random.normal(ks[2], (B, N, T, E), jnp.float32)

    def linear_init(kw, kb, out_f, in_f):
        # nn.Linear default init: uniform(-1/sqrt(in), 1/sqrt(in)), weight (out, in)
        bound = 1.0 / math.sqrt(in_f)
        w = jax.random.uniform(kw, (out_f, in_f), jnp.float32, -bound, bound)
        b = jax.random.uniform(kb, (out_f,), jnp.float32, -bound, bound)
        return w, b

    wq, bq = linear_init(ks[3], ks[4], D, D)
    wk, bk = linear_init(ks[5], ks[6], D, D)
    wv, bv = linear_init(ks[7], ks[8], D, D)
    wfc, bfc = linear_init(ks[9], ks[10], E, E)
    params = dict(wq=wq, bq=bq, wk=wk, bk=bk, wv=wv, bv=bv, wfc=wfc, bfc=bfc)

    out = tself_attention(value, key_in, query, params, heads=H)
    jax.block_until_ready(out)

    ref = _reference(value, key_in, query, params, heads=H)
    assert out.shape == (B, N, T, E)
    err = float(jnp.max(jnp.abs(out - ref)))
    assert jnp.allclose(out, ref, atol=1e-3, rtol=1e-3), f"max abs err = {err}"

    print("KERNEL_OK")
</pallas_src>

<mosaic_0001>
module attributes {stable_mosaic.version = 11 : i64} {
  func.func @_tself_attention_kernel(%arg0: i32, %arg1: memref<1x3x32x32xf32, #tpu.memory_space<vmem>>, %arg2: memref<3x32x32xf32, #tpu.memory_space<vmem>>, %arg3: memref<3x1x32xf32, #tpu.memory_space<vmem>>, %arg4: memref<32x32xf32, #tpu.memory_space<vmem>>, %arg5: memref<1x32xf32, #tpu.memory_space<vmem>>, %arg6: memref<4x1x32xf32, #tpu.memory_space<vmem>>, %arg7: memref<32x32xf32, #tpu.memory_space<vmem>>, %arg8: memref<1x32x32xf32, #tpu.memory_space<vmem>>) attributes {dimension_semantics = [#tpu.dimension_semantics<parallel>], iteration_bounds = array<i64: 2>, scalar_prefetch = 0 : i64, scratch_operands = 0 : i64, tpu.core_type = #tpu.core_type<tc>, window_params = [{transform_indices = @transform_0, window_bounds = array<i64: 1, 3, 32, 32>}, {pipeline_mode = #tpu.pipeline_mode<synchronous>, transform_indices = @transform_1, window_bounds = array<i64: 3, 32, 32>}, {pipeline_mode = #tpu.pipeline_mode<synchronous>, transform_indices = @transform_2, window_bounds = array<i64: 3, 1, 32>}, {pipeline_mode = #tpu.pipeline_mode<synchronous>, transform_indices = @transform_3, window_bounds = array<i64: 32, 32>}, {pipeline_mode = #tpu.pipeline_mode<synchronous>, transform_indices = @transform_4, window_bounds = array<i64: 1, 32>}, {pipeline_mode = #tpu.pipeline_mode<synchronous>, transform_indices = @transform_5, window_bounds = array<i64: 4, 1, 32>}, {pipeline_mode = #tpu.pipeline_mode<synchronous>, transform_indices = @transform_6, window_bounds = array<i64: 32, 32>}, {transform_indices = @transform_7, window_bounds = array<i64: 1, 32, 32>}]} {
    %c0 = arith.constant 0 : index
    %c0_0 = arith.constant 0 : index
    %c0_1 = arith.constant 0 : index
    %c0_2 = arith.constant 0 : index
    %0 = vector.load %arg1[%c0, %c0_0, %c0_1, %c0_2] : memref<1x3x32x32xf32, #tpu.memory_space<vmem>>, vector<1x1x32x32xf32>
    %1 = vector.shape_cast %0 : vector<1x1x32x32xf32> to vector<32x32xf32>
    %c0_3 = arith.constant 0 : index
    %c0_4 = arith.constant 0 : index
    %c0_5 = arith.constant 0 : index
    %2 = vector.load %arg2[%c0_3, %c0_4, %c0_5] : memref<3x32x32xf32, #tpu.memory_space<vmem>>, vector<1x32x32xf32>
    %3 = vector.shape_cast %2 : vector<1x32x32xf32> to vector<32x32xf32>
    %cst = arith.constant dense<0.000000e+00> : vector<32x32xf32>
    %4 = tpu.matmul %1, %3, %cst {dimension_numbers = #tpu.dot_dimension_numbers<[1], [0], [0], [1], [0, 0, 1, 1], [], []>, precision = #tpu.contract_precision<fp32>} : vector<32x32xf32>, vector<32x32xf32>, vector<32x32xf32> -> vector<32x32xf32>
    %c0_6 = arith.constant 0 : index
    %c0_7 = arith.constant 0 : index
    %c0_8 = arith.constant 0 : index
    %5 = vector.load %arg3[%c0_6, %c0_7, %c0_8] : memref<3x1x32xf32, #tpu.memory_space<vmem>>, vector<1x1x32xf32>
    %6 = vector.shape_cast %5 : vector<1x1x32xf32> to vector<1x32xf32>
    %7 = vector.broadcast %6 : vector<1x32xf32> to vector<32x32xf32>
    %8 = arith.addf %4, %7 : vector<32x32xf32>
    %c0_9 = arith.constant 0 : index
    %c1 = arith.constant 1 : index
    %c0_10 = arith.constant 0 : index
    %c0_11 = arith.constant 0 : index
    %9 = vector.load %arg1[%c0_9, %c1, %c0_10, %c0_11] : memref<1x3x32x32xf32, #tpu.memory_space<vmem>>, vector<1x1x32x32xf32>
    %10 = vector.shape_cast %9 : vector<1x1x32x32xf32> to vector<32x32xf32>
    %c1_12 = arith.constant 1 : index
    %c0_13 = arith.constant 0 : index
    %c0_14 = arith.constant 0 : index
    %11 = vector.load %arg2[%c1_12, %c0_13, %c0_14] : memref<3x32x32xf32, #tpu.memory_space<vmem>>, vector<1x32x32xf32>
    %12 = vector.shape_cast %11 : vector<1x32x32xf32> to vector<32x32xf32>
    %cst_15 = arith.constant dense<0.000000e+00> : vector<32x32xf32>
    %13 = tpu.matmul %10, %12, %cst_15 {dimension_numbers = #tpu.dot_dimension_numbers<[1], [0], [0], [1], [0, 0, 1, 1], [], []>, precision = #tpu.contract_precision<fp32>} : vector<32x32xf32>, vector<32x32xf32>, vector<32x32xf32> -> vector<32x32xf32>
    %c1_16 = arith.constant 1 : index
    %c0_17 = arith.constant 0 : index
    %c0_18 = arith.constant 0 : index
    %14 = vector.load %arg3[%c1_16, %c0_17, %c0_18] : memref<3x1x32xf32, #tpu.memory_space<vmem>>, vector<1x1x32xf32>
    %15 = vector.shape_cast %14 : vector<1x1x32xf32> to vector<1x32xf32>
    %16 = vector.broadcast %15 : vector<1x32xf32> to vector<32x32xf32>
    %17 = arith.addf %13, %16 : vector<32x32xf32>
    %c0_19 = arith.constant 0 : index
    %c2 = arith.constant 2 : index
    %c0_20 = arith.constant 0 : index
    %c0_21 = arith.constant 0 : index
    %18 = vector.load %arg1[%c0_19, %c2, %c0_20, %c0_21] : memref<1x3x32x32xf32, #tpu.memory_space<vmem>>, vector<1x1x32x32xf32>
    %19 = vector.shape_cast %18 : vector<1x1x32x32xf32> to vector<32x32xf32>
    %c2_22 = arith.constant 2 : index
    %c0_23 = arith.constant 0 : index
    %c0_24 = arith.constant 0 : index
    %20 = vector.load %arg2[%c2_22, %c0_23, %c0_24] : memref<3x32x32xf32, #tpu.memory_space<vmem>>, vector<1x32x32xf32>
    %21 = vector.shape_cast %20 : vector<1x32x32xf32> to vector<32x32xf32>
    %cst_25 = arith.constant dense<0.000000e+00> : vector<32x32xf32>
    %22 = tpu.matmul %19, %21, %cst_25 {dimension_numbers = #tpu.dot_dimension_numbers<[1], [0], [0], [1], [0, 0, 1, 1], [], []>, precision = #tpu.contract_precision<fp32>} : vector<32x32xf32>, vector<32x32xf32>, vector<32x32xf32> -> vector<32x32xf32>
    %c2_26 = arith.constant 2 : index
    %c0_27 = arith.constant 0 : index
    %c0_28 = arith.constant 0 : index
    %23 = vector.load %arg3[%c2_26, %c0_27, %c0_28] : memref<3x1x32xf32, #tpu.memory_space<vmem>>, vector<1x1x32xf32>
    %24 = vector.shape_cast %23 : vector<1x1x32xf32> to vector<1x32xf32>
    %25 = vector.broadcast %24 : vector<1x32xf32> to vector<32x32xf32>
    %26 = arith.addf %22, %25 : vector<32x32xf32>
    %c0_29 = arith.constant 0 : index
    %c0_30 = arith.constant 0 : index
    %27 = vector.load %arg7[%c0_29, %c0_30] : memref<32x32xf32, #tpu.memory_space<vmem>>, vector<32x32xf32>
    %cst_31 = arith.constant 0.000000e+00 : f32
    %28 = vector.broadcast %cst_31 : f32 to vector<32x32xf32>
    %c0_32 = arith.constant 0 : index
    %c0_33 = arith.constant 0 : index
    %c0_34 = arith.constant 0 : index
    %29 = vector.load %arg6[%c0_32, %c0_33, %c0_34] : memref<4x1x32xf32, #tpu.memory_space<vmem>>, vector<1x1x32xf32>
    %30 = vector.shape_cast %29 : vector<1x1x32xf32> to vector<1x32xf32>
    %31 = vector.broadcast %30 : vector<1x32xf32> to vector<32x32xf32>
    %32 = arith.mulf %8, %31 : vector<32x32xf32>
    %cst_35 = arith.constant dense<0.000000e+00> : vector<32x32xf32>
    %33 = tpu.matmul %32, %17, %cst_35 {dimension_numbers = #tpu.dot_dimension_numbers<[1], [1], [0], [0], [0, 0, 1, 0], [], []>, precision = #tpu.contract_precision<fp32>} : vector<32x32xf32>, vector<32x32xf32>, vector<32x32xf32> -> vector<32x32xf32>
    %cst_36 = arith.constant 0.176776692 : f32
    %34 = vector.broadcast %cst_36 : f32 to vector<32x32xf32>
    %35 = arith.mulf %33, %34 : vector<32x32xf32>
    %36 = arith.addf %35, %27 : vector<32x32xf32>
    %cst_37 = arith.constant dense<0xFF800000> : vector<32xf32>
    %37 = vector.multi_reduction <maximumf>, %36, %cst_37 [0] : vector<32x32xf32> to vector<32xf32>
    %38 = vector.shape_cast %37 : vector<32xf32> to vector<1x32xf32>
    %39 = vector.broadcast %38 : vector<1x32xf32> to vector<32x32xf32>
    %40 = arith.subf %36, %39 : vector<32x32xf32>
    %41 = math.exp %40 : vector<32x32xf32>
    %cst_38 = arith.constant dense<0.000000e+00> : vector<32xf32>
    %42 = vector.multi_reduction <add>, %41, %cst_38 [0] : vector<32x32xf32> to vector<32xf32>
    %43 = vector.shape_cast %42 : vector<32xf32> to vector<1x32xf32>
    %44 = tpu.reciprocal %43 : vector<1x32xf32> -> vector<1x32xf32>
    %45 = vector.broadcast %44 : vector<1x32xf32> to vector<32x32xf32>
    %46 = arith.mulf %41, %45 : vector<32x32xf32>
    %47 = vector.broadcast %30 : vector<1x32xf32> to vector<32x32xf32>
    %48 = arith.mulf %26, %47 : vector<32x32xf32>
    %cst_39 = arith.constant dense<0.000000e+00> : vector<32x32xf32>
    %49 = tpu.matmul %46, %48, %cst_39 {dimension_numbers = #tpu.dot_dimension_numbers<[1], [0], [0], [1], [0, 0, 1, 1], [], []>, precision = #tpu.contract_precision<fp32>} : vector<32x32xf32>, vector<32x32xf32>, vector<32x32xf32> -> vector<32x32xf32>
    %50 = arith.addf %28, %49 : vector<32x32xf32>
    %c1_40 = arith.constant 1 : index
    %c0_41 = arith.constant 0 : index
    %c0_42 = arith.constant 0 : index
    %51 = vector.load %arg6[%c1_40, %c0_41, %c0_42] : memref<4x1x32xf32, #tpu.memory_space<vmem>>, vector<1x1x32xf32>
    %52 = vector.shape_cast %51 : vector<1x1x32xf32> to vector<1x32xf32>
    %53 = vector.broadcast %52 : vector<1x32xf32> to vector<32x32xf32>
    %54 = arith.mulf %8, %53 : vector<32x32xf32>
    %cst_43 = arith.constant dense<0.000000e+00> : vector<32x32xf32>
    %55 = tpu.matmul %54, %17, %cst_43 {dimension_numbers = #tpu.dot_dimension_numbers<[1], [1], [0], [0], [0, 0, 1, 0], [], []>, precision = #tpu.contract_precision<fp32>} : vector<32x32xf32>, vector<32x32xf32>, vector<32x32xf32> -> vector<32x32xf32>
    %cst_44 = arith.constant 0.176776692 : f32
    %56 = vector.broadcast %cst_44 : f32 to vector<32x32xf32>
    %57 = arith.mulf %55, %56 : vector<32x32xf32>
    %58 = arith.addf %57, %27 : vector<32x32xf32>
    %cst_45 = arith.constant dense<0xFF800000> : vector<32xf32>
    %59 = vector.multi_reduction <maximumf>, %58, %cst_45 [0] : vector<32x32xf32> to vector<32xf32>
    %60 = vector.shape_cast %59 : vector<32xf32> to vector<1x32xf32>
    %61 = vector.broadcast %60 : vector<1x32xf32> to vector<32x32xf32>
    %62 = arith.subf %58, %61 : vector<32x32xf32>
    %63 = math.exp %62 : vector<32x32xf32>
    %cst_46 = arith.constant dense<0.000000e+00> : vector<32xf32>
    %64 = vector.multi_reduction <add>, %63, %cst_46 [0] : vector<32x32xf32> to vector<32xf32>
    %65 = vector.shape_cast %64 : vector<32xf32> to vector<1x32xf32>
    %66 = tpu.reciprocal %65 : vector<1x32xf32> -> vector<1x32xf32>
    %67 = vector.broadcast %66 : vector<1x32xf32> to vector<32x32xf32>
    %68 = arith.mulf %63, %67 : vector<32x32xf32>
    %69 = vector.broadcast %52 : vector<1x32xf32> to vector<32x32xf32>
    %70 = arith.mulf %26, %69 : vector<32x32xf32>
    %cst_47 = arith.constant dense<0.000000e+00> : vector<32x32xf32>
    %71 = tpu.matmul %68, %70, %cst_47 {dimension_numbers = #tpu.dot_dimension_numbers<[1], [0], [0], [1], [0, 0, 1, 1], [], []>, precision = #tpu.contract_precision<fp32>} : vector<32x32xf32>, vector<32x32xf32>, vector<32x32xf32> -> vector<32x32xf32>
    %72 = arith.addf %50, %71 : vector<32x32xf32>
    %c2_48 = arith.constant 2 : index
    %c0_49 = arith.constant 0 : index
    %c0_50 = arith.constant 0 : index
    %73 = vector.load %arg6[%c2_48, %c0_49, %c0_50] : memref<4x1x32xf32, #tpu.memory_space<vmem>>, vector<1x1x32xf32>
    %74 = vector.shape_cast %73 : vector<1x1x32xf32> to vector<1x32xf32>
    %75 = vector.broadcast %74 : vector<1x32xf32> to vector<32x32xf32>
    %76 = arith.mulf %8, %75 : vector<32x32xf32>
    %cst_51 = arith.constant dense<0.000000e+00> : vector<32x32xf32>
    %77 = tpu.matmul %76, %17, %cst_51 {dimension_numbers = #tpu.dot_dimension_numbers<[1], [1], [0], [0], [0, 0, 1, 0], [], []>, precision = #tpu.contract_precision<fp32>} : vector<32x32xf32>, vector<32x32xf32>, vector<32x32xf32> -> vector<32x32xf32>
    %cst_52 = arith.constant 0.176776692 : f32
    %78 = vector.broadcast %cst_52 : f32 to vector<32x32xf32>
    %79 = arith.mulf %77, %78 : vector<32x32xf32>
    %80 = arith.addf %79, %27 : vector<32x32xf32>
    %cst_53 = arith.constant dense<0xFF800000> : vector<32xf32>
    %81 = vector.multi_reduction <maximumf>, %80, %cst_53 [0] : vector<32x32xf32> to vector<32xf32>
    %82 = vector.shape_cast %81 : vector<32xf32> to vector<1x32xf32>
    %83 = vector.broadcast %82 : vector<1x32xf32> to vector<32x32xf32>
    %84 = arith.subf %80, %83 : vector<32x32xf32>
    %85 = math.exp %84 : vector<32x32xf32>
    %cst_54 = arith.constant dense<0.000000e+00> : vector<32xf32>
    %86 = vector.multi_reduction <add>, %85, %cst_54 [0] : vector<32x32xf32> to vector<32xf32>
    %87 = vector.shape_cast %86 : vector<32xf32> to vector<1x32xf32>
    %88 = tpu.reciprocal %87 : vector<1x32xf32> -> vector<1x32xf32>
    %89 = vector.broadcast %88 : vector<1x32xf32> to vector<32x32xf32>
    %90 = arith.mulf %85, %89 : vector<32x32xf32>
    %91 = vector.broadcast %74 : vector<1x32xf32> to vector<32x32xf32>
    %92 = arith.mulf %26, %91 : vector<32x32xf32>
    %cst_55 = arith.constant dense<0.000000e+00> : vector<32x32xf32>
    %93 = tpu.matmul %90, %92, %cst_55 {dimension_numbers = #tpu.dot_dimension_numbers<[1], [0], [0], [1], [0, 0, 1, 1], [], []>, precision = #tpu.contract_precision<fp32>} : vector<32x32xf32>, vector<32x32xf32>, vector<32x32xf32> -> vector<32x32xf32>
    %94 = arith.addf %72, %93 : vector<32x32xf32>
    %c3 = arith.constant 3 : index
    %c0_56 = arith.constant 0 : index
    %c0_57 = arith.constant 0 : index
    %95 = vector.load %arg6[%c3, %c0_56, %c0_57] : memref<4x1x32xf32, #tpu.memory_space<vmem>>, vector<1x1x32xf32>
    %96 = vector.shape_cast %95 : vector<1x1x32xf32> to vector<1x32xf32>
    %97 = vector.broadcast %96 : vector<1x32xf32> to vector<32x32xf32>
    %98 = arith.mulf %8, %97 : vector<32x32xf32>
    %cst_58 = arith.constant dense<0.000000e+00> : vector<32x32xf32>
    %99 = tpu.matmul %98, %17, %cst_58 {dimension_numbers = #tpu.dot_dimension_numbers<[1], [1], [0], [0], [0, 0, 1, 0], [], []>, precision = #tpu.contract_precision<fp32>} : vector<32x32xf32>, vector<32x32xf32>, vector<32x32xf32> -> vector<32x32xf32>
    %cst_59 = arith.constant 0.176776692 : f32
    %100 = vector.broadcast %cst_59 : f32 to vector<32x32xf32>
    %101 = arith.mulf %99, %100 : vector<32x32xf32>
    %102 = arith.addf %101, %27 : vector<32x32xf32>
    %cst_60 = arith.constant dense<0xFF800000> : vector<32xf32>
    %103 = vector.multi_reduction <maximumf>, %102, %cst_60 [0] : vector<32x32xf32> to vector<32xf32>
    %104 = vector.shape_cast %103 : vector<32xf32> to vector<1x32xf32>
    %105 = vector.broadcast %104 : vector<1x32xf32> to vector<32x32xf32>
    %106 = arith.subf %102, %105 : vector<32x32xf32>
    %107 = math.exp %106 : vector<32x32xf32>
    %cst_61 = arith.constant dense<0.000000e+00> : vector<32xf32>
    %108 = vector.multi_reduction <add>, %107, %cst_61 [0] : vector<32x32xf32> to vector<32xf32>
    %109 = vector.shape_cast %108 : vector<32xf32> to vector<1x32xf32>
    %110 = tpu.reciprocal %109 : vector<1x32xf32> -> vector<1x32xf32>
    %111 = vector.broadcast %110 : vector<1x32xf32> to vector<32x32xf32>
    %112 = arith.mulf %107, %111 : vector<32x32xf32>
    %113 = vector.broadcast %96 : vector<1x32xf32> to vector<32x32xf32>
    %114 = arith.mulf %26, %113 : vector<32x32xf32>
    %cst_62 = arith.constant dense<0.000000e+00> : vector<32x32xf32>
    %115 = tpu.matmul %112, %114, %cst_62 {dimension_numbers = #tpu.dot_dimension_numbers<[1], [0], [0], [1], [0, 0, 1, 1], [], []>, precision = #tpu.contract_precision<fp32>} : vector<32x32xf32>, vector<32x32xf32>, vector<32x32xf32> -> vector<32x32xf32>
    %116 = arith.addf %94, %115 : vector<32x32xf32>
    %c0_63 = arith.constant 0 : index
    %c0_64 = arith.constant 0 : index
    %117 = vector.load %arg4[%c0_63, %c0_64] : memref<32x32xf32, #tpu.memory_space<vmem>>, vector<32x32xf32>
    %cst_65 = arith.constant dense<0.000000e+00> : vector<32x32xf32>
    %118 = tpu.matmul %116, %117, %cst_65 {dimension_numbers = #tpu.dot_dimension_numbers<[1], [0], [0], [1], [0, 0, 1, 1], [], []>, precision = #tpu.contract_precision<fp32>} : vector<32x32xf32>, vector<32x32xf32>, vector<32x32xf32> -> vector<32x32xf32>
    %c0_66 = arith.constant 0 : index
    %c0_67 = arith.constant 0 : index
    %119 = vector.load %arg5[%c0_66, %c0_67] : memref<1x32xf32, #tpu.memory_space<vmem>>, vector<1x32xf32>
    %120 = vector.broadcast %119 : vector<1x32xf32> to vector<32x32xf32>
    %121 = arith.addf %118, %120 : vector<32x32xf32>
    %c0_68 = arith.constant 0 : index
    %c0_69 = arith.constant 0 : index
    %c0_70 = arith.constant 0 : index
    %122 = vector.load %arg8[%c0_68, %c0_69, %c0_70] : memref<1x32x32xf32, #tpu.memory_space<vmem>>, vector<1x32x32xf32>
    %123 = vector.shape_cast %122 : vector<1x32x32xf32> to vector<32x32xf32>
    %124 = vector.shape_cast %121 : vector<32x32xf32> to vector<1x32x32xf32>
    tpu.vector_store %arg8[%c0_68, %c0_69, %c0_70], %124 {strides = array<i32>} : memref<1x32x32xf32, #tpu.memory_space<vmem>>, vector<1x32x32xf32>,
    return
  }
  func.func @transform_0(%arg0: i32) -> (i32, i32, i32, i32) {
    %c0_i32 = arith.constant 0 : i32
    %c0_i32_0 = arith.constant 0 : i32
    %c0_i32_1 = arith.constant 0 : i32
    %c0_i32_2 = arith.constant 0 : i32
    return %arg0, %c0_i32, %c0_i32_0, %c0_i32_1 : i32, i32, i32, i32
  }
  func.func @transform_1(%arg0: i32) -> (i32, i32, i32) {
    %c0_i32 = arith.constant 0 : i32
    %c0_i32_0 = arith.constant 0 : i32
    %c0_i32_1 = arith.constant 0 : i32
    %c0_i32_2 = arith.constant 0 : i32
    return %c0_i32, %c0_i32_0, %c0_i32_1 : i32, i32, i32
  }
  func.func @transform_2(%arg0: i32) -> (i32, i32, i32) {
    %c0_i32 = arith.constant 0 : i32
    %c0_i32_0 = arith.constant 0 : i32
    %c0_i32_1 = arith.constant 0 : i32
    %c0_i32_2 = arith.constant 0 : i32
    return %c0_i32, %c0_i32_0, %c0_i32_1 : i32, i32, i32
  }
  func.func @transform_3(%arg0: i32) -> (i32, i32) {
    %c0_i32 = arith.constant 0 : i32
    %c0_i32_0 = arith.constant 0 : i32
    %c0_i32_1 = arith.constant 0 : i32
    return %c0_i32, %c0_i32_0 : i32, i32
  }
  func.func @transform_4(%arg0: i32) -> (i32, i32) {
    %c0_i32 = arith.constant 0 : i32
    %c0_i32_0 = arith.constant 0 : i32
    %c0_i32_1 = arith.constant 0 : i32
    return %c0_i32, %c0_i32_0 : i32, i32
  }
  func.func @transform_5(%arg0: i32) -> (i32, i32, i32) {
    %c0_i32 = arith.constant 0 : i32
    %c0_i32_0 = arith.constant 0 : i32
    %c0_i32_1 = arith.constant 0 : i32
    %c0_i32_2 = arith.constant 0 : i32
    return %c0_i32, %c0_i32_0, %c0_i32_1 : i32, i32, i32
  }
  func.func @transform_6(%arg0: i32) -> (i32, i32) {
    %c0_i32 = arith.constant 0 : i32
    %c0_i32_0 = arith.constant 0 : i32
    %c0_i32_1 = arith.constant 0 : i32
    return %c0_i32, %c0_i32_0 : i32, i32
  }
  func.func @transform_7(%arg0: i32) -> (i32, i32, i32) {
    %c0_i32 = arith.constant 0 : i32
    %c0_i32_0 = arith.constant 0 : i32
    %c0_i32_1 = arith.constant 0 : i32
    return %arg0, %c0_i32, %c0_i32_0 : i32, i32, i32
  }
}

</mosaic_0001>

<bundles_post_ra>
// kernel: tpu_custom_call.1
= control target key start
LH: loop header
LB: loop body
LE: loop exit
PB: predicated region body
PF: predicated region fallthrough
CT: control target
= control target key end

     0   :  { %s12264_s0 = inlined_call_operand.hbm [shape: f32[2,3,32,32], index: 0, kind: input, shape index: {}]   ;;  %s12265_s1 = inlined_call_operand.hbm [shape: f32[3,32,32], index: 1, kind: input, shape index: {}]   ;;  %s12266_s2 = inlined_call_operand.vmem [shape: f32[3,1,32], index: 2, kind: input, shape index: {}]   ;;  %s12267_s3 = inlined_call_operand.hbm [shape: f32[32,32], index: 3, kind: input, shape index: {}]   ;;  %s12268_s4 = inlined_call_operand.hbm [shape: f32[1,32], index: 4, kind: input, shape index: {}]   ;;  %s12269_s5 = inlined_call_operand.vmem [shape: f32[4,1,32], index: 5, kind: input, shape index: {}]   ;;  %s12270_s6 = inlined_call_operand.hbm [shape: f32[32,32], index: 6, kind: input, shape index: {}]   ;;  %s12271_s7 = inlined_call_operand.hbm [shape: f32[2,32,32], index: 7, kind: output, shape index: {}]  }
   0x1   :  { %12300 = sst [smem:[#allocation26_spill]] %s12265_s1 }
   0x2   :  { %12 = vsyncpa [#allocation3], 0 }
   0x3   :  { %14 = vsyncpa [#allocation3 + $0x1], 0 }
   0x4   :  { %15 = vsyncpa [#allocation6], 0 }
   0x5   :  { %16 = vsyncpa [#allocation9], 0 }
   0x6   :  { %17 = vsyncpa [#allocation4], 0 }
   0x7   :  { %19 = vsyncpa [#allocation4 + $0x1], 0  ;;  %s10368_s24 = smov 0   ;;  %s10370_s25 = smov 0  }
   0x8   :  { %s10372_s26 = smov 0   ;;  %s10374_s27 = smov 0  }
   0x9 LB: > { %s10389_s28 = sadd.s32 4294967295, %s10316_s27   ;;  %s8348_s29 = sadd.s32 4294967294, %s10316_s27   ;;  %s10316_s27 = sphi %s10374_s27, %s12354_s27   ;;  %s10312_s26 = sphi %s10372_s26, %s12353_s26   ;;  %s10308_s25 = sphi %s10370_s25, %s12352_s25   ;;  %s10304_s24 = sphi %s10368_s24, %s12351_s24  }
   0xa   : > { %p45_p0 = scmp.ne.s32.totalorder %s10308_s25, %s10304_s24  ;;  %p12272_p1 = scmp.eq.s32.totalorder %s10389_s28, 0 }
   0xb   : > { %p201_p3 = scmp.eq.s32.totalorder %s8348_s29, 1  ;;  %p8349_p5 = scmp.ge.s32.totalorder %s10316_s27, 1 }
   0xc   : > { %p10398_p4 = por %p12272_p1, %p45_p0  ;;  %p208_p7 = scmp.lt.s32.totalorder %s10316_s27, 3 }
   0xd   : > { %p10403_p6 = por %p201_p3, %p45_p0  ;;  %s10318_s10 = smov [#allocation5]  }
   0xe   : > { %s12301_s30 = scalar_select %p10398_p4, 1, 0 }
   0xf   : > { %s12302_s8 = scalar_select %p10403_p6, 1, 0 }
  0x10   : > { %p10408_p8 = pnand %p8349_p5, %p208_p7  ;;  %s220_s11 = sshll.u32 %s10318_s10, 4  ;;  %s221_s11 = int_to_ptr.vmem [resolvable:$true] %s220_s11 }
  0x11   : > { %s10319_s13 = smov [#allocation8]   ;;  %s10320_s15 = smov [#allocation7]  }
  0x12   : > { %s12303_s9 = scalar_select %p10408_p8, 1, 0 }
  0x13   : > { %p9996_p9 = pneg %p10408_p8  ;;  %s250_s14 = sshll.u32 %s10319_s13, 4  ;;  %s251_s14 = int_to_ptr.vmem [resolvable:$true] %s250_s14 }
  0x14   : > { %s236_s16 = sshll.u32 %s10320_s15, 4  ;;  %s10123_s17 = scalar_lea.vmem %s221_s11, 1536  ;;  %s237_s16 = int_to_ptr.vmem [resolvable:$true] %s236_s16 }
  0x15   : > { %p10417_p11 = pnand %p9996_p9, %p12272_p1  ;;  %p10124_p13 = scmp.ne.s32.totalorder %s221_s11, %s10123_s17 }
  0x16   : > { %p10131_p5 = scmp.lt.s32.totalorder %s221_s11, %s221_s11  ;;  %p10132_p7 = scmp.lt.s32.totalorder %s10123_s17, %s10123_s17 }
  0x17   : > { %p10114_p12 = pneg %p10417_p11 }
  0x18   : > { %p10133_p9 = por %p10132_p7, %p10131_p5 }
  0x19   : > { %p10126_p0 = pnand %p10124_p13, %p10114_p12 }
  0x1b   : > { %p10127_p3 = pneg %p10126_p0 }
  0x1d   : > { %p10134_p10 = pnand %p10133_p9, %p10127_p3 }
  0x1f   : > { %10137 = shalt.err (!%p10134_p10)
}
  0x20   : > { %s12274_s18 = smov 128   ;;  %s12275_s19 = smov 8  }
  0x21   : > { %s12305_s1 = sld [smem:[#allocation26_spill]]  ;;  %s10149_s22 = scalar_lea.vmem %s251_s14, 16 }
  0x22   : > { %p10150_p13 = scmp.ne.s32.totalorder %s251_s14, %s10149_s22  ;;  %s10156_s23 = scalar_lea.vmem %s251_s14, 32 }
  0x23   : > { %p10157_p10 = scmp.lt.s32.totalorder %s251_s14, %s251_s14  ;;  %p10158_p3 = scmp.lt.s32.totalorder %s10156_s23, %s10149_s22 }
  0x24   : > { %p10152_p0 = pnand %p10150_p13, %p10114_p12 }
  0x25   : > { %p10159_p7 = por %p10158_p3, %p10157_p10 }
  0x26   : > { %p10153_p5 = pneg %p10152_p0 }
  0x27   : > { %9999 = dma.hbm_to_vmem [thread:$0]  (!%p10417_p11), %s12305_s1, 1536, %s221_s11, [#allocation6], %s12274_s18, %s12274_s18, %s12275_s19  }
  0x28   : > { %p10160_p9 = pnand %p10159_p7, %p10153_p5 }
  0x2a   : > { %10163 = shalt.err (!%p10160_p9)
}
  0x2b   : > { %10005 = dma.hbm_to_vmem [thread:$0]  (!%p10417_p11), %s12268_s4, 16, %s251_s14, [#allocation9]  }
  0x2c   : > { %s10175_s11 = scalar_lea.vmem %s237_s16, 512  ;;  %p10183_p2 = scmp.lt.s32.totalorder %s237_s16, %s237_s16 }
  0x2d   : > { %p10176_p1 = scmp.ne.s32.totalorder %s237_s16, %s10175_s11  ;;  %p10184_p6 = scmp.lt.s32.totalorder %s10175_s11, %s10175_s11 }
  0x2f   : > { %p10178_p13 = pnand %p10176_p1, %p10114_p12  ;;  %p10185_p4 = por %p10184_p6, %p10183_p2 }
  0x31   : > { %p10179_p0 = pneg %p10178_p13 }
  0x33   : > { %p10186_p10 = pnand %p10185_p4, %p10179_p0 }
  0x35   : > { %10189 = shalt.err (!%p10186_p10)
}
  0x36   : > { %10002 = dma.hbm_to_vmem [thread:$0]  (!%p10417_p11), %s12267_s3, 512, %s237_s16, [#allocation6], %s12274_s18, %s12274_s18, %s12275_s19  }
  0x37   : > { %s10323_s14 = smov [#allocation10]  }
  0x38   : > { %s263_s17 = sshll.u32 %s10323_s14, 4  ;;  %s264_s17 = int_to_ptr.vmem [resolvable:$true] %s263_s17 }
  0x39   : > { %s10201_s20 = scalar_lea.vmem %s264_s17, 512  ;;  %p10209_p6 = scmp.lt.s32.totalorder %s264_s17, %s264_s17 }
  0x3a   : > { %p10202_p1 = scmp.ne.s32.totalorder %s264_s17, %s10201_s20  ;;  %p10210_p5 = scmp.lt.s32.totalorder %s10201_s20, %s10201_s20 }
  0x3c   : > { %p10204_p2 = pnand %p10202_p1, %p10114_p12  ;;  %p10211_p3 = por %p10210_p5, %p10209_p6 }
  0x3e   : > { %p10205_p4 = pneg %p10204_p2 }
  0x40   : > { %p10212_p7 = pnand %p10211_p3, %p10205_p4 }
  0x42   : > { %10215 = shalt.err (!%p10212_p7)
}
  0x43   : > { %10008 = dma.hbm_to_vmem [thread:$0]  (!%p10417_p11), %s12270_s6, 512, %s264_s17, [#allocation9], %s12274_s18, %s12274_s18, %s12275_s19  }
  0x44   : > { %s10465_s22 = sadd.s32 1, %s10316_s27   ;;  %s32_s12 = sadd.s32 1, %s10312_s26 }
  0x45   : > { %s29_s23 = ssub.s32 %s10316_s27, %s10465_s22  ;;  %p39_p12 = scmp.ne.s32.totalorder %s10312_s26, %s10308_s25 }
  0x46   : > { %p30_p9 = scmp.eq.s32.totalorder %s29_s23, 0  ;;  %p40_p13 = scmp.eq.s32.totalorder %s10316_s27, 0 }
  0x47   : > { %p12306_p0 = scmp.eq.s32.totalorder %s10389_s28, 1  ;;  %p10021_p1 = scmp.lt.s32.totalorder %s10316_s27, 2 }
  0x48   : > { %s10481_s10 = scalar_select %p30_p9, %s10312_s26, %s32_s12  }
  0x49   : > { %p10475_p10 = por %p12306_p0, %p39_p12  ;;  %p41_p2 = por %p40_p13, %p39_p12 }
  0x4a   : > { %s277_s11 = sand.u32 1, %s10312_s26   ;;  %s9974_s15 = smul.u32 1536, %s10316_s27 }
  0x4b   : > { %s12307_s29 = scalar_select %p10475_p10, 1, 0 }
  0x4c   : > { %s9973_s13 = smul.u32 96, %s277_s11  ;;  %p10485_p11 = pnand %p10021_p1, %p41_p2 }
  0x4d   : > { %s10492_s16 = scalar_lea.hbm %s12264_s0, %s9974_s15  ;;  %s10496_s23 = scalar_lea.sflag [#allocation3], %s277_s11 }
  0x4e   : > { %s281_s21 = scalar_lea.vmem [#allocation2], %s9973_s13  ;;  %s10216_s18 = scalar_lea.hbm %s10492_s16, 1536 }
  0x4f   : > { %s288_s12 = sshll.u32 %s281_s21, 4  ;;  %p10217_p4 = scmp.ne.s32.totalorder %s10492_s16, %s10216_s18  ;;  %s10494_s12 = int_to_ptr.vmem [resolvable:$true] %s288_s12 }
  0x50   : > { %p10218_p6 = pneg %p10485_p11  ;;  %s10221_s15 = scalar_lea.hbm %s12264_s0, 3072 }
  0x51   : > { %p10222_p7 = scmp.lt.s32.totalorder %s10492_s16, %s12264_s0  ;;  %p10223_p12 = scmp.lt.s32.totalorder %s10221_s15, %s10216_s18 }
  0x52   : > { %p10219_p5 = pnand %p10218_p6, %p10217_p4 }
  0x53   : > { %p10224_p9 = por %p10223_p12, %p10222_p7 }
  0x54   : > { %p10220_p3 = pneg %p10219_p5 }
  0x56   : > { %p10225_p13 = pnand %p10224_p9, %p10220_p3 }
  0x58   : > { %10228 = shalt.err (!%p10225_p13)
}
  0x59   : > { %s10229_s11 = scalar_lea.vmem %s10494_s12, 1536  ;;  %s10324_s13 = smov [#allocation2]  }
  0x5a   : > { %p10230_p0 = scmp.ne.s32.totalorder %s10494_s12, %s10229_s11  ;;  %s10234_s21 = sshll.u32 %s10324_s13, 4  ;;  %s10235_s21 = int_to_ptr.vmem [resolvable:$false] %s10234_s21 }
  0x5b   : > { %s10236_s19 = scalar_lea.vmem %s10235_s21, 3072  ;;  %p10237_p4 = scmp.lt.s32.totalorder %s10494_s12, %s10235_s21 }
  0x5c   : > { %p10232_p1 = pnand %p10230_p0, %p10218_p6  ;;  %p10238_p5 = scmp.lt.s32.totalorder %s10236_s19, %s10229_s11 }
  0x5e   : > { %p10233_p2 = pneg %p10232_p1  ;;  %p10239_p10 = por %p10238_p5, %p10237_p4 }
  0x60   : > { %p10240_p8 = pnand %p10239_p10, %p10233_p2 }
  0x62   : > { %10243 = shalt.err (!%p10240_p8)
}
  0x63   : > { %s12309_s1 = smov 8   ;;  %s12310_s18 = smov 128  }
  0x64   : > { %10012 = dma.hbm_to_vmem [thread:$0]  (!%p10485_p11), %s10492_s16, 1536, %s10494_s12, %s10496_s23, %s12310_s18, %s12310_s18, %s12309_s1  }
  0x65   : > { %p12311_p6 = scmp.ne.s32.totalorder %s12303_s9, 0 }
  0x67   : > { %300 = sbr.rel (%p12311_p6) target bundleno = 2020 (0x7e4), region = 48 }
  0x6c   : > { %s10523_s17 = sand.u32 1, %s10308_s25   ;;  %p12312_p8 = scmp.ne.s32.totalorder %s12301_s30, 0 }
  0x6d   : > { %s9975_s15 = smul.u32 96, %s10523_s17  ;;  %s303_s20 = scalar_lea.sflag [#allocation3], %s10523_s17 }
  0x6f   : > { %s10527_s11 = scalar_lea.vmem [#allocation2], %s9975_s15 }
  0x70   : > { %10287 = dma.done.wait (%p12312_p8), %s303_s20, 1536  }
  0x71   : > { %10289 = vsyncadd (%p12312_p8), %s303_s20, 4294965760  ;;  %p12313_p10 = scmp.eq.s32.totalorder %s10389_s28, 0 }
  0x73   : > { %10291 = dma.done.wait (%p12313_p10), [#allocation6], 2048   ;;  %p12314_p11 = pmov %p12313_p10 }
  0x74   : > { %p12315_p3 = pmov %p12313_p10 }
  0x75   : > { %10293 = vsyncadd (%p12314_p11), [#allocation6], 4294965248 }
  0x76   : > { %10295 = dma.done.wait (%p12315_p3), [#allocation9], 528   ;;  %p12316_p7 = pmov %p12315_p3 }
  0x77   : > { %vm368_vm0 = vcmask 261120   ;;  %v360_v0 = vld [vmem:[#allocation5 + $0x18] sm:$0xff]  ;;  %v359_v1 = vld [vmem:[#allocation5 + $0x10] sm:$0xff]  ;;  %v358_v2 = vld [vmem:[#allocation5 + $0x8] sm:$0xff]  ;;  %s8361_s14 = sshll.u32 %s10523_s17, 5  ;;  %s8388_s23 = sshll.u32 %s10389_s28, 9 }
  0x78   : > { %10297 = vsyncadd (%p12316_p7), [#allocation9], 4294966768  ;;  %v10541_v3 = vand.u32 4294901760, %v360_v0  ;;  %v10543_v4 = vand.u32 4294901760, %v359_v1  ;;  %v10545_v5 = vand.u32 4294901760, %v358_v2  ;;  %v357_v6 = vld [vmem:[#allocation5] sm:$0xff]  ;;  %s12219_s19 = scalar_lea.hbm %s12271_s7, %s8388_s23 }
  0x79   : > { %v353_v7 = vld [vmem:[%s10527_s11] sm:$0xff]  ;;  %v354_v8 = vld [vmem:[%s10527_s11 + $0x8] sm:$0xff]  ;;  %v10549_v9 = vand.u32 4294901760, %v357_v6  ;;  %v355_v12 = vld [vmem:[%s10527_s11 + $0x10] sm:$0xff]  ;;  %s352_s16 = scalar_lea.vmem [#allocation11], %s8361_s14  ;;  %s8224_s28 = scalar_lea.sflag [#allocation4], %s10523_s17 }
  0x7a   : > { %v370_v10 = vsel %vm368_vm0, %v353_v7, 0  ;;  %v373_v11 = vsel %vm368_vm0, %v354_v8, 0  ;;  %v356_v13 = vld [vmem:[%s10527_s11 + $0x18] sm:$0xff]  ;;  %8965 = vmatprep.subr.mxu0 %v10541_v3  ;;  %v516_v14 = vsub.f32 %v360_v0, %v10541_v3  ;;  %v523_v17 = vsub.f32 %v359_v1, %v10543_v4  ;;  %v8363_v52 = vld [vmem:[%s10527_s11 + $0x20] sm:$0xff]  ;;  %v8364_v53 = vld [vmem:[%s10527_s11 + $0x28] sm:$0xff]  ;;  %s8237_s12 = sshll.u32 %s352_s16, 4  ;;  %s12213_s12 = int_to_ptr.vmem [resolvable:$true] %s8237_s12 }
  0x7b   : > { %v10557_v15 = vand.u32 4294901760, %v370_v10  ;;  %v10559_v16 = vand.u32 4294901760, %v373_v11  ;;  %8966 = vmatpush3.msra.mxu0 %v10541_v3  ;;  %v530_v18 = vsub.f32 %v358_v2, %v10545_v5  ;;  %v376_v19 = vsel %vm368_vm0, %v355_v12, 0  ;;  %v1004_v54 = vld [vmem:[#allocation5 + $0x38] sm:$0xff]  ;;  %v1003_v58 = vld [vmem:[#allocation5 + $0x30] sm:$0xff]  ;;  %v1002_v63 = vld [vmem:[#allocation5 + $0x28] sm:$0xff] }
  0x7c   : > { %v379_v20 = vsel %vm368_vm0, %v356_v13, 0  ;;  %v537_v21 = vsub.f32 %v357_v6, %v10549_v9  ;;  %8967 = vmatprep.subr.mxu0 %v10543_v4  ;;  %v10568_v22 = vand.u32 4294901760, %v516_v14  ;;  %v10576_v25 = vand.u32 4294901760, %v523_v17  ;;  %v8365_v60 = vld [vmem:[%s10527_s11 + $0x30] sm:$0xff]  ;;  %v8366_v0 = vld [vmem:[%s10527_s11 + $0x38] sm:$0xff]  ;;  %v1001_v6 = vld [vmem:[#allocation5 + $0x20] sm:$0xff] }
  0x7d   : > { %v10571_v23 = vsub.f32 %v370_v10, %v10557_v15  ;;  %v10574_v24 = vsub.f32 %v373_v11, %v10559_v16  ;;  %8987 = vmatprep.mubr.f32.mxu1 %v10557_v15  ;;  %8968 = vmatpush3.msra.mxu0 %v10543_v4  ;;  %v10580_v26 = vand.u32 4294901760, %v530_v18  ;;  %v10582_v27 = vand.u32 4294901760, %v376_v19  ;;  %s10244_s1 = scalar_lea.vmem %s12213_s12, 512  ;;  %p12348_p9 = scmp.ne.s32.totalorder %s12307_s29, 0 }
  0x7e   : > { %v10584_v28 = vand.u32 4294901760, %v379_v20  ;;  %v10586_v29 = vand.u32 4294901760, %v537_v21  ;;  %8969 = vmatprep.subr.mxu0 %v10545_v5  ;;  %v518_v30 = vsub.f32 %v516_v14, %v10568_v22  ;;  %v525_v33 = vsub.f32 %v523_v17, %v10576_v25  ;;  %p10245_p12 = scmp.ne.s32.totalorder %s12213_s12, %s10244_s1  ;;  %s10325_s18 = smov [#allocation11]  }
  0x7f   : > { %v452_v31 = vand.u32 4294901760, %v10571_v23  ;;  %v462_v32 = vand.u32 4294901760, %v10574_v24  ;;  %8970 = vmatpush3.msra.mxu0 %v10545_v5  ;;  %v532_v34 = vsub.f32 %v530_v18, %v10580_v26  ;;  %v10596_v35 = vsub.f32 %v376_v19, %v10582_v27  ;;  %s10248_s15 = sshll.u32 %s10325_s18, 4  ;;  %s10249_s15 = int_to_ptr.vmem [resolvable:$false] %s10248_s15 }
  0x80   : > { %v10599_v36 = vsub.f32 %v379_v20, %v10584_v28  ;;  %8971 = vmatprep.subr.mxu0 %v10549_v9  ;;  %v519_v37 = vand.u32 4294901760, %v518_v30  ;;  %v526_v40 = vand.u32 4294901760, %v525_v33  ;;  %v539_v43 = vsub.f32 %v537_v21, %v10586_v29  ;;  %p10246_p13 = pnand %p10245_p12, %p12348_p9  ;;  %s10250_s20 = scalar_lea.vmem %s10249_s15, 1024 }
  0x81   : > { %v453_v38 = vsub.f32 %v10571_v23, %v452_v31  ;;  %v463_v39 = vsub.f32 %v10574_v24, %v462_v32  ;;  %8972 = vmatpush3.msra.mxu0 %v10549_v9  ;;  %v472_v41 = vand.u32 4294901760, %v10596_v35  ;;  %v533_v46 = vand.u32 4294901760, %v532_v34  ;;  %p10251_p1 = scmp.lt.s32.totalorder %s12213_s12, %s10249_s15  ;;  %p10252_p2 = scmp.lt.s32.totalorder %s10250_s20, %s10244_s1 }
  0x82   : > { %v482_v42 = vand.u32 4294901760, %v10599_v36  ;;  %8979 = vmatprep.subr.mxu1 %v519_v37  ;;  %8993 = vmatprep.subr.mxu0 %v516_v14  ;;  %v540_v51 = vand.u32 4294901760, %v539_v43  ;;  %v1014_v55 = vsel %vm368_vm0, %v8363_v52, 0  ;;  %v1017_v56 = vsel %vm368_vm0, %v8364_v53, 0  ;;  %v1645_v52 = vld [vmem:[#allocation5 + $0x40] sm:$0xff]  ;;  %p10247_p0 = pneg %p10246_p13 }
  0x83   : > { %v454_v44 = vand.u32 4294901760, %v453_v38  ;;  %v464_v45 = vand.u32 4294901760, %v463_v39  ;;  %8980 = vmatpush3.msra.mxu1 %v519_v37  ;;  %v473_v47 = vsub.f32 %v10596_v35, %v472_v41  ;;  %v10631_v57 = vand.u32 4294901760, %v1004_v54  ;;  %p10253_p4 = por %p10252_p2, %p10251_p1 }
  0x84   : > { %v483_v48 = vsub.f32 %v10599_v36, %v482_v42  ;;  %8981 = vmatprep.subr.mxu1 %v526_v40  ;;  %v10635_v59 = vand.u32 4294901760, %v1014_v55  ;;  %v10640_v61 = vand.u32 4294901760, %v1017_v56  ;;  %v10644_v62 = vand.u32 4294901760, %v1003_v58 }
  0x85   : > { %8973 = vmatprep.mubr.f32.mxu0 %v454_v44  ;;  %8982 = vmatpush3.msra.mxu1 %v526_v40  ;;  %v474_v49 = vand.u32 4294901760, %v473_v47  ;;  %v10650_v1 = vsub.f32 %v1004_v54, %v10631_v57  ;;  %v1020_v2 = vsel %vm368_vm0, %v8365_v60, 0  ;;  %v10661_v8 = vand.u32 4294901760, %v1002_v63  ;;  %p10254_p5 = pnand %p10253_p4, %p10247_p0 }
  0x86   : > { %8974 = vmatmul.mubr.f32.vlgmr.msra.gmra.mxu0 %v464_v45  ;;  %v484_v50 = vand.u32 4294901760, %v483_v48  ;;  %8983 = vmatprep.subr.mxu1 %v533_v46  ;;  %v10656_v7 = vsub.f32 %v1014_v55, %v10635_v59  ;;  %v10664_v10 = vsub.f32 %v1017_v56, %v10640_v61  ;;  %v1023_v11 = vsel %vm368_vm0, %v8366_v0, 0  ;;  %v1646_v45 = vld [vmem:[#allocation5 + $0x48] sm:$0xff] }
  0x87   : > { %8994 = vmatpush3.msra.mxu0 %v516_v14  ;;  %8976 = vmatprep.mubr.f32.mxu0 %v474_v49  ;;  %v10671_v12 = vsub.f32 %v1003_v58, %v10644_v62  ;;  %v10673_v13 = vand.u32 4294901760, %v1020_v2  ;;  %v10677_v14 = vand.u32 4294901760, %v1001_v6  ;;  %v10685_v19 = vand.u32 4294901760, %v1023_v11  ;;  %v8369_v58 = vld [vmem:[%s10527_s11 + $0x40] sm:$0xff] }
  0x88   : > { %8995 = vmatprep.subr.mxu0 %v523_v17  ;;  %8984 = vmatpush3.msra.mxu1 %v533_v46  ;;  %v1106_v20 = vand.u32 4294901760, %v10664_v10  ;;  %v10822_v48 = vand.u32 4294901760, %v1646_v45  ;;  %v10835_v53 = vand.u32 4294901760, %v1645_v52 }
  0x89   : > { %8996 = vmatpush3.msra.mxu0 %v523_v17  ;;  %8985 = vmatprep.subr.mxu1 %v540_v51  ;;  %v10680_v17 = vand.u32 4294901760, %v10650_v1 }
  0x8a   : > { %8977 = vmatmul.mubr.f32.gmra.mxu0 %v484_v50  ;;  %8997 = vmatprep.subr.mxu0 %v530_v18 }
  0x8b   : > { %8986 = vmatpush3.msra.mxu1 %v540_v51  ;;  %8998 = vmatpush3.msra.mxu0 %v530_v18  ;;  %v1096_v18 = vand.u32 4294901760, %v10656_v7  ;;  %v10832_v51 = vsub.f32 %v1646_v45, %v10822_v48 }
  0x8c   : > { %8988 = vmatmul.mubr.f32.vlgmr.msra.gmra.mxu1 %v10559_v16  ;;  %8999 = vmatprep.subr.mxu0 %v537_v21 }
  0x8d   : > { %9007 = vmatprep.subr.mxu1 %v10541_v3  ;;  %9000 = vmatpush3.msra.mxu0 %v537_v21  ;;  %v10691_v21 = vsub.f32 %v1002_v63, %v10661_v8  ;;  %v10841_v56 = vand.u32 4294901760, %v10832_v51 }
  0x8e   : > { %9001 = vmatprep.mubr.f32.mxu0 %v10571_v23  ;;  %9008 = vmatpush3.msra.mxu1 %v10541_v3  ;;  %v10699_v23 = vsub.f32 %v1020_v2, %v10673_v13 }
  0x8f   : > { %9002 = vmatmul.mubr.f32.vlgmr.msra.gmra.mxu0 %v10574_v24  ;;  %9009 = vmatprep.subr.mxu1 %v10543_v4  ;;  %v1181_v24 = vsub.f32 %v1001_v6, %v10677_v14 }
  0x90   : > { %9021 = vmatprep.subr.mxu0 %v10568_v22  ;;  %8990 = vmatprep.mubr.f32.mxu1 %v10582_v27 }
  0x91   : > { %9010 = vmatpush3.msra.mxu1 %v10543_v4  ;;  %9022 = vmatpush3.msra.mxu0 %v10568_v22  ;;  %v10696_v22 = vand.u32 4294901760, %v10671_v12  ;;  %v10731_v33 = vand.u32 4294901760, %v1181_v24 }
  0x92   : > { %8991 = vmatmul.mubr.f32.gmra.mxu1 %v10584_v28  ;;  %9011 = vmatprep.subr.mxu1 %v10545_v5 }
  0x93   : > { %9023 = vmatprep.subr.mxu0 %v10576_v25  ;;  %9004 = vmatprep.mubr.f32.mxu0 %v10596_v35  ;;  %v1169_v30 = vsub.f32 %v10671_v12, %v10696_v22 }
  0x94   : > { %9012 = vmatpush3.msra.mxu1 %v10545_v5  ;;  %9024 = vmatpush3.msra.mxu0 %v10576_v25  ;;  %v1097_v25 = vsub.f32 %v10656_v7, %v1096_v18 }
  0x95   : > { %9013 = vmatprep.subr.mxu1 %v10549_v9  ;;  %9005 = vmatmul.mubr.f32.gmra.mxu0 %v10599_v36  ;;  %v1170_v37 = vand.u32 4294901760, %v1169_v30 }
  0x96   : > { %9025 = vmatprep.subr.mxu0 %v10580_v26  ;;  %9014 = vmatpush3.msra.mxu1 %v10549_v9  ;;  %v1098_v34 = vand.u32 4294901760, %v1097_v25 }
  0x97   : > { %9015 = vmatprep.mubr.f32.mxu1 %v452_v31  ;;  %9026 = vmatpush3.msra.mxu0 %v10580_v26  ;;  %v10714_v26 = vsub.f32 %v1023_v11, %v10685_v19  ;;  %v1116_v31 = vand.u32 4294901760, %v10699_v23  ;;  %v8372_v11 = vld [vmem:[%s10527_s11 + $0x58] sm:$0xff] }
  0x98   : > { %9016 = vmatmul.mubr.f32.vlgmr.msra.gmra.mxu1 %v462_v32  ;;  %9027 = vmatprep.subr.mxu0 %v10586_v29 }
  0x99   : > { %9035 = vmatprep.subr.mxu1 %v10541_v3  ;;  %9028 = vmatpush3.msra.mxu0 %v10586_v29  ;;  %v10722_v29 = vand.u32 4294901760, %v10691_v21  ;;  %v1126_v35 = vand.u32 4294901760, %v10714_v26  ;;  %v1117_v38 = vsub.f32 %v10699_v23, %v1116_v31 }
  0x9a   : > { %9029 = vmatprep.mubr.f32.mxu0 %v10557_v15  ;;  %9036 = vmatpush3.msra.mxu1 %v10541_v3  ;;  %v1162_v3 = vsub.f32 %v10650_v1, %v10680_v17 }
  0x9b   : > { %9030 = vmatmul.mubr.f32.vlgmr.msra.gmra.mxu0 %v10559_v16  ;;  %9037 = vmatprep.subr.mxu1 %v10543_v4  ;;  %v1176_v36 = vsub.f32 %v10691_v21, %v10722_v29  ;;  %v1118_v39 = vand.u32 4294901760, %v1117_v38 }
  0x9c   : > { %9049 = vmatprep.subr.mxu0 %v10631_v57  ;;  %9018 = vmatprep.mubr.f32.mxu1 %v472_v41  ;;  %v1163_v32 = vand.u32 4294901760, %v1162_v3 }
  0x9d   : > { %9038 = vmatpush3.msra.mxu1 %v10543_v4  ;;  %9050 = vmatpush3.msra.mxu0 %v10631_v57  ;;  %v1107_v4 = vsub.f32 %v10664_v10, %v1106_v20 }
  0x9e   : > { %9019 = vmatmul.mubr.f32.gmra.mxu1 %v482_v42  ;;  %9039 = vmatprep.subr.mxu1 %v10545_v5  ;;  %v1647_v42 = vld [vmem:[#allocation5 + $0x50] sm:$0xff] }
  0x9f   : > { %9051 = vmatprep.subr.mxu0 %v10644_v62  ;;  %9032 = vmatprep.mubr.f32.mxu0 %v10582_v27  ;;  %v10812_v44 = vand.u32 4294901760, %v1647_v42 }
  0xa0   : > { %9040 = vmatpush3.msra.mxu1 %v10545_v5  ;;  %9052 = vmatpush3.msra.mxu0 %v10644_v62  ;;  %v1108_v5 = vand.u32 4294901760, %v1107_v4 }
  0xa1   : > { %9041 = vmatprep.subr.mxu1 %v10549_v9  ;;  %9033 = vmatmul.mubr.f32.gmra.mxu0 %v10584_v28  ;;  %v10820_v47 = vsub.f32 %v1647_v42, %v10812_v44 }
  0xa2   : > { %9053 = vmatprep.subr.mxu0 %v10661_v8  ;;  %9042 = vmatpush3.msra.mxu1 %v10549_v9  ;;  %v1183_v9 = vsub.f32 %v1181_v24, %v10731_v33 }
  0xa3   : > { %9043 = vmatprep.mubr.f32.mxu1 %v10557_v15  ;;  %9054 = vmatpush3.msra.mxu0 %v10661_v8  ;;  %v1127_v15 = vsub.f32 %v10714_v26, %v1126_v35  ;;  %v10829_v50 = vand.u32 4294901760, %v10820_v47 }
  0xa4   : > { %9044 = vmatmul.mubr.f32.vlgmr.msra.gmra.mxu1 %v10559_v16  ;;  %9055 = vmatprep.subr.mxu0 %v10677_v14  ;;  %v1177_v16 = vand.u32 4294901760, %v1176_v36  ;;  %v1184_v40 = vand.u32 4294901760, %v1183_v9 }
  0xa5   : > { %9063 = vmatprep.subr.mxu1 %v1163_v32  ;;  %9056 = vmatpush3.msra.mxu0 %v10677_v14  ;;  %v1128_v41 = vand.u32 4294901760, %v1127_v15  ;;  %v1813_v55 = vsub.f32 %v10820_v47, %v10829_v50 }
  0xa6   : > { %9057 = vmatprep.mubr.f32.mxu0 %v1098_v34  ;;  %9064 = vmatpush3.msra.mxu1 %v1163_v32 }
  0xa7   : > { %9058 = vmatmul.mubr.f32.vlgmr.msra.gmra.mxu0 %v1108_v5  ;;  %9065 = vmatprep.subr.mxu1 %v1170_v37  ;;  %v1814_v60 = vand.u32 4294901760, %v1813_v55 }
  0xa8   : > { %9077 = vmatprep.subr.mxu0 %v10650_v1  ;;  %9046 = vmatprep.mubr.f32.mxu1 %v10582_v27  ;;  %v1648_v27 = vld [vmem:[#allocation5 + $0x58] sm:$0xff] }
  0xa9   : > { %9066 = vmatpush3.msra.mxu1 %v1170_v37  ;;  %9078 = vmatpush3.msra.mxu0 %v10650_v1 }
  0xaa   : > { %9047 = vmatmul.mubr.f32.gmra.mxu1 %v10584_v28  ;;  %9067 = vmatprep.subr.mxu1 %v1177_v16  ;;  %v10807_v28 = vand.u32 4294901760, %v1648_v27 }
  0xab   : > { %9079 = vmatprep.subr.mxu0 %v10671_v12  ;;  %9060 = vmatprep.mubr.f32.mxu0 %v1118_v39 }
  0xac   : > { %9068 = vmatpush3.msra.mxu1 %v1177_v16  ;;  %9080 = vmatpush3.msra.mxu0 %v10671_v12  ;;  %v10810_v43 = vsub.f32 %v1648_v27, %v10807_v28 }
  0xad   : > { %9069 = vmatprep.subr.mxu1 %v1184_v40  ;;  %9061 = vmatmul.mubr.f32.gmra.mxu0 %v1128_v41  ;;  %v8362_v41 = vld [vmem:[%s12266_s2] ss:$0 sm:$0xff] }
  0xae   : > { %9081 = vmatprep.subr.mxu0 %v10691_v21  ;;  %9070 = vmatpush3.msra.mxu1 %v1184_v40  ;;  %v10817_v46 = vand.u32 4294901760, %v10810_v43 }
  0xaf   : > { %9071 = vmatprep.mubr.f32.mxu1 %v10635_v59  ;;  %9082 = vmatpush3.msra.mxu0 %v10691_v21 }
  0xb0   : > { %9072 = vmatmul.mubr.f32.vlgmr.msra.gmra.mxu1 %v10640_v61  ;;  %9083 = vmatprep.subr.mxu0 %v1181_v24  ;;  %v1806_v49 = vsub.f32 %v10810_v43, %v10817_v46 }
  0xb1   : > { %9091 = vmatprep.subr.mxu1 %v10631_v57  ;;  %9084 = vmatpush3.msra.mxu0 %v1181_v24 }
  0xb2   : > { %9085 = vmatprep.mubr.f32.mxu0 %v10656_v7  ;;  %9092 = vmatpush3.msra.mxu1 %v10631_v57  ;;  %v1807_v54 = vand.u32 4294901760, %v1806_v49 }
  0xb3   : > { %9086 = vmatmul.mubr.f32.vlgmr.msra.gmra.mxu0 %v10664_v10  ;;  %9093 = vmatprep.subr.mxu1 %v10644_v62  ;;  %v8371_v10 = vld [vmem:[%s10527_s11 + $0x50] sm:$0xff] }
  0xb4   : > { %9105 = vmatprep.subr.mxu0 %v10680_v17  ;;  %9074 = vmatprep.mubr.f32.mxu1 %v10673_v13  ;;  %v1664_v12 = vsel %vm368_vm0, %v8371_v10, 0 }
  0xb5   : > { %9094 = vmatpush3.msra.mxu1 %v10644_v62  ;;  %9106 = vmatpush3.msra.mxu0 %v10680_v17  ;;  %v10870_v17 = vand.u32 4294901760, %v1664_v12 }
  0xb6   : > { %9075 = vmatmul.mubr.f32.gmra.mxu1 %v10685_v19  ;;  %9095 = vmatprep.subr.mxu1 %v10661_v8 }
  0xb7   : > { %9107 = vmatprep.subr.mxu0 %v10696_v22  ;;  %9088 = vmatprep.mubr.f32.mxu0 %v10699_v23  ;;  %v1759_v25 = vsub.f32 %v1664_v12, %v10870_v17 }
  0xb8   : > { %9096 = vmatpush3.msra.mxu1 %v10661_v8  ;;  %9108 = vmatpush3.msra.mxu0 %v10696_v22 }
  0xb9   : > { %9097 = vmatprep.subr.mxu1 %v10677_v14  ;;  %9089 = vmatmul.mubr.f32.gmra.mxu0 %v10714_v26  ;;  %v1760_v4 = vand.u32 4294901760, %v1759_v25 }
  0xba   : > { %9109 = vmatprep.subr.mxu0 %v10722_v29  ;;  %9098 = vmatpush3.msra.mxu1 %v10677_v14 }
  0xbb   : > { %9099 = vmatprep.mubr.f32.mxu1 %v1096_v18  ;;  %9110 = vmatpush3.msra.mxu0 %v10722_v29  ;;  %v1761_v30 = vsub.f32 %v1759_v25, %v1760_v4 }
  0xbc   : > { %9100 = vmatmul.mubr.f32.vlgmr.msra.gmra.mxu1 %v1106_v20  ;;  %9111 = vmatprep.subr.mxu0 %v10731_v33 }
  0xbd   : > { %9119 = vmatprep.subr.mxu1 %v10631_v57  ;;  %9112 = vmatpush3.msra.mxu0 %v10731_v33  ;;  %v1762_v32 = vand.u32 4294901760, %v1761_v30 }
  0xbe   : > { %9113 = vmatprep.mubr.f32.mxu0 %v10635_v59  ;;  %9120 = vmatpush3.msra.mxu1 %v10631_v57  ;;  %v10844_v57 = vsub.f32 %v1645_v52, %v10835_v53 }
  0xbf   : > { %9114 = vmatmul.mubr.f32.vlgmr.msra.gmra.mxu0 %v10640_v61  ;;  %9121 = vmatprep.subr.mxu1 %v10644_v62 }
  0xc0   : > { %9102 = vmatprep.mubr.f32.mxu1 %v1116_v31  ;;  %9122 = vmatpush3.msra.mxu1 %v10644_v62  ;;  %v1658_v62 = vsel %vm368_vm0, %v8369_v58, 0  ;;  %v10855_v0 = vand.u32 4294901760, %v10844_v57  ;;  %v10929_v58 = vld [vmem:[%s12269_s5] ss:$0 sm:$0xff] }
  0xc1   : > { %9116 = vmatprep.mubr.f32.mxu0 %v10673_v13  ;;  %9103 = vmatmul.mubr.f32.gmra.mxu1 %v1126_v35  ;;  %v10857_v1 = vand.u32 4294901760, %v1658_v62 }
  0xc2   : > { %9123 = vmatprep.subr.mxu1 %v10661_v8  ;;  %9127 = vmatprep.mubr.f32.mxu1 %v10635_v59  ;;  %v8370_v59 = vld [vmem:[%s10527_s11 + $0x48] sm:$0xff]  ;;  %v1827_v6 = vsub.f32 %v10844_v57, %v10855_v0 }
  0xc3   : > { %9124 = vmatpush3.msra.mxu1 %v10661_v8  ;;  %9117 = vmatmul.mubr.f32.gmra.mxu0 %v10685_v19  ;;  %v1661_v63 = vsel %vm368_vm0, %v8370_v59, 0 }
  0xc4   : > { %9125 = vmatprep.subr.mxu1 %v10677_v14  ;;  %9133 = vmatprep.subr.mxu0 %v10807_v28  ;;  %v10863_v7 = vand.u32 4294901760, %v1661_v63  ;;  %v1828_v8 = vand.u32 4294901760, %v1827_v6 }
  0xc5   : > { %9126 = vmatpush3.msra.mxu1 %v10677_v14  ;;  %9134 = vmatpush3.msra.mxu0 %v10807_v28 }
  0xc6   : > { %9128 = vmatmul.mubr.f32.vlgmr.msra.gmra.mxu1 %v10640_v61  ;;  %9135 = vmatprep.subr.mxu0 %v10812_v44  ;;  %v1820_v61 = vsub.f32 %v10832_v51, %v10841_v56  ;;  %v1749_v14 = vsub.f32 %v1661_v63, %v10863_v7 }
  0xc7   : > { %9130 = vmatprep.mubr.f32.mxu1 %v10673_v13  ;;  %9136 = vmatpush3.msra.mxu0 %v10812_v44  ;;  %v1667_v13 = vsel %vm368_vm0, %v8372_v11, 0 }
  0xc8   : > { %9137 = vmatprep.subr.mxu0 %v10822_v48  ;;  %9147 = vmatprep.subr.mxu1 %v1807_v54  ;;  %v1821_v2 = vand.u32 4294901760, %v1820_v61  ;;  %v10874_v18 = vand.u32 4294901760, %v1667_v13  ;;  %v1750_v20 = vand.u32 4294901760, %v1749_v14 }
  0xc9   : > { %9138 = vmatpush3.msra.mxu0 %v10822_v48  ;;  %9148 = vmatpush3.msra.mxu1 %v1807_v54 }
  0xca   : > { %9131 = vmatmul.mubr.f32.gmra.mxu1 %v10685_v19  ;;  %9139 = vmatprep.subr.mxu0 %v10835_v53  ;;  %v1739_v19 = vsub.f32 %v1658_v62, %v10857_v1  ;;  %v1751_v22 = vsub.f32 %v1749_v14, %v1750_v20  ;;  %v1769_v26 = vsub.f32 %v1667_v13, %v10874_v18  ;;  %v8368_v13 = vld [vmem:[%s12266_s2 + $0x1] ss:$0 sm:$0xff] }
  0xcb   : > { %9140 = vmatpush3.msra.mxu0 %v10835_v53  ;;  %9149 = vmatprep.subr.mxu1 %v1814_v60 }
  0xcc   : > { %9161 = vmatprep.subr.mxu0 %v10810_v43  ;;  %9150 = vmatpush3.msra.mxu1 %v1814_v60  ;;  %v1740_v21 = vand.u32 4294901760, %v1739_v19  ;;  %v1752_v3 = vand.u32 4294901760, %v1751_v22  ;;  %v1770_v29 = vand.u32 4294901760, %v1769_v26 }
  0xcd   : > { %9155 = vmatprep.mubr.f32.mxu1 %v10857_v1  ;;  %9151 = vmatprep.subr.mxu1 %v1821_v2 }
  0xce   : > { %9152 = vmatpush3.msra.mxu1 %v1821_v2  ;;  %v1741_v23 = vsub.f32 %v1739_v19, %v1740_v21  ;;  %v1771_v31 = vsub.f32 %v1769_v26, %v1770_v29 }
  0xcf   : > { %9153 = vmatprep.subr.mxu1 %v1828_v8 }
  0xd0   : > { %9154 = vmatpush3.msra.mxu1 %v1828_v8  ;;  %v1742_v24 = vand.u32 4294901760, %v1741_v23  ;;  %v1772_v33 = vand.u32 4294901760, %v1771_v31 }
  0xd1   : > { %9156 = vmatmul.mubr.f32.vlgmr.msra.gmra.mxu1 %v10863_v7  ;;  %9175 = vmatprep.subr.mxu1 %v10807_v28 }
  0xd2   : > { %9176 = vmatpush3.msra.mxu1 %v10807_v28  ;;  %9158 = vmatprep.mubr.f32.mxu1 %v10870_v17 }
  0xd3   : > { %9177 = vmatprep.subr.mxu1 %v10812_v44  ;;  %9141 = vmatprep.mubr.f32.mxu0 %v1742_v24 }
  0xd4   : > { %9178 = vmatpush3.msra.mxu1 %v10812_v44  ;;  %9142 = vmatmul.mubr.f32.vlgmr.msra.gmra.mxu0 %v1752_v3 }
  0xd5   : > { %9159 = vmatmul.mubr.f32.gmra.mxu1 %v10874_v18  ;;  %9179 = vmatprep.subr.mxu1 %v10822_v48 }
  0xd6   : > { %9180 = vmatpush3.msra.mxu1 %v10822_v48  ;;  %9183 = vmatprep.mubr.f32.mxu1 %v1740_v21 }
  0xd7   : > { %9181 = vmatprep.subr.mxu1 %v10835_v53  ;;  %9162 = vmatpush3.msra.mxu0 %v10810_v43 }
  0xd8   : > { %9182 = vmatpush3.msra.mxu1 %v10835_v53  ;;  %9163 = vmatprep.subr.mxu0 %v10820_v47 }
  0xd9   : > { %9184 = vmatmul.mubr.f32.vlgmr.msra.gmra.mxu1 %v1750_v20  ;;  %9203 = vmatprep.subr.mxu1 %v10807_v28 }
  0xda   : > { %9204 = vmatpush3.msra.mxu1 %v10807_v28  ;;  %9186 = vmatprep.mubr.f32.mxu1 %v1760_v4 }
  0xdb   : > { %9205 = vmatprep.subr.mxu1 %v10812_v44  ;;  %9164 = vmatpush3.msra.mxu0 %v10820_v47 }
  0xdc   : > { %9206 = vmatpush3.msra.mxu1 %v10812_v44  ;;  %9165 = vmatprep.subr.mxu0 %v10832_v51 }
  0xdd   : > { %9207 = vmatprep.subr.mxu1 %v10822_v48  ;;  %9187 = vmatmul.mubr.f32.gmra.mxu1 %v1770_v29 }
  0xde   : > { %9208 = vmatpush3.msra.mxu1 %v10822_v48  ;;  %9166 = vmatpush3.msra.mxu0 %v10832_v51 }
  0xdf   : > { %9209 = vmatprep.subr.mxu1 %v10835_v53  ;;  %9167 = vmatprep.subr.mxu0 %v10844_v57 }
  0xe0   : > { %9210 = vmatpush3.msra.mxu1 %v10835_v53  ;;  %9144 = vmatprep.mubr.f32.mxu0 %v1762_v32 }
  0xe1   : > { %9168 = vmatpush3.msra.mxu0 %v10844_v57  ;;  %9211 = vmatprep.mubr.f32.mxu1 %v10857_v1 }
  0xe2   : > { %9145 = vmatmul.mubr.f32.gmra.mxu0 %v1772_v33  ;;  %9189 = vmatprep.subr.mxu0 %v10817_v46 }
  0xe3   : > { %9169 = vmatprep.mubr.f32.mxu0 %v1739_v19  ;;  %9212 = vmatmul.mubr.f32.vlgmr.msra.gmra.mxu1 %v10863_v7 }
  0xe4   : > { %9214 = vmatprep.mubr.f32.mxu1 %v10870_v17 }
  0xe6   : > { %9170 = vmatmul.mubr.f32.vlgmr.msra.gmra.mxu0 %v1749_v14 }
  0xe7   : > { %9190 = vmatpush3.msra.mxu0 %v10817_v46  ;;  %9172 = vmatprep.mubr.f32.mxu0 %v1759_v25 }
  0xe8   : > { %9191 = vmatprep.subr.mxu0 %v10829_v50  ;;  %9215 = vmatmul.mubr.f32.gmra.mxu1 %v10874_v18 }
  0xe9   : > { %9192 = vmatpush3.msra.mxu0 %v10829_v50 }
  0xea   : > { %9173 = vmatmul.mubr.f32.gmra.mxu0 %v1769_v26  ;;  %9193 = vmatprep.subr.mxu0 %v10841_v56 }
  0xeb   : > { %9194 = vmatpush3.msra.mxu0 %v10841_v56  ;;  %9197 = vmatprep.mubr.f32.mxu0 %v10857_v1 }
  0xec   : > { %9195 = vmatprep.subr.mxu0 %v10855_v0 }
  0xed   : > { %9196 = vmatpush3.msra.mxu0 %v10855_v0 }
  0xee   : > { %9198 = vmatmul.mubr.f32.vlgmr.msra.gmra.mxu0 %v10863_v7 }
  0xef   : > { %9200 = vmatprep.mubr.f32.mxu0 %v10870_v17 }
  0xf2   : > { %9201 = vmatmul.mubr.f32.gmra.mxu0 %v10874_v18 }
 0x146   : > { %v8975_v34 = vpop.f32.mrf.mxu0 }
 0x147   : > { %v467_v8 = vadd.f32 %v8975_v34, %v8362_v41 }
 0x148   : > { %v456_v35 = vpop.f32.mrf.mxu0 }
 0x149   : > { %v457_v42 = vadd.f32 %v8362_v41, %v456_v35 }
 0x14a   : > { %v8978_v5 = vpop.f32.mrf.mxu0 }
 0x14b   : > { %v487_v21 = vadd.f32 %v8978_v5, %v8362_v41 }
 0x14c   : > { %v476_v36 = vpop.f32.mrf.mxu0  ;;  %v8989_v37 = vpop.f32.mrf.mxu1 }
 0x14d   : > { %v477_v17 = vadd.f32 %v8362_v41, %v476_v36  ;;  %v584_v18 = vadd.f32 %v8989_v37, %v467_v8 }
 0x14e   : > { %v577_v38 = vpop.f32.mrf.mxu1 }
 0x14f   : > { %v9003_v9 = vpop.f32.mrf.mxu0  ;;  %v578_v45 = vadd.f32 %v577_v38, %v457_v42 }
 0x150   : > { %v683_v25 = vadd.f32 %v9003_v9, %v584_v18 }
 0x151   : > { %v675_v16 = vpop.f32.mrf.mxu0 }
 0x152   : > { %v8992_v15 = vpop.f32.mrf.mxu1  ;;  %v676_v48 = vadd.f32 %v675_v16, %v578_v45 }
 0x153   : > { %v596_v4 = vadd.f32 %v8992_v15, %v487_v21 }
 0x154   : > { %v589_v39 = vpop.f32.mrf.mxu1 }
 0x155   : > { %v9006_v40 = vpop.f32.mrf.mxu0  ;;  %v590_v3 = vadd.f32 %v589_v39, %v477_v17 }
 0x156   : > { %v697_v16 = vadd.f32 %v9006_v40, %v596_v4 }
 0x157   : > { %v689_v27 = vpop.f32.mrf.mxu0 }
 0x158   : > { %v9017_v28 = vpop.f32.mrf.mxu1  ;;  %v690_v32 = vadd.f32 %v689_v27, %v590_v3 }
 0x159   : > { %v782_v33 = vadd.f32 %v9017_v28, %v683_v25 }
 0x15a   : > { %v773_v43 = vpop.f32.mrf.mxu1 }
 0x15b   : > { %v9031_v44 = vpop.f32.mrf.mxu0  ;;  %v774_v50 = vadd.f32 %v773_v43, %v676_v48 }
 0x15c   : > { %v887_v43 = vadd.f32 %v9031_v44, %v782_v33 }
 0x15d   : > { %v880_v47 = vpop.f32.mrf.mxu0 }
 0x15e   : > { %v9020_v46 = vpop.f32.mrf.mxu1  ;;  %v881_v54 = vadd.f32 %v880_v47, %v774_v50 }
 0x15f   : > { %v798_v45 = vadd.f32 %v9020_v46, %v697_v16 }
 0x160   : > { %v789_v49 = vpop.f32.mrf.mxu1 }
 0x161   : > { %v10922_v51 = vpop.f32.mrf.mxu0  ;;  %v790_v37 = vadd.f32 %v789_v49, %v690_v32 }
 0x163   : > { %v892_v52 = vpop.f32.mrf.mxu0 }
 0x164   : > { %v9045_v53 = vpop.f32.mrf.mxu1  ;;  %v893_v50 = vadd.f32 %v892_v52, %v790_v37 }
 0x166   : > { %v973_v55 = vpop.f32.mrf.mxu1 }
 0x167   : > { %v9059_v56 = vpop.f32.mrf.mxu0  ;;  %v10924_v57 = vadd.f32 %v973_v55, %v881_v54  ;;  %v10949_v54 = vadd.f32 %v9045_v53, %v887_v43 }
 0x168   : > { %v1111_v22 = vadd.f32 %v9059_v56, %v8368_v13 }
 0x169   : > { %v1100_v60 = vpop.f32.mrf.mxu0  ;;  %v2294_v61 = vmul.f32 %v10929_v58, %v10924_v57  ;;  %v2295_v46 = vmul.f32 %v10929_v58, %v10949_v54 }
 0x16a   : > { %v10931_v59 = vpop.f32.mrf.mxu1  ;;  %v1101_v29 = vadd.f32 %v8368_v13, %v1100_v60  ;;  %v899_v60 = vadd.f32 %v10922_v51, %v798_v45 }
 0x16b   : > { %v2299_v63 = vsel %vm368_vm0, %v2294_v61, 0  ;;  %v2302_v17 = vsel %vm368_vm0, %v2295_v46, 0 }
 0x16c   : > { %v985_v62 = vpop.f32.mrf.mxu1  ;;  %v10936_v1 = vand.u32 4294901760, %v2299_v63  ;;  %v10957_v52 = vadd.f32 %v10931_v59, %v899_v60  ;;  %v10970_v25 = vand.u32 4294901760, %v2302_v17 }
 0x16d   : > { %v9062_v0 = vpop.f32.mrf.mxu0  ;;  %v10951_v56 = vadd.f32 %v985_v62, %v893_v50 }
 0x16e   : > { %9239 = vmatprep.mubr.f32.mxu1 %v10936_v1  ;;  %v10940_v7 = vsub.f32 %v2299_v63, %v10936_v1  ;;  %v1131_v30 = vadd.f32 %v9062_v0, %v8368_v13  ;;  %v2297_v18 = vmul.f32 %v10929_v58, %v10957_v52 }
 0x16f   : > { %v1120_v2 = vpop.f32.mrf.mxu0  ;;  %v2296_v62 = vmul.f32 %v10929_v58, %v10951_v56 }
 0x170   : > { %v9073_v6 = vpop.f32.mrf.mxu1  ;;  %v2393_v12 = vand.u32 4294901760, %v10940_v7  ;;  %v1121_v5 = vadd.f32 %v8368_v13, %v1120_v2  ;;  %v2308_v58 = vsel %vm368_vm0, %v2297_v18, 0 }
 0x171   : > { %v1228_v31 = vadd.f32 %v9073_v6, %v1111_v22  ;;  %v2305_v22 = vsel %vm368_vm0, %v2296_v62, 0  ;;  %v11000_v37 = vand.u32 4294901760, %v2308_v58 }
 0x172   : > { %v1221_v10 = vpop.f32.mrf.mxu1  ;;  %v2394_v14 = vsub.f32 %v10940_v7, %v2393_v12 }
 0x173   : > { %v9087_v11 = vpop.f32.mrf.mxu0  ;;  %v1222_v36 = vadd.f32 %v1221_v10, %v1101_v29  ;;  %v10975_v29 = vand.u32 4294901760, %v2305_v22 }
 0x174   : > { %v2395_v23 = vand.u32 4294901760, %v2394_v14  ;;  %v1327_v41 = vadd.f32 %v9087_v11, %v1228_v31 }
 0x175   : > { %v1319_v20 = vpop.f32.mrf.mxu0 }
 0x176   : > { %v9076_v19 = vpop.f32.mrf.mxu1  ;;  %9225 = vmatprep.mubr.f32.mxu0 %v2395_v23  ;;  %v1320_v9 = vadd.f32 %v1319_v20, %v1222_v36 }
 0x177   : > { %v1240_v42 = vadd.f32 %v9076_v19, %v1131_v30 }
 0x178   : > { %v1233_v24 = vpop.f32.mrf.mxu1 }
 0x179   : > { %v9090_v26 = vpop.f32.mrf.mxu0  ;;  %v1234_v47 = vadd.f32 %v1233_v24, %v1121_v5 }
 0x17a   : > { %v1341_v28 = vadd.f32 %v9090_v26, %v1240_v42 }
 0x17b   : > { %v1333_v34 = vpop.f32.mrf.mxu0 }
 0x17c   : > { %v9101_v35 = vpop.f32.mrf.mxu1  ;;  %v1334_v61 = vadd.f32 %v1333_v34, %v1234_v47  ;;  %v10991_v34 = vsub.f32 %v2302_v17, %v10970_v25 }
 0x17d   : > { %v1426_v15 = vadd.f32 %v9101_v35, %v1327_v41 }
 0x17e   : > { %v1417_v38 = vpop.f32.mrf.mxu1  ;;  %v2403_v45 = vand.u32 4294901760, %v10991_v34 }
 0x17f   : > { %v9115_v39 = vpop.f32.mrf.mxu0  ;;  %v1418_v55 = vadd.f32 %v1417_v38, %v1320_v9  ;;  %v11003_v38 = vsub.f32 %v2305_v22, %v10975_v29  ;;  %v11024_v9 = vsub.f32 %v2308_v58, %v11000_v37 }
 0x180   : > { %v1531_v63 = vadd.f32 %v9115_v39, %v1426_v15 }
 0x181   : > { %v1524_v48 = vpop.f32.mrf.mxu0  ;;  %v9104_v27 = vpop.f32.mrf.mxu1  ;;  %v2413_v47 = vand.u32 4294901760, %v11003_v38 }
 0x182   : > { %v1442_v44 = vadd.f32 %v9104_v27, %v1341_v28  ;;  %v1525_v53 = vadd.f32 %v1524_v48, %v1418_v55  ;;  %v2404_v27 = vsub.f32 %v10991_v34, %v2403_v45  ;;  %v2423_v28 = vand.u32 4294901760, %v11024_v9 }
 0x183   : > { %v1433_v49 = vpop.f32.mrf.mxu1  ;;  %v9118_v40 = vpop.f32.mrf.mxu0  ;;  %v2414_v55 = vsub.f32 %v11003_v38, %v2413_v47 }
 0x184   : > { %v1434_v2 = vadd.f32 %v1433_v49, %v1334_v61  ;;  %v1543_v11 = vadd.f32 %v9118_v40, %v1442_v44  ;;  %v2405_v60 = vand.u32 4294901760, %v2404_v27  ;;  %v2424_v61 = vsub.f32 %v11024_v9, %v2423_v28 }
 0x185   : > { %v1536_v8 = vpop.f32.mrf.mxu0 }
 0x186   : > { %v9129_v0 = vpop.f32.mrf.mxu1  ;;  %v1537_v59 = vadd.f32 %v1536_v8, %v1434_v2  ;;  %v2425_v46 = vand.u32 4294901760, %v2424_v61 }
 0x187   : > { %v1624_v6 = vadd.f32 %v9129_v0, %v1531_v63  ;;  %v2415_v63 = vand.u32 4294901760, %v2414_v55 }
 0x188   : > { %v1617_v10 = vpop.f32.mrf.mxu1 }
 0x189   : > { %v2314_v51 = vsel %vm368_vm0, %v1624_v6, 0  ;;  %v1618_v13 = vadd.f32 %v1617_v10, %v1525_v53  ;;  %v11079_v53 = vld [vmem:[%s12269_s5 + $0x1] ss:$0 sm:$0xff] }
 0x18a   : > { %v9132_v14 = vpop.f32.mrf.mxu1  ;;  %v10965_v20 = vand.u32 4294901760, %v2314_v51  ;;  %v2999_v2 = vmul.f32 %v11079_v53, %v10924_v57  ;;  %v3001_v17 = vmul.f32 %v11079_v53, %v10951_v56 }
 0x18b   : > { %v1636_v19 = vadd.f32 %v9132_v14, %v1543_v11  ;;  %v2311_v23 = vsel %vm368_vm0, %v1618_v13, 0  ;;  %v3000_v13 = vmul.f32 %v11079_v53, %v10949_v54 }
 0x18c   : > { %v1629_v21 = vpop.f32.mrf.mxu1  ;;  %v10979_v30 = vsub.f32 %v2314_v51, %v10965_v20  ;;  %v10981_v31 = vand.u32 4294901760, %v2311_v23  ;;  %v3004_v8 = vsel %vm368_vm0, %v2999_v2, 0 }
 0x18d   : > { %v2320_v3 = vsel %vm368_vm0, %v1636_v19, 0  ;;  %v1630_v24 = vadd.f32 %v1629_v21, %v1537_v59  ;;  %v11103_v10 = vand.u32 4294901760, %v3004_v8  ;;  %v3007_v19 = vsel %vm368_vm0, %v3000_v13, 0 }
 0x18e   : > { %v10972_v26 = vand.u32 4294901760, %v2320_v3  ;;  %12317 = vst [vmem:[#allocation16_spill] sm:$0xff] %v10979_v30  ;;  %v11006_v16 = vand.u32 4294901760, %v10979_v30  ;;  %v11009_v5 = vsub.f32 %v2311_v23, %v10981_v31  ;;  %v3002_v21 = vmul.f32 %v11079_v53, %v10957_v52 }
 0x18f   : > { %v2317_v4 = vsel %vm368_vm0, %v1630_v24, 0  ;;  %v11116_v14 = vsub.f32 %v3004_v8, %v11103_v10  ;;  %v3010_v23 = vsel %vm368_vm0, %v3001_v17, 0 }
 0x190   : > { %v10984_v32 = vsub.f32 %v2320_v3, %v10972_v26  ;;  %v10986_v33 = vand.u32 4294901760, %v2317_v4  ;;  %9217 = vmatprep.subr.mxu0 %v10972_v26  ;;  %12321 = vst [vmem:[#allocation20_spill] sm:$0xff] %v11006_v16  ;;  %12322 = vst [vmem:[#allocation21_spill] sm:$0xff] %v11009_v5  ;;  %v11028_v15 = vand.u32 4294901760, %v11009_v5  ;;  %v2473_v50 = vsub.f32 %v10979_v30, %v11006_v16 }
 0x191   : > { %9218 = vmatpush3.xpose.msra.mxu0 %v10972_v26  ;;  %v11092_v62 = vpop.f32.mrf.mxu1  ;;  %v3086_v22 = vand.u32 4294901760, %v11116_v14  ;;  %v11141_v3 = vand.u32 4294901760, %v3007_v19 }
 0x192   : > { %12318 = vst [vmem:[#allocation17_spill] sm:$0xff] %v10984_v32  ;;  %v10994_v35 = vand.u32 4294901760, %v10984_v32  ;;  %v10997_v36 = vsub.f32 %v2317_v4, %v10986_v33  ;;  %9219 = vmatprep.subr.mxu0 %v10986_v33  ;;  %12324 = vst [vmem:[#allocation23_spill] sm:$0xff] %v11028_v15  ;;  %v11046_v49 = vand.u32 4294901760, %v2473_v50  ;;  %v2480_v40 = vsub.f32 %v11009_v5, %v11028_v15 }
 0x193   : > { %v3087_v58 = vsub.f32 %v11116_v14, %v3086_v22 }
 0x194   : > { %12319 = vst [vmem:[#allocation18_spill] sm:$0xff] %v10994_v35  ;;  %12320 = vst [vmem:[#allocation19_spill] sm:$0xff] %v10997_v36  ;;  %v11012_v41 = vand.u32 4294901760, %v10997_v36  ;;  %v2459_v42 = vsub.f32 %v10984_v32, %v10994_v35  ;;  %v11057_v44 = vand.u32 4294901760, %v2480_v40  ;;  %v11074_v0 = vpop.f32.mrf.mxu0 }
 0x195   : > { %9220 = vmatpush3.xpose.msra.mxu0 %v10986_v33 }
 0x196   : > { %12323 = vst [vmem:[#allocation22_spill] sm:$0xff] %v11012_v41  ;;  %9221 = vmatprep.subr.mxu0 %v10965_v20  ;;  %v11018_v39 = vand.u32 4294901760, %v2459_v42  ;;  %v2466_v43 = vsub.f32 %v10997_v36, %v11012_v41  ;;  %v11090_v6 = vpop.f32.mrf.mxu0 }
 0x198   : > { %9231 = vmatprep.subr.mxu1 %v11018_v39  ;;  %v11031_v48 = vand.u32 4294901760, %v2466_v43  ;;  %v8374_v43 = vld [vmem:[%s12266_s2 + $0x2] ss:$0 sm:$0xff] }
 0x199   : > { %9222 = vmatpush3.xpose.msra.mxu0 %v10965_v20  ;;  %9232 = vmatpush3.xpose.msra.mxu1 %v11018_v39  ;;  %v1755_v13 = vadd.f32 %v11074_v0, %v8374_v43 }
 0x19a   : > { %9223 = vmatprep.subr.mxu0 %v10981_v31  ;;  %9233 = vmatprep.subr.mxu1 %v11031_v48 }
 0x19d   : > { %9224 = vmatpush3.xpose.msra.mxu0 %v10981_v31  ;;  %9234 = vmatpush3.xpose.msra.mxu1 %v11031_v48 }
 0x19e   : > { %9235 = vmatprep.subr.mxu1 %v11046_v49  ;;  %9245 = vmatprep.subr.mxu0 %v10984_v32 }
 0x1a0   : > { %9226 = vmatmul.mubr.f32.vlgmr.msra.gmra.mxu0 %v2405_v60 }
 0x1a1   : > { %9228 = vmatprep.mubr.f32.mxu0 %v2415_v63  ;;  %9236 = vmatpush3.xpose.msra.mxu1 %v11046_v49 }
 0x1a2   : > { %9246 = vmatpush3.xpose.msra.mxu0 %v10984_v32  ;;  %9237 = vmatprep.subr.mxu1 %v11057_v44 }
 0x1a3   : > { %9247 = vmatprep.subr.mxu0 %v10997_v36 }
 0x1a4   : > { %9229 = vmatmul.mubr.f32.gmra.mxu0 %v2425_v46 }
 0x1a5   : > { %9238 = vmatpush3.xpose.msra.mxu1 %v11057_v44  ;;  %9253 = vmatprep.mubr.f32.mxu0 %v10940_v7  ;;  %v9146_v7 = vpop.f32.mrf.mxu0 }
 0x1a6   : > { %9248 = vmatpush3.xpose.msra.mxu0 %v10997_v36  ;;  %9259 = vmatprep.subr.mxu1 %v10972_v26  ;;  %v1775_v27 = vadd.f32 %v9146_v7, %v8374_v43 }
 0x1a7   : > { %9249 = vmatprep.subr.mxu0 %v10979_v30  ;;  %v1764_v11 = vpop.f32.mrf.mxu0 }
 0x1a8   : > { %9240 = vmatmul.mubr.f32.vlgmr.msra.gmra.mxu1 %v10970_v25  ;;  %v1765_v63 = vadd.f32 %v8374_v43, %v1764_v11  ;;  %v1745_v11 = vadd.f32 %v8374_v43, %v11090_v6 }
 0x1a9   : > { %9242 = vmatprep.mubr.f32.mxu1 %v10975_v29  ;;  %9260 = vmatpush3.xpose.msra.mxu1 %v10972_v26  ;;  %v11128_v59 = vpop.f32.mrf.mxu0 }
 0x1aa   : > { %9250 = vmatpush3.xpose.msra.mxu0 %v10979_v30  ;;  %9261 = vmatprep.subr.mxu1 %v10986_v33 }
 0x1ab   : > { %9251 = vmatprep.subr.mxu0 %v11009_v5  ;;  %v11144_v24 = vpop.f32.mrf.mxu0 }
 0x1ac   : > { %9243 = vmatmul.mubr.f32.gmra.mxu1 %v11000_v37 }
 0x1ad   : > { %9262 = vmatpush3.xpose.msra.mxu1 %v10986_v33  ;;  %9267 = vmatprep.mubr.f32.mxu1 %v2393_v12  ;;  %v11101_v12 = vpop.f32.mrf.mxu1 }
 0x1ae   : > { %9252 = vmatpush3.xpose.msra.mxu0 %v11009_v5  ;;  %9263 = vmatprep.subr.mxu1 %v10965_v20  ;;  %v1866_v6 = vadd.f32 %v11101_v12, %v1745_v11 }
 0x1af   : > { %9273 = vmatprep.subr.mxu0 %v10994_v35  ;;  %v9160_v51 = vpop.f32.mrf.mxu1 }
 0x1b0   : > { %v1884_v46 = vadd.f32 %v9160_v51, %v1775_v27 }
 0x1b1   : > { %9254 = vmatmul.mubr.f32.vlgmr.msra.gmra.mxu0 %v10991_v34  ;;  %9264 = vmatpush3.xpose.msra.mxu1 %v10965_v20  ;;  %v11126_v18 = vpop.f32.mrf.mxu1  ;;  %v11151_v34 = vand.u32 4294901760, %v3010_v23 }
 0x1b2   : > { %9256 = vmatprep.mubr.f32.mxu0 %v11003_v38  ;;  %9274 = vmatpush3.xpose.msra.mxu0 %v10994_v35  ;;  %v11159_v38 = vsub.f32 %v3007_v19, %v11141_v3  ;;  %v1878_v51 = vadd.f32 %v11126_v18, %v1765_v63 }
 0x1b3   : > { %9265 = vmatprep.subr.mxu1 %v10981_v31  ;;  %9275 = vmatprep.subr.mxu0 %v11012_v41  ;;  %v11146_v4 = vpop.f32.mrf.mxu1  ;;  %v11171_v50 = vsub.f32 %v3010_v23, %v11151_v34 }
 0x1b5   : > { %9257 = vmatmul.mubr.f32.gmra.mxu0 %v11024_v9  ;;  %9266 = vmatpush3.xpose.msra.mxu1 %v10981_v31  ;;  %v11168_v9 = vpop.f32.mrf.mxu1  ;;  %v3106_v61 = vand.u32 4294901760, %v11171_v50 }
 0x1b6   : > { %9276 = vmatpush3.xpose.msra.mxu0 %v11012_v41  ;;  %9281 = vmatprep.mubr.f32.mxu0 %v10936_v1 }
 0x1b7   : > { %9277 = vmatprep.subr.mxu0 %v11006_v16  ;;  %9287 = vmatprep.subr.mxu1 %v10972_v26  ;;  %v9188_v60 = vpop.f32.mrf.mxu1 }
 0x1b8   : > { %9268 = vmatmul.mubr.f32.vlgmr.msra.gmra.mxu1 %v2403_v45  ;;  %v9174_v45 = vpop.f32.mrf.mxu0 }
 0x1b9   : > { %9270 = vmatprep.mubr.f32.mxu1 %v2413_v47  ;;  %9288 = vmatpush3.xpose.msra.mxu1 %v10972_v26  ;;  %v3088_v47 = vand.u32 4294901760, %v3087_v58  ;;  %v2077_v8 = vpop.f32.mrf.mxu1  ;;  %v1985_v17 = vadd.f32 %v9174_v45, %v1884_v46  ;;  %v1872_v58 = vadd.f32 %v11092_v62, %v1755_v13  ;;  %v1964_v62 = vadd.f32 %v11144_v24, %v1866_v6 }
 0x1ba   : > { %9278 = vmatpush3.xpose.msra.mxu0 %v11006_v16  ;;  %9289 = vmatprep.subr.mxu1 %v10986_v33  ;;  %v1977_v40 = vpop.f32.mrf.mxu0 }
 0x1bb   : > { %9279 = vmatprep.subr.mxu0 %v11028_v15  ;;  %v1978_v18 = vadd.f32 %v1977_v40, %v1878_v51  ;;  %v1971_v27 = vadd.f32 %v11128_v59, %v1872_v58  ;;  %v2062_v24 = vadd.f32 %v11168_v9, %v1964_v62 }
 0x1bc   : > { %9271 = vmatmul.mubr.f32.gmra.mxu1 %v2423_v28  ;;  %v3096_v28 = vand.u32 4294901760, %v11159_v38  ;;  %v9199_v7 = vpop.f32.mrf.mxu0 }
 0x1bd   : > { %9290 = vmatpush3.xpose.msra.mxu1 %v10986_v33  ;;  %9295 = vmatprep.mubr.f32.mxu1 %v10936_v1  ;;  %v3013_v1 = vsel %vm368_vm0, %v3002_v21, 0  ;;  %v9213_v21 = vpop.f32.mrf.mxu1  ;;  %v2078_v12 = vadd.f32 %v2077_v8, %v1978_v18  ;;  %v2070_v59 = vadd.f32 %v11146_v4, %v1971_v27 }
 0x1be   : > { %9280 = vmatpush3.xpose.msra.mxu0 %v11028_v15  ;;  %9291 = vmatprep.subr.mxu1 %v10965_v20  ;;  %v11163_v42 = vand.u32 4294901760, %v3013_v1  ;;  %v3097_v2 = vsub.f32 %v11159_v38, %v3096_v28  ;;  %v2168_v19 = vpop.f32.mrf.mxu0 }
 0x1bf   : > { %9301 = vmatprep.subr.mxu0 %v10972_v26  ;;  %v2169_v4 = vadd.f32 %v2168_v19, %v2062_v24 }
 0x1c0   : > { %v11180_v55 = vsub.f32 %v3013_v1, %v11163_v42  ;;  %v2086_v1 = vadd.f32 %v9188_v60, %v1985_v17  ;;  %v9202_v45 = vpop.f32.mrf.mxu0 }
 0x1c1   : > { %9282 = vmatmul.mubr.f32.vlgmr.msra.gmra.mxu0 %v10970_v25  ;;  %9292 = vmatpush3.xpose.msra.mxu1 %v10965_v20 }
 0x1c2   : > { %9284 = vmatprep.mubr.f32.mxu0 %v10975_v29  ;;  %9302 = vmatpush3.xpose.msra.mxu0 %v10972_v26  ;;  %v2187_v40 = vadd.f32 %v9202_v45, %v2086_v1  ;;  %v2180_v60 = vpop.f32.mrf.mxu0 }
 0x1c3   : > { %9293 = vmatprep.subr.mxu1 %v10981_v31  ;;  %9303 = vmatprep.subr.mxu0 %v10986_v33  ;;  %v2181_v46 = vadd.f32 %v2180_v60, %v2078_v12 }
 0x1c5   : > { %9285 = vmatmul.mubr.f32.gmra.mxu0 %v11000_v37  ;;  %9294 = vmatpush3.xpose.msra.mxu1 %v10981_v31 }
 0x1c6   : > { %9304 = vmatpush3.xpose.msra.mxu0 %v10986_v33  ;;  %9309 = vmatprep.mubr.f32.mxu0 %v3088_v47  ;;  %v2261_v47 = vpop.f32.mrf.mxu1 }
 0x1c7   : > { %9305 = vmatprep.subr.mxu0 %v10965_v20  ;;  %9315 = vmatprep.subr.mxu1 %v11018_v39 }
 0x1c8   : > { %9296 = vmatmul.mubr.f32.vlgmr.msra.gmra.mxu1 %v10970_v25  ;;  %v3116_v25 = vand.u32 4294901760, %v11180_v55  ;;  %v9216_v63 = vpop.f32.mrf.mxu1 }
 0x1c9   : > { %9298 = vmatprep.mubr.f32.mxu1 %v10975_v29  ;;  %9316 = vmatpush3.xpose.msra.mxu1 %v11018_v39  ;;  %v3107_v29 = vsub.f32 %v11171_v50, %v3106_v61 }
 0x1ca   : > { %9306 = vmatpush3.xpose.msra.mxu0 %v10965_v20  ;;  %9317 = vmatprep.subr.mxu1 %v11031_v48  ;;  %v3117_v0 = vsub.f32 %v11180_v55, %v3116_v25  ;;  %v2273_v8 = vpop.f32.mrf.mxu1 }
 0x1cb   : > { %9307 = vmatprep.subr.mxu0 %v10981_v31  ;;  %v3108_v23 = vand.u32 4294901760, %v3107_v29  ;;  %v2175_v29 = vadd.f32 %v9199_v7, %v2070_v59  ;;  %v11239_v13 = vadd.f32 %v2273_v8, %v2181_v46 }
 0x1cc   : > { %9299 = vmatmul.mubr.f32.gmra.mxu1 %v11000_v37  ;;  %v3098_v37 = vand.u32 4294901760, %v3097_v2  ;;  %v3118_v43 = vand.u32 4294901760, %v3117_v0  ;;  %v11228_v2 = vadd.f32 %v9216_v63, %v2187_v40 }
 0x1cd   : > { %9318 = vmatpush3.xpose.msra.mxu1 %v11031_v48  ;;  %9323 = vmatprep.mubr.f32.mxu1 %v11103_v10  ;;  %v11242_v11 = vadd.f32 %v9213_v21, %v2175_v29  ;;  %v3682_v7 = vmul.f32 %v11079_v53, %v11239_v13 }
 0x1ce   : > { %9308 = vmatpush3.xpose.msra.mxu0 %v10981_v31  ;;  %9319 = vmatprep.subr.mxu1 %v11046_v49  ;;  %v3683_v9 = vmul.f32 %v11079_v53, %v11228_v2 }
 0x1cf   : > { %9329 = vmatprep.subr.mxu0 %v10984_v32  ;;  %v3681_v51 = vmul.f32 %v11079_v53, %v11242_v11  ;;  %v11267_v0 = vand.u32 4294901760, %v3682_v7 }
 0x1d1   : > { %9310 = vmatmul.mubr.f32.vlgmr.msra.gmra.mxu0 %v3098_v37  ;;  %9320 = vmatpush3.xpose.msra.mxu1 %v11046_v49  ;;  %v11273_v19 = vand.u32 4294901760, %v3681_v51  ;;  %v11283_v21 = vsub.f32 %v3682_v7, %v11267_v0 }
 0x1d2   : > { %9312 = vmatprep.mubr.f32.mxu0 %v3108_v23  ;;  %9330 = vmatpush3.xpose.msra.mxu0 %v10984_v32 }
 0x1d3   : > { %9321 = vmatprep.subr.mxu1 %v11057_v44  ;;  %9331 = vmatprep.subr.mxu0 %v10997_v36 }
 0x1d5   : > { %9313 = vmatmul.mubr.f32.gmra.mxu0 %v3118_v43  ;;  %9322 = vmatpush3.xpose.msra.mxu1 %v11057_v44 }
 0x1d6   : > { %9332 = vmatpush3.xpose.msra.mxu0 %v10997_v36  ;;  %9337 = vmatprep.mubr.f32.mxu0 %v11116_v14  ;;  %v11248_v14 = vadd.f32 %v2261_v47, %v2169_v4 }
 0x1d7   : > { %9333 = vmatprep.subr.mxu0 %v10979_v30  ;;  %9343 = vmatprep.subr.mxu1 %v10972_v26 }
 0x1d8   : > { %9324 = vmatmul.mubr.f32.vlgmr.msra.gmra.mxu1 %v11141_v3  ;;  %12325 = vst [vmem:[#allocation24_spill] sm:$0xff] %v11248_v14  ;;  %v3680_v17 = vmul.f32 %v11079_v53, %v11248_v14 }
 0x1d9   : > { %9326 = vmatprep.mubr.f32.mxu1 %v11151_v34  ;;  %9344 = vmatpush3.xpose.msra.mxu1 %v10972_v26 }
 0x1da   : > { %9334 = vmatpush3.xpose.msra.mxu0 %v10979_v30  ;;  %9345 = vmatprep.subr.mxu1 %v10986_v33  ;;  %v11280_v53 = vand.u32 4294901760, %v3680_v17 }
 0x1db   : > { %9335 = vmatprep.subr.mxu0 %v11009_v5 }
 0x1dc   : > { %9327 = vmatmul.mubr.f32.gmra.mxu1 %v11163_v42 }
 0x1dd   : > { %9346 = vmatpush3.xpose.msra.mxu1 %v10986_v33  ;;  %9351 = vmatprep.mubr.f32.mxu1 %v3086_v22  ;;  %v11250_v22 = vand.u32 4294901760, %v3683_v9 }
 0x1de   : > { %9336 = vmatpush3.xpose.msra.mxu0 %v11009_v5  ;;  %9347 = vmatprep.subr.mxu1 %v10965_v20 }
 0x1df   : > { %9357 = vmatprep.subr.mxu0 %v10994_v35  ;;  %v11265_v37 = vsub.f32 %v3683_v9, %v11250_v22 }
 0x1e1   : > { %9338 = vmatmul.mubr.f32.vlgmr.msra.gmra.mxu0 %v11159_v38  ;;  %9348 = vmatpush3.xpose.msra.mxu1 %v10965_v20  ;;  %v11286_v23 = vand.u32 4294901760, %v11265_v37  ;;  %v11292_v38 = vsub.f32 %v3681_v51, %v11273_v19 }
 0x1e2   : > { %9340 = vmatprep.mubr.f32.mxu0 %v11171_v50  ;;  %9358 = vmatpush3.xpose.msra.mxu0 %v10994_v35  ;;  %v11299_v50 = vsub.f32 %v3680_v17, %v11280_v53 }
 0x1e3   : > { %9349 = vmatprep.subr.mxu1 %v10981_v31  ;;  %9359 = vmatprep.subr.mxu0 %v11012_v41 }
 0x1e4   : > { %v11317_v58 = vand.u32 4294901760, %v11299_v50 }
 0x1e5   : > { %9341 = vmatmul.mubr.f32.gmra.mxu0 %v11180_v55  ;;  %9350 = vmatpush3.xpose.msra.mxu1 %v10981_v31  ;;  %v11304_v55 = vand.u32 4294901760, %v11283_v21 }
 0x1e6   : > { %9360 = vmatpush3.xpose.msra.mxu0 %v11012_v41  ;;  %9365 = vmatprep.mubr.f32.mxu0 %v11103_v10  ;;  %v3854_v1 = vsub.f32 %v11299_v50, %v11317_v58 }
 0x1e7   : > { %9361 = vmatprep.subr.mxu0 %v11006_v16  ;;  %9371 = vmatprep.subr.mxu1 %v10972_v26 }
 0x1e8   : > { %9352 = vmatmul.mubr.f32.vlgmr.msra.gmra.mxu1 %v3096_v28  ;;  %v3833_v28 = vsub.f32 %v11265_v37, %v11286_v23  ;;  %v3855_v45 = vand.u32 4294901760, %v3854_v1 }
 0x1e9   : > { %9354 = vmatprep.mubr.f32.mxu1 %v3106_v61  ;;  %9372 = vmatpush3.xpose.msra.mxu1 %v10972_v26  ;;  %v11308_v61 = vand.u32 4294901760, %v11292_v38 }
 0x1ea   : > { %9362 = vmatpush3.xpose.msra.mxu0 %v11006_v16  ;;  %9373 = vmatprep.subr.mxu1 %v10986_v33 }
 0x1eb   : > { %9363 = vmatprep.subr.mxu0 %v11028_v15  ;;  %v3847_v6 = vsub.f32 %v11292_v38, %v11308_v61 }
 0x1ec   : > { %9355 = vmatmul.mubr.f32.gmra.mxu1 %v3116_v25  ;;  %v3840_v25 = vsub.f32 %v11283_v21, %v11304_v55 }
 0x1ed   : > { %9374 = vmatpush3.xpose.msra.mxu1 %v10986_v33  ;;  %9379 = vmatprep.mubr.f32.mxu1 %v11103_v10  ;;  %v3834_v10 = vand.u32 4294901760, %v3833_v28  ;;  %v3848_v43 = vand.u32 4294901760, %v3847_v6 }
 0x1ee   : > { %9364 = vmatpush3.xpose.msra.mxu0 %v11028_v15  ;;  %9375 = vmatprep.subr.mxu1 %v10965_v20  ;;  %v3841_v18 = vand.u32 4294901760, %v3840_v25 }
 0x1ef   : > { %9385 = vmatprep.subr.mxu0 %v11250_v22 }
 0x1f1   : > { %9366 = vmatmul.mubr.f32.vlgmr.msra.gmra.mxu0 %v11141_v3  ;;  %9376 = vmatpush3.xpose.msra.mxu1 %v10965_v20 }
 0x1f2   : > { %9368 = vmatprep.mubr.f32.mxu0 %v11151_v34  ;;  %9377 = vmatprep.subr.mxu1 %v10981_v31 }
 0x1f3   : > { %9386 = vmatpush3.msra.mxu0 %v11250_v22 }
 0x1f4   : > { %9387 = vmatprep.subr.mxu0 %v11267_v0 }
 0x1f5   : > { %9369 = vmatmul.mubr.f32.gmra.mxu0 %v11163_v42  ;;  %9378 = vmatpush3.xpose.msra.mxu1 %v10981_v31 }
 0x1f6   : > { %9388 = vmatpush3.msra.mxu0 %v11267_v0  ;;  %9399 = vmatprep.subr.mxu1 %v3834_v10 }
 0x1f7   : > { %9389 = vmatprep.subr.mxu0 %v11273_v19 }
 0x1f8   : > { %9380 = vmatmul.mubr.f32.vlgmr.msra.gmra.mxu1 %v11141_v3  ;;  %9390 = vmatpush3.msra.mxu0 %v11273_v19 }
 0x1f9   : > { %9382 = vmatprep.mubr.f32.mxu1 %v11151_v34  ;;  %9400 = vmatpush3.msra.mxu1 %v3834_v10 }
 0x1fa   : > { %9401 = vmatprep.subr.mxu1 %v3841_v18  ;;  %9391 = vmatprep.subr.mxu0 %v11280_v53 }
 0x1fb   : > { %9402 = vmatpush3.msra.mxu1 %v3841_v18  ;;  %9392 = vmatpush3.msra.mxu0 %v11280_v53 }
 0x1fc   : > { %9383 = vmatmul.mubr.f32.gmra.mxu1 %v11163_v42  ;;  %9403 = vmatprep.subr.mxu1 %v3848_v43 }
 0x1fd   : > { %9404 = vmatpush3.msra.mxu1 %v3848_v43  ;;  %9413 = vmatprep.subr.mxu0 %v11265_v37 }
 0x1fe   : > { %9405 = vmatprep.subr.mxu1 %v3855_v45 }
 0x1ff   : > { %9406 = vmatpush3.msra.mxu1 %v3855_v45 }
 0x200   : > { %9427 = vmatprep.subr.mxu1 %v11250_v22 }
 0x260   : > { %v9227_v3 = vpop.f32.mrf.mxu0 }
 0x262   : > { %v2397_v34 = vpop.f32.mrf.mxu0 }
 0x264   : > { %v9230_v12 = vpop.f32.mrf.mxu0 }
 0x266   : > { %v2417_v59 = vpop.f32.mrf.mxu0 }
 0x268   : > { %v9241_v47 = vpop.f32.mrf.mxu1 }
 0x269   : > { %v2525_v27 = vadd.f32 %v9241_v47, %v9227_v3 }
 0x26a   : > { %v2518_v62 = vpop.f32.mrf.mxu1 }
 0x26b   : > { %v2519_v40 = vadd.f32 %v2518_v62, %v2397_v34 }
 0x26c   : > { %v9244_v60 = vpop.f32.mrf.mxu1 }
 0x26d   : > { %v2537_v63 = vadd.f32 %v9244_v60, %v9230_v12 }
 0x26e   : > { %v2530_v46 = vpop.f32.mrf.mxu1 }
 0x26f   : > { %v2531_v1 = vadd.f32 %v2530_v46, %v2417_v59 }
 0x271   : > { %v9255_v24 = vpop.f32.mrf.mxu0 }
 0x272   : > { %v2624_v42 = vadd.f32 %v9255_v24, %v2525_v27  ;;  %v11337_v24 = vld [vmem:[#allocation10 + $0x8] sm:$0xff] }
 0x273   : > { %v2616_v8 = vpop.f32.mrf.mxu0 }
 0x274   : > { %v2617_v25 = vadd.f32 %v2616_v8, %v2519_v40  ;;  %v11339_v40 = vld [vmem:[#allocation10] sm:$0xff] }
 0x275   : > { %v9258_v9 = vpop.f32.mrf.mxu0 }
 0x276   : > { %v2638_v43 = vadd.f32 %v9258_v9, %v2537_v63  ;;  %v11342_v9 = vld [vmem:[#allocation10 + $0x18] sm:$0xff] }
 0x277   : > { %v2630_v51 = vpop.f32.mrf.mxu0 }
 0x278   : > { %v9269_v29 = vpop.f32.mrf.mxu1  ;;  %v2631_v47 = vadd.f32 %v2630_v51, %v2531_v1 }
 0x279   : > { %v2723_v4 = vadd.f32 %v9269_v29, %v2624_v42 }
 0x27a   : > { %v2714_v7 = vpop.f32.mrf.mxu1 }
 0x27b   : > { %v2715_v45 = vadd.f32 %v2714_v7, %v2617_v25 }
 0x27c   : > { %v9272_v28 = vpop.f32.mrf.mxu1 }
 0x27d   : > { %v2739_v27 = vadd.f32 %v9272_v28, %v2638_v43 }
 0x27e   : > { %v2730_v6 = vpop.f32.mrf.mxu1 }
 0x27f   : > { %v2731_v29 = vadd.f32 %v2730_v6, %v2631_v47 }
 0x281   : > { %v9283_v17 = vpop.f32.mrf.mxu0 }
 0x282   : > { %v2828_v3 = vadd.f32 %v9283_v17, %v2723_v4 }
 0x283   : > { %v2821_v10 = vpop.f32.mrf.mxu0 }
 0x284   : > { %v2822_v62 = vadd.f32 %v2821_v10, %v2715_v45  ;;  %v11345_v10 = vld [vmem:[#allocation10 + $0x10] sm:$0xff] }
 0x285   : > { %v9286_v18 = vpop.f32.mrf.mxu0 }
 0x286   : > { %v2840_v15 = vadd.f32 %v9286_v18, %v2739_v27 }
 0x287   : > { %v2833_v60 = vpop.f32.mrf.mxu0 }
 0x288   : > { %v9297_v34 = vpop.f32.mrf.mxu1  ;;  %v2834_v59 = vadd.f32 %v2833_v60, %v2731_v29 }
 0x289   : > { %v2921_v12 = vadd.f32 %v9297_v34, %v2828_v3 }
 0x28a   : > { %v2914_v42 = vpop.f32.mrf.mxu1 }
 0x28b   : > { %v2937_v16 = vmul.f32 0.17677669, %v2921_v12  ;;  %v2915_v41 = vadd.f32 %v2914_v42, %v2822_v62 }
 0x28c   : > { %v9300_v8 = vpop.f32.mrf.mxu1 }
 0x28d   : > { %v2941_v63 = vadd.f32 %v2937_v16, %v11337_v24  ;;  %v2936_v46 = vmul.f32 0.17677669, %v2915_v41  ;;  %v2933_v4 = vadd.f32 %v9300_v8, %v2840_v15 }
 0x28e   : > { %v2926_v7 = vpop.f32.mrf.mxu1 }
 0x28f   : > { %v2940_v51 = vadd.f32 %v2936_v46, %v11339_v40  ;;  %v2939_v17 = vmul.f32 0.17677669, %v2933_v4  ;;  %v2927_v28 = vadd.f32 %v2926_v7, %v2834_v59  ;;  %v2945_v25 = vsel %vm368_vm0, %v2941_v63, -inf }
 0x291   : > { %v2944_v6 = vsel %vm368_vm0, %v2940_v51, -inf  ;;  %v2943_v18 = vadd.f32 %v2939_v17, %v11342_v9  ;;  %v2938_v1 = vmul.f32 0.17677669, %v2927_v28  ;;  %v9311_v45 = vpop.f32.mrf.mxu0 }
 0x292   : > { %v2948_v43 = vmax.f32 %v2944_v6, %v2945_v25 }
 0x293   : > { %v2942_v16 = vadd.f32 %v2938_v1, %v11345_v10  ;;  %v2947_v41 = vsel %vm368_vm0, %v2943_v18, -inf  ;;  %v3090_v47 = vpop.f32.mrf.mxu0 }
 0x295   : > { %v2946_v15 = vsel %vm368_vm0, %v2942_v16, -inf  ;;  %v9314_v60 = vpop.f32.mrf.mxu0 }
 0x296   : > { %v2949_v3 = vmax.f32 %v2946_v15, %v2947_v41 }
 0x297   : > { %v3110_v59 = vpop.f32.mrf.mxu0 }
 0x298   : > { %v2950_v34 = vmax.f32 %v2948_v43, %v2949_v3  ;;  %v9325_v12 = vpop.f32.mrf.mxu1 }
 0x29a   : > { %v2951_v27 = vrot.slane %v2950_v34, 4  ;;  %v3211_v8 = vpop.f32.mrf.mxu1 }
 0x29c   : > { %v2952_v62 = vmax.f32 %v2950_v34, %v2951_v27  ;;  %v9328_v17 = vpop.f32.mrf.mxu1 }
 0x29e   : > { %v2953_v42 = vrot.slane %v2952_v62, 2  ;;  %v3223_v3 = vpop.f32.mrf.mxu1 }
 0x29f   : > { %v3224_v30 = vadd.f32 %v3223_v3, %v3110_v59 }
 0x2a0   : > { %v2954_v29 = vmax.f32 %v2952_v62, %v2953_v42 }
 0x2a1   : > { %v9339_v4 = vpop.f32.mrf.mxu0 }
 0x2a2   : > { %v2955_v46 = vrot.slane %v2954_v29, 1 }
 0x2a3   : > { %v3309_v35 = vpop.f32.mrf.mxu0 }
 0x2a4   : > { %v2956_v7 = vmax.f32 %v2954_v29, %v2955_v46  ;;  %v3218_v29 = vadd.f32 %v9325_v12, %v9311_v45 }
 0x2a5   : > { %v9342_v62 = vpop.f32.mrf.mxu0 }
 0x2a6   : > { %v2957_v28 = vsub.f32 %v2940_v51, %v2956_v7  ;;  %v2958_v25 = vsub.f32 %v2941_v63, %v2956_v7  ;;  %v2959_v6 = vsub.f32 %v2942_v16, %v2956_v7  ;;  %v2960_v1 = vsub.f32 %v2943_v18, %v2956_v7 }
 0x2a7   : > { %v3323_v5 = vpop.f32.mrf.mxu0  ;;  %v3212_v63 = vadd.f32 %v3211_v8, %v3090_v47  ;;  %v3317_v16 = vadd.f32 %v9339_v4, %v3218_v29  ;;  %v3230_v7 = vadd.f32 %v9328_v17, %v9314_v60 }
 0x2a8   : > { %v2961_v41 = vmul.f32 1.442695, %v2957_v28  ;;  %v2963_v43 = vmul.f32 1.442695, %v2958_v25  ;;  %v2965_v15 = vmul.f32 1.442695, %v2959_v6  ;;  %v9353_v27 = vpop.f32.mrf.mxu1  ;;  %v3324_v12 = vadd.f32 %v3323_v5, %v3224_v30 }
 0x2a9   : > { %v2967_v34 = vmul.f32 1.442695, %v2960_v1  ;;  %v3310_v28 = vadd.f32 %v3309_v35, %v3212_v63  ;;  %v3416_v25 = vadd.f32 %v9353_v27, %v3317_v16 }
 0x2aa   : > { %10067 = vpow2.f32 %v2961_v41  ;;  %v3407_v42 = vpop.f32.mrf.mxu1 }
 0x2ab   : > { %10069 = vpow2.f32 %v2963_v43  ;;  %v3331_v43 = vadd.f32 %v9342_v62, %v3230_v7  ;;  %v3408_v36 = vadd.f32 %v3407_v42, %v3310_v28 }
 0x2ac   : > { %10071 = vpow2.f32 %v2965_v15  ;;  %v9356_v51 = vpop.f32.mrf.mxu1 }
 0x2ad   : > { %10073 = vpow2.f32 %v2967_v34  ;;  %v3432_v60 = vadd.f32 %v9356_v51, %v3331_v43 }
 0x2ae   : > { %v3423_v1 = vpop.f32.mrf.mxu1 }
 0x2af   : > { %v3424_v62 = vadd.f32 %v3423_v1, %v3324_v12 }
 0x2b1   : > { %v9367_v46 = vpop.f32.mrf.mxu0 }
 0x2b2   : > { %v3521_v15 = vadd.f32 %v9367_v46, %v3416_v25 }
 0x2b3   : > { %v3514_v18 = vpop.f32.mrf.mxu0 }
 0x2b4   : > { %v3515_v4 = vadd.f32 %v3514_v18, %v3408_v36 }
 0x2b5   : > { %v9370_v6 = vpop.f32.mrf.mxu0 }
 0x2b6   : > { %v3533_v46 = vadd.f32 %v9370_v6, %v3432_v60 }
 0x2b7   : > { %v11353_v41 = vpop.eup %10067  ;;  %v3526_v59 = vpop.f32.mrf.mxu0 }
 0x2b8   : > { %v11355_v34 = vpop.eup %10069  ;;  %v2969_v45 = vsel %vm368_vm0, %v11353_v41, 0.0  ;;  %v9381_v47 = vpop.f32.mrf.mxu1  ;;  %v3527_v7 = vadd.f32 %v3526_v59, %v3424_v62 }
 0x2b9   : > { %v10072_v8 = vpop.eup %10071  ;;  %v2970_v35 = vsel %vm368_vm0, %v11355_v34, 0.0  ;;  %v3614_v17 = vadd.f32 %v9381_v47, %v3521_v15 }
 0x2ba   : > { %v10074_v3 = vpop.eup %10073  ;;  %v2971_v27 = vadd.f32 %v2970_v35, %v2969_v45  ;;  %v3607_v42 = vpop.f32.mrf.mxu1  ;;  %v2972_v29 = vsel %vm368_vm0, %v10072_v8, 0.0 }
 0x2bb   : > { %v3608_v63 = vadd.f32 %v3607_v42, %v3515_v4  ;;  %v2974_v5 = vsel %vm368_vm0, %v10074_v3, 0.0  ;;  %v3630_v28 = vmul.f32 0.17677669, %v3614_v17 }
 0x2bc   : > { %v2973_v16 = vadd.f32 %v2972_v29, %v2971_v27  ;;  %v9384_v30 = vpop.f32.mrf.mxu1 }
 0x2bd   : > { %v3629_v25 = vmul.f32 0.17677669, %v3608_v63  ;;  %v3626_v32 = vadd.f32 %v9384_v30, %v3533_v46  ;;  %v3634_v45 = vadd.f32 %v3630_v28, %v11337_v24 }
 0x2be   : > { %v2975_v51 = vadd.f32 %v2974_v5, %v2973_v16  ;;  %v3619_v36 = vpop.f32.mrf.mxu1 }
 0x2bf   : > { %v3633_v18 = vadd.f32 %v3629_v25, %v11339_v40  ;;  %v3632_v43 = vmul.f32 0.17677669, %v3626_v32  ;;  %v3620_v15 = vadd.f32 %v3619_v36, %v3527_v7  ;;  %v3638_v59 = vsel %vm368_vm0, %v3634_v45, -inf }
 0x2c0   : > { %v2976_v1 = vrot.slane %v2975_v51, 4 }
 0x2c1   : > { %v3636_v6 = vadd.f32 %v3632_v43, %v11342_v9  ;;  %v3631_v12 = vmul.f32 0.17677669, %v3620_v15  ;;  %v3637_v35 = vsel %vm368_vm0, %v3633_v18, -inf }
 0x2c2   : > { %v2977_v47 = vadd.f32 %v2976_v1, %v2975_v51  ;;  %v3641_v27 = vmax.f32 %v3637_v35, %v3638_v59 }
 0x2c3   : > { %v3635_v60 = vadd.f32 %v3631_v12, %v11345_v10  ;;  %v3640_v17 = vsel %vm368_vm0, %v3636_v6, -inf }
 0x2c4   : > { %v2978_v4 = vrot.slane %v2977_v47, 2 }
 0x2c5   : > { %v3639_v40 = vsel %vm368_vm0, %v3635_v60, -inf }
 0x2c6   : > { %v2979_v32 = vadd.f32 %v2978_v4, %v2977_v47  ;;  %v3642_v62 = vmax.f32 %v3639_v40, %v3640_v17 }
 0x2c8   : > { %v2980_v42 = vrot.slane %v2979_v32, 1  ;;  %v3643_v24 = vmax.f32 %v3641_v27, %v3642_v62 }
 0x2ca   : > { %v2981_v29 = vadd.f32 %v2980_v42, %v2979_v32  ;;  %v3644_v9 = vrot.slane %v3643_v24, 4 }
 0x2cc   : > { %10075 = vrcp.f32 %v2981_v29  ;;  %v3645_v46 = vmax.f32 %v3643_v24, %v3644_v9 }
 0x2ce   : > { %v3646_v63 = vrot.slane %v3645_v46, 2 }
 0x2d0   : > { %v3647_v16 = vmax.f32 %v3645_v46, %v3646_v63 }
 0x2d2   : > { %v3648_v7 = vrot.slane %v3647_v16, 1 }
 0x2d4   : > { %v3649_v10 = vmax.f32 %v3647_v16, %v3648_v7 }
 0x2d6   : > { %v3650_v30 = vsub.f32 %v3633_v18, %v3649_v10  ;;  %v3651_v5 = vsub.f32 %v3634_v45, %v3649_v10  ;;  %v3652_v28 = vsub.f32 %v3635_v60, %v3649_v10  ;;  %v3653_v25 = vsub.f32 %v3636_v6, %v3649_v10 }
 0x2d8   : > { %v3654_v51 = vmul.f32 1.442695, %v3650_v30  ;;  %v3656_v36 = vmul.f32 1.442695, %v3651_v5  ;;  %v3658_v43 = vmul.f32 1.442695, %v3652_v28 }
 0x2d9   : > { %v10076_v15 = vpop.eup %10075  ;;  %v3660_v1 = vmul.f32 1.442695, %v3653_v25 }
 0x2da   : > { %10077 = vpow2.f32 %v3654_v51  ;;  %v11372_v12 = vmul.f32 %v10076_v15, %v11353_v41  ;;  %v11375_v47 = vmul.f32 %v10076_v15, %v11355_v34  ;;  %v11377_v35 = vmul.f32 %v10076_v15, %v10072_v8 }
 0x2db   : > { %10079 = vpow2.f32 %v3656_v36  ;;  %v11379_v4 = vmul.f32 %v10076_v15, %v10074_v3  ;;  %v10107_v15 = vld [vmem:[%s12269_s5] ss:$0 sm:$0xff] }
 0x2dc   : > { %10081 = vpow2.f32 %v3658_v43 }
 0x2dd   : > { %10083 = vpow2.f32 %v3660_v1  ;;  %v2990_v1 = vmul.f32 %v10107_v15, %v11228_v2 }
 0x2e7   : > { %v10078_v18 = vpop.eup %10077 }
 0x2e8   : > { %v10080_v45 = vpop.eup %10079  ;;  %v3662_v6 = vsel %vm368_vm0, %v10078_v18, 0.0 }
 0x2e9   : > { %v10082_v60 = vpop.eup %10081  ;;  %v3663_v59 = vsel %vm368_vm0, %v10080_v45, 0.0 }
 0x2ea   : > { %v10084_v17 = vpop.eup %10083  ;;  %v3664_v41 = vadd.f32 %v3663_v59, %v3662_v6  ;;  %v3665_v40 = vsel %vm368_vm0, %v10082_v60, 0.0 }
 0x2eb   : > { %v3667_v8 = vsel %vm368_vm0, %v10084_v17, 0.0 }
 0x2ec   : > { %v3666_v34 = vadd.f32 %v3665_v40, %v3664_v41  ;;  %v11417_v40 = vand.u32 4294901760, %v2990_v1 }
 0x2ee   : > { %v3668_v32 = vadd.f32 %v3667_v8, %v3666_v34  ;;  %v2989_v34 = vmul.f32 %v10107_v15, %v11239_v13 }
 0x2f0   : > { %v3669_v27 = vrot.slane %v3668_v32, 4 }
 0x2f2   : > { %v3670_v3 = vadd.f32 %v3669_v27, %v3668_v32  ;;  %v2988_v27 = vmul.f32 %v10107_v15, %v11242_v11 }
 0x2f4   : > { %v3671_v62 = vrot.slane %v3670_v3, 2 }
 0x2f6   : > { %v3672_v42 = vadd.f32 %v3671_v62, %v3670_v3 }
 0x2f8   : > { %v3673_v24 = vrot.slane %v3672_v42, 1 }
 0x2fa   : > { %v3674_v29 = vadd.f32 %v3673_v24, %v3672_v42 }
 0x2fc   : > { %10085 = vrcp.f32 %v3674_v29  ;;  %v11430_v29 = vsub.f32 %v2990_v1, %v11417_v40 }
 0x309   : > { %v10086_v9 = vpop.eup %10085 }
 0x30a   : > { %v3676_v46 = vmul.f32 %v10086_v9, %v10078_v18  ;;  %v3677_v63 = vmul.f32 %v10086_v9, %v10080_v45  ;;  %v3678_v16 = vmul.f32 %v10086_v9, %v10082_v60  ;;  %v3679_v7 = vmul.f32 %v10086_v9, %v10084_v17 }
 0x30b   : > { %v11432_v9 = vand.u32 4294901760, %v2989_v34 }
 0x30c   : > { %v3685_v10 = vsel %vm368_vm0, %v3676_v46, 0  ;;  %v3688_v30 = vsel %vm368_vm0, %v3677_v63, 0  ;;  %v3691_v5 = vsel %vm368_vm0, %v3678_v16, 0  ;;  %v3694_v28 = vsel %vm368_vm0, %v3679_v7, 0 }
 0x30d   : > { %v11389_v25 = vand.u32 4294901760, %v3685_v10  ;;  %v11391_v51 = vand.u32 4294901760, %v3688_v30  ;;  %v11393_v36 = vand.u32 4294901760, %v3691_v5  ;;  %v11395_v43 = vand.u32 4294901760, %v3694_v28 }
 0x30e   : > { %v2987_v46 = vmul.f32 %v10107_v15, %v11248_v14  ;;  %v11437_v63 = vand.u32 4294901760, %v2988_v27 }
 0x30f   : > { %9407 = vmatprep.mubr.f32.mxu1 %v11389_v25  ;;  %v11403_v18 = vsub.f32 %v3688_v30, %v11391_v51  ;;  %v3766_v45 = vsub.f32 %v3685_v10, %v11389_v25  ;;  %v11407_v6 = vsub.f32 %v3691_v5, %v11393_v36  ;;  %v11411_v60 = vsub.f32 %v3694_v28, %v11395_v43 }
 0x310   : > { %9408 = vmatmul.mubr.f32.vlgmr.msra.gmra.mxu1 %v11391_v51  ;;  %v11443_v10 = vsub.f32 %v2989_v34, %v11432_v9  ;;  %v11447_v30 = vand.u32 4294901760, %v11430_v29  ;;  %v11449_v5 = vand.u32 4294901760, %v2987_v46  ;;  %v11453_v28 = vsub.f32 %v2988_v27, %v11437_v63 }
 0x311   : > { %9428 = vmatpush3.msra.mxu1 %v11250_v22  ;;  %9410 = vmatprep.mubr.f32.mxu1 %v11393_v36  ;;  %v3767_v59 = vand.u32 4294901760, %v3766_v45  ;;  %v3777_v17 = vand.u32 4294901760, %v11403_v18  ;;  %v3787_v41 = vand.u32 4294901760, %v11407_v6  ;;  %v3797_v62 = vand.u32 4294901760, %v11411_v60 }
 0x312   : > { %9429 = vmatprep.subr.mxu1 %v11267_v0  ;;  %v11463_v15 = vand.u32 4294901760, %v11443_v10  ;;  %v11466_v1 = vsub.f32 %v2987_v46, %v11449_v5 }
 0x313   : > { %9430 = vmatpush3.msra.mxu1 %v11267_v0  ;;  %v3768_v8 = vsub.f32 %v3766_v45, %v3767_v59  ;;  %v3778_v32 = vsub.f32 %v11403_v18, %v3777_v17  ;;  %v3788_v3 = vsub.f32 %v11407_v6, %v3787_v41  ;;  %v3798_v7 = vsub.f32 %v11411_v60, %v3797_v62 }
 0x314   : > { %9431 = vmatprep.subr.mxu1 %v11273_v19  ;;  %9411 = vmatmul.mubr.f32.gmra.mxu1 %v11395_v43 }
 0x315   : > { %9432 = vmatpush3.msra.mxu1 %v11273_v19  ;;  %9435 = vmatprep.mubr.f32.mxu1 %v3767_v59  ;;  %v3769_v42 = vand.u32 4294901760, %v3768_v8  ;;  %v3779_v24 = vand.u32 4294901760, %v3778_v32  ;;  %v3789_v16 = vand.u32 4294901760, %v3788_v3  ;;  %v4466_v59 = vsub.f32 %v11443_v10, %v11463_v15 }
 0x316   : > { %9433 = vmatprep.subr.mxu1 %v11280_v53 }
 0x317   : > { %9434 = vmatpush3.msra.mxu1 %v11280_v53  ;;  %9393 = vmatprep.mubr.f32.mxu0 %v3769_v42 }
 0x318   : > { %9455 = vmatprep.subr.mxu1 %v11250_v22  ;;  %9394 = vmatmul.mubr.f32.vlgmr.msra.gmra.mxu0 %v3779_v24  ;;  %v11567_v24 = vld [vmem:[%s12269_s5 + $0x2] ss:$0 sm:$0xff] }
 0x319   : > { %9414 = vmatpush3.msra.mxu0 %v11265_v37  ;;  %9436 = vmatmul.mubr.f32.vlgmr.msra.gmra.mxu1 %v3777_v17  ;;  %v3799_v37 = vand.u32 4294901760, %v3798_v7  ;;  %v4944_v46 = vmul.f32 %v11567_v24, %v10924_v57 }
 0x31a   : > { %9456 = vmatpush3.msra.mxu1 %v11250_v22  ;;  %9396 = vmatprep.mubr.f32.mxu0 %v3789_v16  ;;  %v4459_v22 = vsub.f32 %v11430_v29, %v11447_v30  ;;  %v4946_v16 = vmul.f32 %v11567_v24, %v10951_v56 }
 0x31b   : > { %9415 = vmatprep.subr.mxu0 %v11283_v21  ;;  %9438 = vmatprep.mubr.f32.mxu1 %v3787_v41 }
 0x31c   : > { %9457 = vmatprep.subr.mxu1 %v11267_v0  ;;  %9416 = vmatpush3.msra.mxu0 %v11283_v21  ;;  %v4460_v21 = vand.u32 4294901760, %v4459_v22 }
 0x31d   : > { %9458 = vmatpush3.msra.mxu1 %v11267_v0  ;;  %9417 = vmatprep.subr.mxu0 %v11292_v38  ;;  %v11472_v0 = vand.u32 4294901760, %v11453_v28 }
 0x31e   : > { %9459 = vmatprep.subr.mxu1 %v11273_v19  ;;  %9397 = vmatmul.mubr.f32.gmra.mxu0 %v3799_v37 }
 0x31f   : > { %9418 = vmatpush3.msra.mxu0 %v11292_v38  ;;  %9439 = vmatmul.mubr.f32.gmra.mxu1 %v3797_v62  ;;  %v4473_v38 = vsub.f32 %v11453_v28, %v11472_v0 }
 0x320   : > { %9460 = vmatpush3.msra.mxu1 %v11273_v19  ;;  %9419 = vmatprep.subr.mxu0 %v11299_v50  ;;  %v11482_v19 = vand.u32 4294901760, %v11466_v1 }
 0x321   : > { %9421 = vmatprep.mubr.f32.mxu0 %v3766_v45  ;;  %9461 = vmatprep.subr.mxu1 %v11280_v53 }
 0x322   : > { %9463 = vmatprep.mubr.f32.mxu1 %v11389_v25  ;;  %9420 = vmatpush3.msra.mxu0 %v11299_v50  ;;  %v4311_v50 = vsel %vm368_vm0, %v11372_v12, 0  ;;  %v4314_v12 = vsel %vm368_vm0, %v11375_v47, 0 }
 0x323   : > { %9462 = vmatpush3.msra.mxu1 %v11280_v53  ;;  %9441 = vmatprep.subr.mxu0 %v11286_v23  ;;  %v4467_v53 = vand.u32 4294901760, %v4466_v59  ;;  %v11496_v45 = vand.u32 4294901760, %v4311_v50  ;;  %v11505_v17 = vand.u32 4294901760, %v4314_v12 }
 0x324   : > { %9483 = vmatprep.subr.mxu1 %v4460_v21  ;;  %9422 = vmatmul.mubr.f32.vlgmr.msra.gmra.mxu0 %v11403_v18  ;;  %v4480_v18 = vsub.f32 %v11466_v1, %v11482_v19 }
 0x325   : > { %9442 = vmatpush3.msra.mxu0 %v11286_v23  ;;  %9464 = vmatmul.mubr.f32.vlgmr.msra.gmra.mxu1 %v11391_v51  ;;  %v4474_v23 = vand.u32 4294901760, %v4473_v38  ;;  %v11510_v41 = vsub.f32 %v4311_v50, %v11496_v45 }
 0x326   : > { %9484 = vmatpush3.msra.mxu1 %v4460_v21  ;;  %9424 = vmatprep.mubr.f32.mxu0 %v11407_v6  ;;  %v4317_v6 = vsel %vm368_vm0, %v11377_v35, 0  ;;  %v4481_v47 = vand.u32 4294901760, %v4480_v18  ;;  %v4320_v35 = vsel %vm368_vm0, %v11379_v4, 0 }
 0x327   : > { %9443 = vmatprep.subr.mxu0 %v11304_v55  ;;  %9466 = vmatprep.mubr.f32.mxu1 %v11393_v36 }
 0x328   : > { %9485 = vmatprep.subr.mxu1 %v4467_v53  ;;  %9444 = vmatpush3.msra.mxu0 %v11304_v55  ;;  %v11513_v55 = vand.u32 4294901760, %v4317_v6 }
 0x329   : > { %9486 = vmatpush3.msra.mxu1 %v4467_v53  ;;  %9445 = vmatprep.subr.mxu0 %v11308_v61 }
 0x32a   : > { %9487 = vmatprep.subr.mxu1 %v4474_v23  ;;  %9425 = vmatmul.mubr.f32.gmra.mxu0 %v11411_v60  ;;  %v4393_v60 = vand.u32 4294901760, %v11510_v41  ;;  %v11530_v4 = vsub.f32 %v4317_v6, %v11513_v55 }
 0x32b   : > { %9446 = vmatpush3.msra.mxu0 %v11308_v61  ;;  %9467 = vmatmul.mubr.f32.gmra.mxu1 %v11395_v43  ;;  %v11521_v61 = vsub.f32 %v4314_v12, %v11505_v17 }
 0x32c   : > { %9488 = vmatpush3.msra.mxu1 %v4474_v23  ;;  %9447 = vmatprep.subr.mxu0 %v11317_v58  ;;  %v4413_v34 = vand.u32 4294901760, %v11530_v4  ;;  %v12326_v23 = vld [vmem:[#allocation17_spill] sm:$0xff] }
 0x32d   : > { %9449 = vmatprep.mubr.f32.mxu0 %v11389_v25  ;;  %9489 = vmatprep.subr.mxu1 %v4481_v47  ;;  %v11527_v25 = vand.u32 4294901760, %v4320_v35 }
 0x32e   : > { %9491 = vmatprep.mubr.f32.mxu1 %v11496_v45  ;;  %9448 = vmatpush3.msra.mxu0 %v11317_v58  ;;  %v4403_v58 = vand.u32 4294901760, %v11521_v61  ;;  %v4414_v27 = vsub.f32 %v11530_v4, %v4413_v34 }
 0x32f   : > { %9490 = vmatpush3.msra.mxu1 %v4481_v47  ;;  %9469 = vmatprep.subr.mxu0 %v11417_v40  ;;  %v11544_v8 = vsub.f32 %v4320_v35, %v11527_v25 }
 0x330   : > { %9511 = vmatprep.subr.mxu1 %v11417_v40  ;;  %9450 = vmatmul.mubr.f32.vlgmr.msra.gmra.mxu0 %v11391_v51  ;;  %v4394_v51 = vsub.f32 %v11510_v41, %v4393_v60  ;;  %v4415_v62 = vand.u32 4294901760, %v4414_v27 }
 0x331   : > { %9470 = vmatpush3.msra.mxu0 %v11417_v40  ;;  %9492 = vmatmul.mubr.f32.vlgmr.msra.gmra.mxu1 %v11505_v17  ;;  %v4423_v3 = vand.u32 4294901760, %v11544_v8 }
 0x332   : > { %9512 = vmatpush3.msra.mxu1 %v11417_v40  ;;  %9452 = vmatprep.mubr.f32.mxu0 %v11393_v36  ;;  %v4404_v36 = vsub.f32 %v11521_v61, %v4403_v58  ;;  %v4395_v32 = vand.u32 4294901760, %v4394_v51 }
 0x333   : > { %9471 = vmatprep.subr.mxu0 %v11432_v9  ;;  %9494 = vmatprep.mubr.f32.mxu1 %v11513_v55  ;;  %v4424_v42 = vsub.f32 %v11544_v8, %v4423_v3 }
 0x334   : > { %9513 = vmatprep.subr.mxu1 %v11432_v9  ;;  %9472 = vmatpush3.msra.mxu0 %v11432_v9 }
 0x335   : > { %9514 = vmatpush3.msra.mxu1 %v11432_v9  ;;  %9473 = vmatprep.subr.mxu0 %v11437_v63 }
 0x336   : > { %9515 = vmatprep.subr.mxu1 %v11437_v63  ;;  %9453 = vmatmul.mubr.f32.gmra.mxu0 %v11395_v43  ;;  %v4405_v43 = vand.u32 4294901760, %v4404_v36  ;;  %v12329_v36 = vld [vmem:[#allocation21_spill] sm:$0xff] }
 0x337   : > { %9474 = vmatpush3.msra.mxu0 %v11437_v63  ;;  %9495 = vmatmul.mubr.f32.gmra.mxu1 %v11527_v25 }
 0x338   : > { %9516 = vmatpush3.msra.mxu1 %v11437_v63  ;;  %9475 = vmatprep.subr.mxu0 %v11449_v5 }
 0x339   : > { %9477 = vmatprep.mubr.f32.mxu0 %v4395_v32  ;;  %9517 = vmatprep.subr.mxu1 %v11449_v5 }
 0x33a   : > { %9519 = vmatprep.mubr.f32.mxu1 %v4393_v60  ;;  %9476 = vmatpush3.msra.mxu0 %v11449_v5  ;;  %v5627_v60 = vmul.f32 %v11567_v24, %v11239_v13 }
 0x33b   : > { %9518 = vmatpush3.msra.mxu1 %v11449_v5  ;;  %9497 = vmatprep.subr.mxu0 %v11430_v29 }
 0x33c   : > { %9539 = vmatprep.subr.mxu1 %v11417_v40  ;;  %9478 = vmatmul.mubr.f32.vlgmr.msra.gmra.mxu0 %v4405_v43 }
 0x33d   : > { %9498 = vmatpush3.msra.mxu0 %v11430_v29  ;;  %9520 = vmatmul.mubr.f32.vlgmr.msra.gmra.mxu1 %v4403_v58  ;;  %v4425_v29 = vand.u32 4294901760, %v4424_v42  ;;  %v5625_v58 = vmul.f32 %v11567_v24, %v11248_v14 }
 0x33e   : > { %9540 = vmatpush3.msra.mxu1 %v11417_v40  ;;  %9480 = vmatprep.mubr.f32.mxu0 %v4415_v62  ;;  %v4949_v40 = vsel %vm368_vm0, %v4944_v46, 0  ;;  %v12330_v62 = vld [vmem:[#allocation18_spill] sm:$0xff] }
 0x33f   : > { %9499 = vmatprep.subr.mxu0 %v11443_v10  ;;  %9522 = vmatprep.mubr.f32.mxu1 %v4413_v34  ;;  %v11690_v34 = vand.u32 4294901760, %v5627_v60  ;;  %v11698_v32 = vand.u32 4294901760, %v5625_v58 }
 0x340   : > { %9541 = vmatprep.subr.mxu1 %v11432_v9  ;;  %9500 = vmatpush3.msra.mxu0 %v11443_v10 }
 0x341   : > { %9542 = vmatpush3.msra.mxu1 %v11432_v9  ;;  %9501 = vmatprep.subr.mxu0 %v11453_v28  ;;  %v11586_v9 = vand.u32 4294901760, %v4949_v40  ;;  %v11701_v27 = vsub.f32 %v5627_v60, %v11690_v34  ;;  %v11716_v42 = vsub.f32 %v5625_v58, %v11698_v32 }
 0x342   : > { %9543 = vmatprep.subr.mxu1 %v11437_v63  ;;  %9481 = vmatmul.mubr.f32.gmra.mxu0 %v4425_v29  ;;  %v12331_v29 = vld [vmem:[#allocation22_spill] sm:$0xff] }
 0x343   : > { %9502 = vmatpush3.msra.mxu0 %v11453_v28  ;;  %9523 = vmatmul.mubr.f32.gmra.mxu1 %v4423_v3  ;;  %v11601_v7 = vsub.f32 %v4949_v40, %v11586_v9  ;;  %v4955_v28 = vsel %vm368_vm0, %v4946_v16, 0  ;;  %v11723_v46 = vand.u32 4294901760, %v11701_v27 }
 0x344   : > { %9544 = vmatpush3.msra.mxu1 %v11437_v63  ;;  %9503 = vmatprep.subr.mxu0 %v11466_v1  ;;  %v4945_v63 = vmul.f32 %v11567_v24, %v10949_v54  ;;  %v11624_v22 = vand.u32 4294901760, %v4955_v28 }
 0x345   : > { %9505 = vmatprep.mubr.f32.mxu0 %v11510_v41  ;;  %9545 = vmatprep.subr.mxu1 %v11449_v5  ;;  %v5628_v41 = vmul.f32 %v11567_v24, %v11228_v2  ;;  %v5785_v16 = vsub.f32 %v11701_v27, %v11723_v46 }
 0x346   : > { %9547 = vmatprep.mubr.f32.mxu1 %v11496_v45  ;;  %9504 = vmatpush3.msra.mxu0 %v11466_v1  ;;  %v4952_v10 = vsel %vm368_vm0, %v4945_v63, 0  ;;  %v11641_v59 = vsub.f32 %v4955_v28, %v11624_v22  ;;  %v12333_v28 = vld [vmem:[#allocation23_spill] sm:$0xff] }
 0x347   : > { %9546 = vmatpush3.msra.mxu1 %v11449_v5  ;;  %9525 = vmatprep.subr.mxu0 %v11447_v30  ;;  %v5031_v5 = vand.u32 4294901760, %v11601_v7  ;;  %v11618_v37 = vand.u32 4294901760, %v4952_v10 }
 0x348   : > { %9567 = vmatprep.subr.mxu1 %v11018_v39  ;;  %9506 = vmatmul.mubr.f32.vlgmr.msra.gmra.mxu0 %v11521_v61  ;;  %v5051_v53 = vand.u32 4294901760, %v11641_v59  ;;  %v11674_v61 = vand.u32 4294901760, %v5628_v41 }
 0x349   : > { %9526 = vmatpush3.msra.mxu0 %v11447_v30  ;;  %9548 = vmatmul.mubr.f32.vlgmr.msra.gmra.mxu1 %v11505_v17  ;;  %v4947_v30 = vmul.f32 %v11567_v24, %v10957_v52  ;;  %v5032_v1 = vsub.f32 %v11601_v7, %v5031_v5 }
 0x34a   : > { %9568 = vmatpush3.xpose.msra.mxu1 %v11018_v39  ;;  %9508 = vmatprep.mubr.f32.mxu0 %v11530_v4  ;;  %v5052_v12 = vsub.f32 %v11641_v59, %v5051_v53  ;;  %v5626_v4 = vmul.f32 %v11567_v24, %v11242_v11  ;;  %v11688_v51 = vsub.f32 %v5628_v41, %v11674_v61 }
 0x34b   : > { %9527 = vmatprep.subr.mxu0 %v11463_v15  ;;  %9550 = vmatprep.mubr.f32.mxu1 %v11513_v55 }
 0x34c   : > { %9569 = vmatprep.subr.mxu1 %v11031_v48  ;;  %9528 = vmatpush3.msra.mxu0 %v11463_v15  ;;  %v4958_v15 = vsel %vm368_vm0, %v4947_v30, 0  ;;  %v5053_v47 = vand.u32 4294901760, %v5052_v12  ;;  %v11705_v3 = vand.u32 4294901760, %v11688_v51 }
 0x34d   : > { %9529 = vmatprep.subr.mxu0 %v11472_v0  ;;  %9509 = vmatmul.mubr.f32.gmra.mxu0 %v11544_v8  ;;  %v11637_v21 = vand.u32 4294901760, %v4958_v15  ;;  %v11694_v8 = vand.u32 4294901760, %v5626_v4 }
 0x34e   : > { %9530 = vmatpush3.msra.mxu0 %v11472_v0  ;;  %9551 = vmatmul.mubr.f32.gmra.mxu1 %v11527_v25  ;;  %v11633_v0 = vsub.f32 %v4952_v10, %v11618_v37  ;;  %v5778_v24 = vsub.f32 %v11688_v51, %v11705_v3  ;;  %v12332_v10 = vld [vmem:[#allocation20_spill] sm:$0xff] }
 0x34f   : > { %9570 = vmatpush3.xpose.msra.mxu1 %v11031_v48  ;;  %9531 = vmatprep.subr.mxu0 %v11482_v19  ;;  %v11649_v50 = vsub.f32 %v4958_v15, %v11637_v21  ;;  %v11710_v43 = vsub.f32 %v5626_v4, %v11694_v8 }
 0x350   : > { %9533 = vmatprep.mubr.f32.mxu0 %v11496_v45  ;;  %9571 = vmatprep.subr.mxu1 %v11046_v49  ;;  %v5041_v38 = vand.u32 4294901760, %v11633_v0  ;;  %v5779_v63 = vand.u32 4294901760, %v5778_v24 }
 0x351   : > { %9575 = vmatprep.mubr.f32.mxu1 %v11586_v9  ;;  %9532 = vmatpush3.msra.mxu0 %v11482_v19  ;;  %v5033_v19 = vand.u32 4294901760, %v5032_v1  ;;  %v5061_v45 = vand.u32 4294901760, %v11649_v50  ;;  %v11729_v40 = vand.u32 4294901760, %v11710_v43 }
 0x352   : > { %9553 = vmatprep.subr.mxu0 %v10972_v26  ;;  %9534 = vmatmul.mubr.f32.vlgmr.msra.gmra.mxu0 %v11505_v17  ;;  %v5042_v18 = vsub.f32 %v11633_v0, %v5041_v38 }
 0x353   : > { %9554 = vmatpush3.xpose.msra.mxu0 %v10972_v26  ;;  %9572 = vmatpush3.xpose.msra.mxu1 %v11046_v49  ;;  %v5062_v17 = vsub.f32 %v11649_v50, %v5061_v45  ;;  %v5792_v30 = vsub.f32 %v11710_v43, %v11729_v40 }
 0x354   : > { %9536 = vmatprep.mubr.f32.mxu0 %v11513_v55  ;;  %9555 = vmatprep.subr.mxu0 %v10986_v33  ;;  %v5043_v6 = vand.u32 4294901760, %v5042_v18  ;;  %v12327_v55 = vld [vmem:[#allocation19_spill] sm:$0xff] }
 0x355   : > { %9573 = vmatprep.subr.mxu1 %v11057_v44  ;;  %v5063_v35 = vand.u32 4294901760, %v5062_v17  ;;  %v5793_v15 = vand.u32 4294901760, %v5792_v30 }
 0x356   : > { %9537 = vmatmul.mubr.f32.gmra.mxu0 %v11527_v25  ;;  %v12328_v25 = vld [vmem:[#allocation16_spill] sm:$0xff] }
 0x357   : > { %9556 = vmatpush3.xpose.msra.mxu0 %v10986_v33  ;;  %9574 = vmatpush3.xpose.msra.mxu1 %v11057_v44 }
 0x358   : > { %9557 = vmatprep.subr.mxu0 %v10965_v20  ;;  %9561 = vmatprep.mubr.f32.mxu0 %v5033_v19 }
 0x359   : > { %9595 = vmatprep.subr.mxu1 %v10972_v26 }
 0x35a   : > { %9576 = vmatmul.mubr.f32.vlgmr.msra.gmra.mxu1 %v11618_v37 }
 0x35b   : > { %9558 = vmatpush3.xpose.msra.mxu0 %v10965_v20  ;;  %9578 = vmatprep.mubr.f32.mxu1 %v11624_v22 }
 0x35c   : > { %9596 = vmatpush3.xpose.msra.mxu1 %v10972_v26  ;;  %9559 = vmatprep.subr.mxu0 %v10981_v31 }
 0x35d   : > { %9597 = vmatprep.subr.mxu1 %v10986_v33 }
 0x35e   : > { %9579 = vmatmul.mubr.f32.gmra.mxu1 %v11637_v21 }
 0x35f   : > { %9560 = vmatpush3.xpose.msra.mxu0 %v10981_v31  ;;  %9603 = vmatprep.mubr.f32.mxu1 %v5031_v5 }
 0x360   : > { %9598 = vmatpush3.xpose.msra.mxu1 %v10986_v33  ;;  %9581 = vmatprep.subr.mxu0 %v12326_v23 }
 0x361   : > { %9599 = vmatprep.subr.mxu1 %v10965_v20 }
 0x362   : > { %9562 = vmatmul.mubr.f32.vlgmr.msra.gmra.mxu0 %v5043_v6 }
 0x363   : > { %9564 = vmatprep.mubr.f32.mxu0 %v5053_v47  ;;  %9582 = vmatpush3.xpose.msra.mxu0 %v12326_v23 }
 0x364   : > { %9600 = vmatpush3.xpose.msra.mxu1 %v10965_v20  ;;  %9583 = vmatprep.subr.mxu0 %v12327_v55 }
 0x365   : > { %9601 = vmatprep.subr.mxu1 %v10981_v31 }
 0x366   : > { %9565 = vmatmul.mubr.f32.gmra.mxu0 %v5063_v35 }
 0x367   : > { %9584 = vmatpush3.xpose.msra.mxu0 %v12327_v55  ;;  %9589 = vmatprep.mubr.f32.mxu0 %v11601_v7  ;;  %v11737_v7 = vand.u32 4294901760, %v11716_v42 }
 0x368   : > { %9602 = vmatpush3.xpose.msra.mxu1 %v10981_v31  ;;  %9585 = vmatprep.subr.mxu0 %v12328_v25 }
 0x369   : > { %9623 = vmatprep.subr.mxu1 %v10972_v26  ;;  %v5799_v5 = vsub.f32 %v11716_v42, %v11737_v7 }
 0x36b   : > { %9604 = vmatmul.mubr.f32.vlgmr.msra.gmra.mxu1 %v5041_v38  ;;  %9586 = vmatpush3.xpose.msra.mxu0 %v12328_v25  ;;  %v5800_v1 = vand.u32 4294901760, %v5799_v5 }
 0x36c   : > { %9606 = vmatprep.mubr.f32.mxu1 %v5051_v53  ;;  %9624 = vmatpush3.xpose.msra.mxu1 %v10972_v26 }
 0x36d   : > { %9587 = vmatprep.subr.mxu0 %v12329_v36  ;;  %9625 = vmatprep.subr.mxu1 %v10986_v33 }
 0x36f   : > { %9607 = vmatmul.mubr.f32.gmra.mxu1 %v5061_v45  ;;  %9588 = vmatpush3.xpose.msra.mxu0 %v12329_v36 }
 0x370   : > { %9626 = vmatpush3.xpose.msra.mxu1 %v10986_v33  ;;  %9631 = vmatprep.mubr.f32.mxu1 %v11586_v9 }
 0x371   : > { %9609 = vmatprep.subr.mxu0 %v12330_v62  ;;  %9627 = vmatprep.subr.mxu1 %v10965_v20 }
 0x372   : > { %9590 = vmatmul.mubr.f32.vlgmr.msra.gmra.mxu0 %v11633_v0 }
 0x373   : > { %9592 = vmatprep.mubr.f32.mxu0 %v11641_v59  ;;  %9610 = vmatpush3.xpose.msra.mxu0 %v12330_v62 }
 0x374   : > { %9628 = vmatpush3.xpose.msra.mxu1 %v10965_v20  ;;  %9611 = vmatprep.subr.mxu0 %v12331_v29 }
 0x375   : > { %9629 = vmatprep.subr.mxu1 %v10981_v31 }
 0x376   : > { %9593 = vmatmul.mubr.f32.gmra.mxu0 %v11649_v50 }
 0x377   : > { %9612 = vmatpush3.xpose.msra.mxu0 %v12331_v29  ;;  %9617 = vmatprep.mubr.f32.mxu0 %v11586_v9  ;;  %v5786_v9 = vand.u32 4294901760, %v5785_v16 }
 0x378   : > { %9630 = vmatpush3.xpose.msra.mxu1 %v10981_v31  ;;  %9613 = vmatprep.subr.mxu0 %v12332_v10 }
 0x379   : > { %9651 = vmatprep.subr.mxu1 %v5779_v63 }
 0x37b   : > { %9632 = vmatmul.mubr.f32.vlgmr.msra.gmra.mxu1 %v11618_v37  ;;  %9614 = vmatpush3.xpose.msra.mxu0 %v12332_v10 }
 0x37c   : > { %9634 = vmatprep.mubr.f32.mxu1 %v11624_v22  ;;  %9652 = vmatpush3.msra.mxu1 %v5779_v63 }
 0x37d   : > { %9615 = vmatprep.subr.mxu0 %v12333_v28  ;;  %9653 = vmatprep.subr.mxu1 %v5786_v9 }
 0x37e   : > { %9654 = vmatpush3.msra.mxu1 %v5786_v9 }
 0x37f   : > { %9635 = vmatmul.mubr.f32.gmra.mxu1 %v11637_v21  ;;  %9655 = vmatprep.subr.mxu1 %v5793_v15 }
 0x380   : > { %9616 = vmatpush3.xpose.msra.mxu0 %v12333_v28  ;;  %9656 = vmatpush3.msra.mxu1 %v5793_v15 }
 0x381   : > { %9637 = vmatprep.subr.mxu0 %v11674_v61  ;;  %9657 = vmatprep.subr.mxu1 %v5800_v1 }
 0x382   : > { %9658 = vmatpush3.msra.mxu1 %v5800_v1 }
 0x383   : > { %9618 = vmatmul.mubr.f32.vlgmr.msra.gmra.mxu0 %v11618_v37  ;;  %9679 = vmatprep.subr.mxu1 %v11674_v61 }
 0x384   : > { %9620 = vmatprep.mubr.f32.mxu0 %v11624_v22  ;;  %9638 = vmatpush3.msra.mxu0 %v11674_v61 }
 0x385   : > { %9639 = vmatprep.subr.mxu0 %v11690_v34 }
 0x386   : > { %9640 = vmatpush3.msra.mxu0 %v11690_v34 }
 0x387   : > { %9621 = vmatmul.mubr.f32.gmra.mxu0 %v11637_v21  ;;  %9641 = vmatprep.subr.mxu0 %v11694_v8 }
 0x388   : > { %9642 = vmatpush3.msra.mxu0 %v11694_v8 }
 0x389   : > { %9643 = vmatprep.subr.mxu0 %v11698_v32 }
 0x38a   : > { %9644 = vmatpush3.msra.mxu0 %v11698_v32 }
 0x38b   : > { %9665 = vmatprep.subr.mxu0 %v11688_v51 }
 0x3d0   : > { %v9409_v37 = vpop.f32.mrf.mxu1 }
 0x3d2   : > { %v3892_v22 = vpop.f32.mrf.mxu1 }
 0x3d4   : > { %v9412_v0 = vpop.f32.mrf.mxu1 }
 0x3d6   : > { %v3904_v59 = vpop.f32.mrf.mxu1 }
 0x3d8   : > { %v9395_v19 = vpop.f32.mrf.mxu0 }
 0x3d9   : > { %v3899_v38 = vadd.f32 %v9409_v37, %v9395_v19  ;;  %v9437_v50 = vpop.f32.mrf.mxu1 }
 0x3da   : > { %v3771_v53 = vpop.f32.mrf.mxu0 }
 0x3db   : > { %v3893_v18 = vadd.f32 %v3892_v22, %v3771_v53  ;;  %v4088_v21 = vpop.f32.mrf.mxu1 }
 0x3de   : > { %v9398_v45 = vpop.f32.mrf.mxu0 }
 0x3df   : > { %v3911_v12 = vadd.f32 %v9412_v0, %v9398_v45  ;;  %v9440_v6 = vpop.f32.mrf.mxu1 }
 0x3e0   : > { %v3791_v17 = vpop.f32.mrf.mxu0 }
 0x3e1   : > { %v3905_v47 = vadd.f32 %v3904_v59, %v3791_v17  ;;  %v4104_v41 = vpop.f32.mrf.mxu1 }
 0x3e4   : > { %v9423_v35 = vpop.f32.mrf.mxu0 }
 0x3e5   : > { %v3998_v60 = vadd.f32 %v9423_v35, %v3899_v38  ;;  %v9465_v4 = vpop.f32.mrf.mxu1 }
 0x3e6   : > { %v3990_v58 = vpop.f32.mrf.mxu0 }
 0x3e7   : > { %v3991_v24 = vadd.f32 %v3990_v58, %v3893_v18  ;;  %v4288_v63 = vpop.f32.mrf.mxu1  ;;  %v4097_v16 = vadd.f32 %v9437_v50, %v3998_v60 }
 0x3e9   : > { %v4089_v30 = vadd.f32 %v4088_v21, %v3991_v24 }
 0x3ea   : > { %v9426_v9 = vpop.f32.mrf.mxu0 }
 0x3eb   : > { %v4012_v5 = vadd.f32 %v9426_v9, %v3911_v12  ;;  %v9468_v15 = vpop.f32.mrf.mxu1 }
 0x3ec   : > { %v4004_v1 = vpop.f32.mrf.mxu0 }
 0x3ed   : > { %v4005_v37 = vadd.f32 %v4004_v1, %v3905_v47  ;;  %v4300_v22 = vpop.f32.mrf.mxu1  ;;  %v4113_v19 = vadd.f32 %v9440_v6, %v4012_v5 }
 0x3ef   : > { %v4105_v0 = vadd.f32 %v4104_v41, %v4005_v37 }
 0x3f0   : > { %v9451_v53 = vpop.f32.mrf.mxu0 }
 0x3f1   : > { %v4202_v45 = vadd.f32 %v9451_v53, %v4097_v16  ;;  %v9493_v59 = vpop.f32.mrf.mxu1 }
 0x3f2   : > { %v4195_v17 = vpop.f32.mrf.mxu0 }
 0x3f3   : > { %v4196_v28 = vadd.f32 %v4195_v17, %v4089_v30  ;;  %v4518_v38 = vpop.f32.mrf.mxu1  ;;  %v4295_v35 = vadd.f32 %v9465_v4, %v4202_v45 }
 0x3f5   : > { %v4289_v10 = vadd.f32 %v4288_v63, %v4196_v28 }
 0x3f6   : > { %v9454_v18 = vpop.f32.mrf.mxu0 }
 0x3f7   : > { %v4214_v58 = vadd.f32 %v9454_v18, %v4113_v19  ;;  %v9496_v50 = vpop.f32.mrf.mxu1 }
 0x3f8   : > { %v4207_v21 = vpop.f32.mrf.mxu0 }
 0x3f9   : > { %v4208_v60 = vadd.f32 %v4207_v21, %v4105_v0  ;;  %v4307_v12 = vadd.f32 %v9468_v15, %v4214_v58  ;;  %v4530_v24 = vpop.f32.mrf.mxu1 }
 0x3fb   : > { %v4301_v9 = vadd.f32 %v4300_v22, %v4208_v60 }
 0x3fc   : > { %v9479_v47 = vpop.f32.mrf.mxu0 }
 0x3fd   : > { %v4408_v1 = vadd.f32 %v9479_v47, %v4295_v35  ;;  %v9521_v6 = vpop.f32.mrf.mxu1 }
 0x3fe   : > { %v4397_v41 = vpop.f32.mrf.mxu0 }
 0x3ff   : > { %v4398_v5 = vadd.f32 %v4397_v41, %v4289_v10  ;;  %v4525_v16 = vadd.f32 %v9493_v59, %v4408_v1  ;;  %v4714_v53 = vpop.f32.mrf.mxu1 }
 0x401   : > { %v4519_v37 = vadd.f32 %v4518_v38, %v4398_v5 }
 0x402   : > { %v9482_v30 = vpop.f32.mrf.mxu0 }
 0x403   : > { %v4428_v17 = vadd.f32 %v9482_v30, %v4307_v12  ;;  %v9524_v19 = vpop.f32.mrf.mxu1 }
 0x404   : > { %v4417_v4 = vpop.f32.mrf.mxu0 }
 0x405   : > { %v4418_v28 = vadd.f32 %v4417_v4, %v4301_v9  ;;  %v4537_v63 = vadd.f32 %v9496_v50, %v4428_v17  ;;  %v4730_v15 = vpop.f32.mrf.mxu1 }
 0x407   : > { %v4531_v45 = vadd.f32 %v4530_v24, %v4418_v28 }
 0x408   : > { %v9507_v18 = vpop.f32.mrf.mxu0 }
 0x409   : > { %v4624_v0 = vadd.f32 %v9507_v18, %v4525_v16  ;;  %v9549_v47 = vpop.f32.mrf.mxu1 }
 0x40a   : > { %v4616_v58 = vpop.f32.mrf.mxu0 }
 0x40b   : > { %v4617_v22 = vadd.f32 %v4616_v58, %v4519_v37  ;;  %v4723_v21 = vadd.f32 %v9521_v6, %v4624_v0  ;;  %v4914_v41 = vpop.f32.mrf.mxu1 }
 0x40d   : > { %v9510_v35 = vpop.f32.mrf.mxu0  ;;  %v4715_v60 = vadd.f32 %v4714_v53, %v4617_v22 }
 0x40e   : > { %v4638_v10 = vadd.f32 %v9510_v35, %v4537_v63  ;;  %v9552_v16 = vpop.f32.mrf.mxu1 }
 0x40f   : > { %v4630_v59 = vpop.f32.mrf.mxu0 }
 0x410   : > { %v4631_v38 = vadd.f32 %v4630_v59, %v4531_v45  ;;  %v4739_v1 = vadd.f32 %v9524_v19, %v4638_v10  ;;  %v4926_v63 = vpop.f32.mrf.mxu1 }
 0x412   : > { %v9535_v12 = vpop.f32.mrf.mxu0  ;;  %v4731_v5 = vadd.f32 %v4730_v15, %v4631_v38 }
 0x413   : > { %v4828_v9 = vadd.f32 %v9535_v12, %v4723_v21 }
 0x414   : > { %v4821_v50 = vpop.f32.mrf.mxu0 }
 0x415   : > { %v11764_v30 = vadd.f32 %v9549_v47, %v4828_v9  ;;  %v4822_v24 = vadd.f32 %v4821_v50, %v4715_v60 }
 0x416   : > { %v9538_v17 = vpop.f32.mrf.mxu0 }
 0x417   : > { %12334 = vst [vmem:[#allocation17_spill] sm:$0xff] %v11764_v30  ;;  %v11766_v4 = vadd.f32 %v4914_v41, %v4822_v24  ;;  %v4840_v6 = vadd.f32 %v9538_v17, %v4739_v1 }
 0x418   : > { %v4833_v37 = vpop.f32.mrf.mxu0 }
 0x419   : > { %12335 = vst [vmem:[#allocation19_spill] sm:$0xff] %v11766_v4  ;;  %v11768_v53 = vadd.f32 %v9552_v16, %v4840_v6  ;;  %v4834_v28 = vadd.f32 %v4833_v37, %v4731_v5 }
 0x41a   : > { %v9577_v19 = vpop.f32.mrf.mxu1 }
 0x41b   : > { %12336 = vst [vmem:[#allocation16_spill] sm:$0xff] %v11768_v53  ;;  %v11770_v45 = vadd.f32 %v4926_v63, %v4834_v28 }
 0x41c   : > { %v5156_v18 = vpop.f32.mrf.mxu1 }
 0x41d   : > { %12337 = vst [vmem:[#allocation25_spill] sm:$0xff] %v11770_v45 }
 0x41e   : > { %v9580_v15 = vpop.f32.mrf.mxu1 }
 0x420   : > { %v5168_v22 = vpop.f32.mrf.mxu1 }
 0x422   : > { %v9563_v0 = vpop.f32.mrf.mxu0 }
 0x423   : > { %v5163_v1 = vadd.f32 %v9577_v19, %v9563_v0 }
 0x424   : > { %v5035_v58 = vpop.f32.mrf.mxu0 }
 0x425   : > { %v5157_v5 = vadd.f32 %v5156_v18, %v5035_v58 }
 0x426   : > { %v9566_v21 = vpop.f32.mrf.mxu0 }
 0x427   : > { %v5175_v24 = vadd.f32 %v9580_v15, %v9566_v21 }
 0x428   : > { %v5055_v60 = vpop.f32.mrf.mxu0 }
 0x429   : > { %v5169_v6 = vadd.f32 %v5168_v22, %v5055_v60 }
 0x42b   : > { %v9605_v35 = vpop.f32.mrf.mxu1 }
 0x42d   : > { %v5352_v47 = vpop.f32.mrf.mxu1 }
 0x42f   : > { %v9608_v59 = vpop.f32.mrf.mxu1 }
 0x431   : > { %v5368_v41 = vpop.f32.mrf.mxu1 }
 0x432   : > { %v9591_v10 = vpop.f32.mrf.mxu0 }
 0x433   : > { %v5262_v9 = vadd.f32 %v9591_v10, %v5163_v1  ;;  %v11772_v1 = vld [vmem:[#allocation10] sm:$0xff] }
 0x434   : > { %v5254_v38 = vpop.f32.mrf.mxu0 }
 0x435   : > { %v5255_v16 = vadd.f32 %v5254_v38, %v5157_v5  ;;  %v5361_v28 = vadd.f32 %v9605_v35, %v5262_v9 }
 0x436   : > { %v9594_v12 = vpop.f32.mrf.mxu0 }
 0x437   : > { %v5276_v37 = vadd.f32 %v9594_v12, %v5175_v24  ;;  %v5353_v30 = vadd.f32 %v5352_v47, %v5255_v16 }
 0x438   : > { %v5268_v17 = vpop.f32.mrf.mxu0 }
 0x439   : > { %v5269_v53 = vadd.f32 %v5268_v17, %v5169_v6  ;;  %v5377_v19 = vadd.f32 %v9608_v59, %v5276_v37 }
 0x43b   : > { %v9633_v50 = vpop.f32.mrf.mxu1  ;;  %v5369_v10 = vadd.f32 %v5368_v41, %v5269_v53  ;;  %v11782_v53 = vld [vmem:[#allocation10 + $0x10] sm:$0xff] }
 0x43d   : > { %v5552_v63 = vpop.f32.mrf.mxu1 }
 0x43f   : > { %v9636_v0 = vpop.f32.mrf.mxu1 }
 0x441   : > { %v5564_v35 = vpop.f32.mrf.mxu1 }
 0x443   : > { %v9619_v45 = vpop.f32.mrf.mxu0 }
 0x444   : > { %v5466_v4 = vadd.f32 %v9619_v45, %v5361_v28 }
 0x445   : > { %v5459_v29 = vpop.f32.mrf.mxu0 }
 0x446   : > { %v5559_v62 = vadd.f32 %v9633_v50, %v5466_v4  ;;  %v5460_v36 = vadd.f32 %v5459_v29, %v5353_v30  ;;  %v11775_v4 = vld [vmem:[#allocation10 + $0x8] sm:$0xff]  ;;  %v11778_v30 = vld [vmem:[#allocation10 + $0x18] sm:$0xff] }
 0x447   : > { %v9622_v14 = vpop.f32.mrf.mxu0 }
 0x448   : > { %v5553_v18 = vadd.f32 %v5552_v63, %v5460_v36  ;;  %v5478_v58 = vadd.f32 %v9622_v14, %v5377_v19  ;;  %v5575_v21 = vmul.f32 0.17677669, %v5559_v62 }
 0x449   : > { %v5471_v15 = vpop.f32.mrf.mxu0 }
 0x44a   : > { %v5574_v38 = vmul.f32 0.17677669, %v5553_v18  ;;  %v5571_v22 = vadd.f32 %v9636_v0, %v5478_v58  ;;  %v5472_v60 = vadd.f32 %v5471_v15, %v5369_v10  ;;  %v5579_v29 = vadd.f32 %v11775_v4, %v5575_v21 }
 0x44c   : > { %v5578_v45 = vadd.f32 %v11772_v1, %v5574_v38  ;;  %v5577_v47 = vmul.f32 0.17677669, %v5571_v22  ;;  %v5565_v12 = vadd.f32 %v5564_v35, %v5472_v60  ;;  %v5583_v41 = vsel %vm368_vm0, %v5579_v29, -inf }
 0x44e   : > { %v5581_v14 = vadd.f32 %v11778_v30, %v5577_v47  ;;  %v5576_v36 = vmul.f32 0.17677669, %v5565_v12  ;;  %v5582_v62 = vsel %vm368_vm0, %v5578_v45, -inf }
 0x44f   : > { %v5586_v50 = vmax.f32 %v5582_v62, %v5583_v41 }
 0x450   : > { %v5580_v59 = vadd.f32 %v11782_v53, %v5576_v36  ;;  %v5585_v5 = vsel %vm368_vm0, %v5581_v14, -inf }
 0x452   : > { %v5584_v9 = vsel %vm368_vm0, %v5580_v59, -inf }
 0x453   : > { %v5587_v24 = vmax.f32 %v5584_v9, %v5585_v5 }
 0x455   : > { %v5588_v16 = vmax.f32 %v5586_v50, %v5587_v24 }
 0x457   : > { %v5589_v17 = vrot.slane %v5588_v16, 4 }
 0x459   : > { %v5590_v6 = vmax.f32 %v5588_v16, %v5589_v17 }
 0x45b   : > { %v5591_v37 = vrot.slane %v5590_v6, 2 }
 0x45d   : > { %v5592_v28 = vmax.f32 %v5590_v6, %v5591_v37 }
 0x45f   : > { %v5593_v63 = vrot.slane %v5592_v28, 1 }
 0x461   : > { %v5594_v19 = vmax.f32 %v5592_v28, %v5593_v63 }
 0x463   : > { %v5595_v0 = vsub.f32 %v5578_v45, %v5594_v19  ;;  %v5596_v18 = vsub.f32 %v5579_v29, %v5594_v19  ;;  %v5597_v58 = vsub.f32 %v5580_v59, %v5594_v19  ;;  %v5598_v10 = vsub.f32 %v5581_v14, %v5594_v19 }
 0x465   : > { %v5599_v15 = vmul.f32 1.442695, %v5595_v0  ;;  %v5601_v21 = vmul.f32 1.442695, %v5596_v18  ;;  %v5603_v38 = vmul.f32 1.442695, %v5597_v58 }
 0x466   : > { %v5605_v22 = vmul.f32 1.442695, %v5598_v10 }
 0x467   : > { %10087 = vpow2.f32 %v5599_v15 }
 0x468   : > { %10089 = vpow2.f32 %v5601_v21 }
 0x469   : > { %10091 = vpow2.f32 %v5603_v38 }
 0x46a   : > { %10093 = vpow2.f32 %v5605_v22 }
 0x474   : > { %v10088_v60 = vpop.eup %10087 }
 0x475   : > { %v10090_v35 = vpop.eup %10089  ;;  %v5607_v47 = vsel %vm368_vm0, %v10088_v60, 0.0 }
 0x476   : > { %v10092_v12 = vpop.eup %10091  ;;  %v5608_v36 = vsel %vm368_vm0, %v10090_v35, 0.0 }
 0x477   : > { %v10094_v62 = vpop.eup %10093  ;;  %v5609_v45 = vadd.f32 %v5608_v36, %v5607_v47  ;;  %v5610_v29 = vsel %vm368_vm0, %v10092_v12, 0.0 }
 0x478   : > { %v5612_v59 = vsel %vm368_vm0, %v10094_v62, 0.0 }
 0x479   : > { %v5611_v14 = vadd.f32 %v5610_v29, %v5609_v45 }
 0x47b   : > { %v5613_v41 = vadd.f32 %v5612_v59, %v5611_v14 }
 0x47d   : > { %v5614_v5 = vrot.slane %v5613_v41, 4 }
 0x47f   : > { %v5615_v9 = vadd.f32 %v5614_v5, %v5613_v41 }
 0x481   : > { %v5616_v50 = vrot.slane %v5615_v9, 2 }
 0x483   : > { %v5617_v24 = vadd.f32 %v5616_v50, %v5615_v9 }
 0x485   : > { %v5618_v16 = vrot.slane %v5617_v24, 1 }
 0x487   : > { %v5619_v17 = vadd.f32 %v5618_v16, %v5617_v24  ;;  %v11828_v16 = vld [vmem:[%s12269_s5 + $0x3] ss:$0 sm:$0xff] }
 0x489   : > { %10095 = vrcp.f32 %v5619_v17  ;;  %v6267_v17 = vmul.f32 %v11828_v16, %v10924_v57 }
 0x48b   : > { %v6272_v57 = vsel %vm368_vm0, %v6267_v17, 0 }
 0x496   : > { %v10096_v6 = vpop.eup %10095 }
 0x497   : > { %v5621_v37 = vmul.f32 %v10096_v6, %v10088_v60  ;;  %v5622_v28 = vmul.f32 %v10096_v6, %v10090_v35  ;;  %v5623_v63 = vmul.f32 %v10096_v6, %v10092_v12  ;;  %v5624_v19 = vmul.f32 %v10096_v6, %v10094_v62 }
 0x499   : > { %v5630_v0 = vsel %vm368_vm0, %v5621_v37, 0  ;;  %v5633_v18 = vsel %vm368_vm0, %v5622_v28, 0  ;;  %v5636_v58 = vsel %vm368_vm0, %v5623_v63, 0  ;;  %v5639_v10 = vsel %vm368_vm0, %v5624_v19, 0 }
 0x49a   : > { %v11796_v15 = vand.u32 4294901760, %v5630_v0  ;;  %v11798_v21 = vand.u32 4294901760, %v5633_v18  ;;  %v11800_v38 = vand.u32 4294901760, %v5636_v58  ;;  %v11802_v22 = vand.u32 4294901760, %v5639_v10 }
 0x49c   : > { %9659 = vmatprep.mubr.f32.mxu1 %v11796_v15  ;;  %v5721_v60 = vsub.f32 %v5633_v18, %v11798_v21  ;;  %v5711_v35 = vsub.f32 %v5630_v0, %v11796_v15  ;;  %v5731_v47 = vsub.f32 %v5636_v58, %v11800_v38  ;;  %v11810_v12 = vsub.f32 %v5639_v10, %v11802_v22 }
 0x49d   : > { %9660 = vmatmul.mubr.f32.vlgmr.msra.gmra.mxu1 %v11798_v21  ;;  %v6951_v58 = vmul.f32 %v11828_v16, %v11228_v2  ;;  %v6949_v2 = vmul.f32 %v11828_v16, %v11242_v11 }
 0x49e   : > { %9680 = vmatpush3.msra.mxu1 %v11674_v61  ;;  %9662 = vmatprep.mubr.f32.mxu1 %v11800_v38  ;;  %v5712_v36 = vand.u32 4294901760, %v5711_v35  ;;  %v5722_v62 = vand.u32 4294901760, %v5721_v60  ;;  %v5732_v45 = vand.u32 4294901760, %v5731_v47  ;;  %v5742_v41 = vand.u32 4294901760, %v11810_v12 }
 0x49f   : > { %9681 = vmatprep.subr.mxu1 %v11690_v34 }
 0x4a0   : > { %9682 = vmatpush3.msra.mxu1 %v11690_v34  ;;  %v5713_v29 = vsub.f32 %v5711_v35, %v5712_v36  ;;  %v5723_v14 = vsub.f32 %v5721_v60, %v5722_v62  ;;  %v5733_v59 = vsub.f32 %v5731_v47, %v5732_v45  ;;  %v5743_v24 = vsub.f32 %v11810_v12, %v5742_v41 }
 0x4a1   : > { %9683 = vmatprep.subr.mxu1 %v11694_v8  ;;  %9663 = vmatmul.mubr.f32.gmra.mxu1 %v11802_v22 }
 0x4a2   : > { %9684 = vmatpush3.msra.mxu1 %v11694_v8  ;;  %9687 = vmatprep.mubr.f32.mxu1 %v5712_v36  ;;  %v5714_v5 = vand.u32 4294901760, %v5713_v29  ;;  %v5724_v9 = vand.u32 4294901760, %v5723_v14  ;;  %v5734_v50 = vand.u32 4294901760, %v5733_v59 }
 0x4a3   : > { %9685 = vmatprep.subr.mxu1 %v11698_v32 }
 0x4a4   : > { %9686 = vmatpush3.msra.mxu1 %v11698_v32  ;;  %9645 = vmatprep.mubr.f32.mxu0 %v5714_v5 }
 0x4a5   : > { %9707 = vmatprep.subr.mxu1 %v11674_v61  ;;  %9646 = vmatmul.mubr.f32.vlgmr.msra.gmra.mxu0 %v5724_v9 }
 0x4a6   : > { %9666 = vmatpush3.msra.mxu0 %v11688_v51  ;;  %9688 = vmatmul.mubr.f32.vlgmr.msra.gmra.mxu1 %v5722_v62  ;;  %v5744_v51 = vand.u32 4294901760, %v5743_v24  ;;  %v12341_v62 = vld [vmem:[#allocation22_spill] sm:$0xff] }
 0x4a7   : > { %9708 = vmatpush3.msra.mxu1 %v11674_v61  ;;  %9648 = vmatprep.mubr.f32.mxu0 %v5734_v50  ;;  %v11846_v61 = vand.u32 4294901760, %v6272_v57  ;;  %v12343_v50 = vld [vmem:[#allocation23_spill] sm:$0xff] }
 0x4a8   : > { %9667 = vmatprep.subr.mxu0 %v11701_v27  ;;  %9690 = vmatprep.mubr.f32.mxu1 %v5732_v45 }
 0x4a9   : > { %9709 = vmatprep.subr.mxu1 %v11690_v34  ;;  %9668 = vmatpush3.msra.mxu0 %v11701_v27  ;;  %v6270_v27 = vmul.f32 %v11828_v16, %v10957_v52 }
 0x4aa   : > { %9710 = vmatpush3.msra.mxu1 %v11690_v34  ;;  %9669 = vmatprep.subr.mxu0 %v11710_v43  ;;  %v6268_v34 = vmul.f32 %v11828_v16, %v10949_v54 }
 0x4ab   : > { %9711 = vmatprep.subr.mxu1 %v11694_v8  ;;  %9649 = vmatmul.mubr.f32.gmra.mxu0 %v5744_v51 }
 0x4ac   : > { %9670 = vmatpush3.msra.mxu0 %v11710_v43  ;;  %9691 = vmatmul.mubr.f32.gmra.mxu1 %v5742_v41  ;;  %v6275_v54 = vsel %vm368_vm0, %v6268_v34, 0  ;;  %v6281_v43 = vsel %vm368_vm0, %v6270_v27, 0 }
 0x4ad   : > { %9712 = vmatpush3.msra.mxu1 %v11694_v8  ;;  %9671 = vmatprep.subr.mxu0 %v11716_v42  ;;  %v6269_v8 = vmul.f32 %v11828_v16, %v10951_v56 }
 0x4ae   : > { %9673 = vmatprep.mubr.f32.mxu0 %v5711_v35  ;;  %9713 = vmatprep.subr.mxu1 %v11698_v32 }
 0x4af   : > { %9715 = vmatprep.mubr.f32.mxu1 %v11796_v15  ;;  %9672 = vmatpush3.msra.mxu0 %v11716_v42 }
 0x4b0   : > { %9714 = vmatpush3.msra.mxu1 %v11698_v32  ;;  %9693 = vmatprep.subr.mxu0 %v11705_v3  ;;  %v11859_v32 = vsub.f32 %v6272_v57, %v11846_v61 }
 0x4b1   : > { %9735 = vmatprep.subr.mxu1 %v11018_v39  ;;  %9674 = vmatmul.mubr.f32.vlgmr.msra.gmra.mxu0 %v5721_v60  ;;  %v12339_v60 = vld [vmem:[#allocation21_spill] sm:$0xff] }
 0x4b2   : > { %9694 = vmatpush3.msra.mxu0 %v11705_v3  ;;  %9716 = vmatmul.mubr.f32.vlgmr.msra.gmra.mxu1 %v11798_v21  ;;  %v6354_v56 = vand.u32 4294901760, %v11859_v32  ;;  %v11876_v3 = vand.u32 4294901760, %v6275_v54 }
 0x4b3   : > { %9736 = vmatpush3.xpose.msra.mxu1 %v11018_v39  ;;  %9676 = vmatprep.mubr.f32.mxu0 %v5731_v47  ;;  %v6278_v39 = vsel %vm368_vm0, %v6269_v8, 0 }
 0x4b4   : > { %9695 = vmatprep.subr.mxu0 %v11723_v46  ;;  %9718 = vmatprep.mubr.f32.mxu1 %v11800_v38  ;;  %v11882_v52 = vand.u32 4294901760, %v6278_v39  ;;  %v11891_v42 = vsub.f32 %v6275_v54, %v11876_v3 }
 0x4b5   : > { %9737 = vmatprep.subr.mxu1 %v11031_v48  ;;  %9696 = vmatpush3.msra.mxu0 %v11723_v46  ;;  %v11895_v46 = vand.u32 4294901760, %v6281_v43 }
 0x4b6   : > { %9697 = vmatprep.subr.mxu0 %v11729_v40  ;;  %9677 = vmatmul.mubr.f32.gmra.mxu0 %v11810_v12 }
 0x4b7   : > { %9698 = vmatpush3.msra.mxu0 %v11729_v40  ;;  %9719 = vmatmul.mubr.f32.gmra.mxu1 %v11802_v22  ;;  %v11899_v40 = vsub.f32 %v6278_v39, %v11882_v52  ;;  %v11907_v6 = vsub.f32 %v6281_v43, %v11895_v46 }
 0x4b8   : > { %9738 = vmatpush3.xpose.msra.mxu1 %v11031_v48  ;;  %9699 = vmatprep.subr.mxu0 %v11737_v7  ;;  %v6355_v48 = vsub.f32 %v11859_v32, %v6354_v56 }
 0x4b9   : > { %9701 = vmatprep.mubr.f32.mxu0 %v11796_v15  ;;  %9739 = vmatprep.subr.mxu1 %v11046_v49  ;;  %v6374_v37 = vand.u32 4294901760, %v11899_v40  ;;  %v6384_v28 = vand.u32 4294901760, %v11907_v6  ;;  %v11932_v15 = vand.u32 4294901760, %v6951_v58 }
 0x4ba   : > { %9743 = vmatprep.mubr.f32.mxu1 %v11846_v61  ;;  %9700 = vmatpush3.msra.mxu0 %v11737_v7  ;;  %v6356_v7 = vand.u32 4294901760, %v6355_v48 }
 0x4bb   : > { %9721 = vmatprep.subr.mxu0 %v10972_v26  ;;  %9702 = vmatmul.mubr.f32.vlgmr.msra.gmra.mxu0 %v11798_v21  ;;  %v6375_v63 = vsub.f32 %v11899_v40, %v6374_v37  ;;  %v6385_v0 = vsub.f32 %v11907_v6, %v6384_v28  ;;  %v6950_v21 = vmul.f32 %v11828_v16, %v11239_v13 }
 0x4bc   : > { %9722 = vmatpush3.xpose.msra.mxu0 %v10972_v26  ;;  %9740 = vmatpush3.xpose.msra.mxu1 %v11046_v49  ;;  %v6364_v49 = vand.u32 4294901760, %v11891_v42 }
 0x4bd   : > { %9704 = vmatprep.mubr.f32.mxu0 %v11800_v38  ;;  %9723 = vmatprep.subr.mxu0 %v10986_v33  ;;  %v6376_v18 = vand.u32 4294901760, %v6375_v63  ;;  %v6386_v10 = vand.u32 4294901760, %v6385_v0  ;;  %v11948_v13 = vand.u32 4294901760, %v6950_v21 }
 0x4be   : > { %9741 = vmatprep.subr.mxu1 %v11057_v44 }
 0x4bf   : > { %9705 = vmatmul.mubr.f32.gmra.mxu0 %v11802_v22  ;;  %v11946_v22 = vsub.f32 %v6951_v58, %v11932_v15  ;;  %v11959_v35 = vsub.f32 %v6950_v21, %v11948_v13 }
 0x4c0   : > { %9724 = vmatpush3.xpose.msra.mxu0 %v10986_v33  ;;  %9742 = vmatpush3.xpose.msra.mxu1 %v11057_v44  ;;  %v6365_v44 = vsub.f32 %v11891_v42, %v6364_v49 }
 0x4c1   : > { %9725 = vmatprep.subr.mxu0 %v10965_v20  ;;  %9729 = vmatprep.mubr.f32.mxu0 %v6356_v7  ;;  %v11963_v47 = vand.u32 4294901760, %v11946_v22  ;;  %v11981_v36 = vand.u32 4294901760, %v11959_v35 }
 0x4c2   : > { %9763 = vmatprep.subr.mxu1 %v10972_v26  ;;  %v6366_v19 = vand.u32 4294901760, %v6365_v44 }
 0x4c3   : > { %9744 = vmatmul.mubr.f32.vlgmr.msra.gmra.mxu1 %v11876_v3  ;;  %v7108_v14 = vsub.f32 %v11959_v35, %v11981_v36 }
 0x4c4   : > { %9726 = vmatpush3.xpose.msra.mxu0 %v10965_v20  ;;  %9746 = vmatprep.mubr.f32.mxu1 %v11882_v52 }
 0x4c5   : > { %9764 = vmatpush3.xpose.msra.mxu1 %v10972_v26  ;;  %9727 = vmatprep.subr.mxu0 %v10981_v31  ;;  %v7109_v5 = vand.u32 4294901760, %v7108_v14 }
 0x4c6   : > { %9765 = vmatprep.subr.mxu1 %v10986_v33 }
 0x4c7   : > { %9747 = vmatmul.mubr.f32.gmra.mxu1 %v11895_v46 }
 0x4c8   : > { %9728 = vmatpush3.xpose.msra.mxu0 %v10981_v31  ;;  %9771 = vmatprep.mubr.f32.mxu1 %v6354_v56 }
 0x4c9   : > { %9766 = vmatpush3.xpose.msra.mxu1 %v10986_v33  ;;  %9749 = vmatprep.subr.mxu0 %v12326_v23 }
 0x4ca   : > { %9767 = vmatprep.subr.mxu1 %v10965_v20 }
 0x4cb   : > { %9730 = vmatmul.mubr.f32.vlgmr.msra.gmra.mxu0 %v6366_v19 }
 0x4cc   : > { %9732 = vmatprep.mubr.f32.mxu0 %v6376_v18  ;;  %9750 = vmatpush3.xpose.msra.mxu0 %v12326_v23  ;;  %v12338_v23 = vld [vmem:[#allocation24_spill] sm:$0xff] }
 0x4cd   : > { %9768 = vmatpush3.xpose.msra.mxu1 %v10965_v20  ;;  %9751 = vmatprep.subr.mxu0 %v12327_v55  ;;  %v6948_v38 = vmul.f32 %v11828_v16, %v12338_v23 }
 0x4ce   : > { %9769 = vmatprep.subr.mxu1 %v10981_v31 }
 0x4cf   : > { %9733 = vmatmul.mubr.f32.gmra.mxu0 %v6386_v10  ;;  %v11956_v11 = vand.u32 4294901760, %v6948_v38 }
 0x4d0   : > { %9752 = vmatpush3.xpose.msra.mxu0 %v12327_v55  ;;  %9757 = vmatprep.mubr.f32.mxu0 %v11859_v32  ;;  %v11952_v55 = vand.u32 4294901760, %v6949_v2 }
 0x4d1   : > { %9770 = vmatpush3.xpose.msra.mxu1 %v10981_v31  ;;  %9753 = vmatprep.subr.mxu0 %v12328_v25  ;;  %v11974_v12 = vsub.f32 %v6948_v38, %v11956_v11 }
 0x4d2   : > { %9791 = vmatprep.subr.mxu1 %v10972_v26 }
 0x4d3   : > { %v11995_v59 = vand.u32 4294901760, %v11974_v12 }
 0x4d4   : > { %9772 = vmatmul.mubr.f32.vlgmr.msra.gmra.mxu1 %v6364_v49  ;;  %9754 = vmatpush3.xpose.msra.mxu0 %v12328_v25  ;;  %v12340_v25 = vld [vmem:[#allocation18_spill] sm:$0xff] }
 0x4d5   : > { %9774 = vmatprep.mubr.f32.mxu1 %v6374_v37  ;;  %9792 = vmatpush3.xpose.msra.mxu1 %v10972_v26  ;;  %v11968_v26 = vsub.f32 %v6949_v2, %v11952_v55  ;;  %v7122_v9 = vsub.f32 %v11974_v12, %v11995_v59 }
 0x4d6   : > { %9755 = vmatprep.subr.mxu0 %v12339_v60  ;;  %9793 = vmatprep.subr.mxu1 %v10986_v33 }
 0x4d7   : > { %v11987_v45 = vand.u32 4294901760, %v11968_v26  ;;  %v7123_v24 = vand.u32 4294901760, %v7122_v9 }
 0x4d8   : > { %9775 = vmatmul.mubr.f32.gmra.mxu1 %v6384_v28  ;;  %9756 = vmatpush3.xpose.msra.mxu0 %v12339_v60 }
 0x4d9   : > { %9794 = vmatpush3.xpose.msra.mxu1 %v10986_v33  ;;  %9799 = vmatprep.mubr.f32.mxu1 %v11846_v61  ;;  %v7101_v33 = vsub.f32 %v11946_v22, %v11963_v47  ;;  %v7115_v41 = vsub.f32 %v11968_v26, %v11987_v45 }
 0x4da   : > { %9777 = vmatprep.subr.mxu0 %v12340_v25  ;;  %9795 = vmatprep.subr.mxu1 %v10965_v20 }
 0x4db   : > { %9758 = vmatmul.mubr.f32.vlgmr.msra.gmra.mxu0 %v11891_v42  ;;  %v7102_v29 = vand.u32 4294901760, %v7101_v33  ;;  %v12344_v33 = vld [vmem:[#allocation17_spill] sm:$0xff] }
 0x4dc   : > { %9760 = vmatprep.mubr.f32.mxu0 %v11899_v40  ;;  %9778 = vmatpush3.xpose.msra.mxu0 %v12340_v25 }
 0x4dd   : > { %9796 = vmatpush3.xpose.msra.mxu1 %v10965_v20  ;;  %9779 = vmatprep.subr.mxu0 %v12341_v62  ;;  %v12342_v20 = vld [vmem:[#allocation20_spill] sm:$0xff] }
 0x4de   : > { %9797 = vmatprep.subr.mxu1 %v10981_v31 }
 0x4df   : > { %9761 = vmatmul.mubr.f32.gmra.mxu0 %v11907_v6 }
 0x4e0   : > { %9780 = vmatpush3.xpose.msra.mxu0 %v12341_v62  ;;  %9785 = vmatprep.mubr.f32.mxu0 %v11846_v61 }
 0x4e1   : > { %9798 = vmatpush3.xpose.msra.mxu1 %v10981_v31  ;;  %9781 = vmatprep.subr.mxu0 %v12342_v20  ;;  %v7116_v31 = vand.u32 4294901760, %v7115_v41  ;;  %v12345_v41 = vld [vmem:[#allocation19_spill] sm:$0xff] }
 0x4e2   : > { %9819 = vmatprep.subr.mxu1 %v7102_v29 }
 0x4e4   : > { %9800 = vmatmul.mubr.f32.vlgmr.msra.gmra.mxu1 %v11876_v3  ;;  %9782 = vmatpush3.xpose.msra.mxu0 %v12342_v20 }
 0x4e5   : > { %9802 = vmatprep.mubr.f32.mxu1 %v11882_v52  ;;  %9820 = vmatpush3.msra.mxu1 %v7102_v29 }
 0x4e6   : > { %9783 = vmatprep.subr.mxu0 %v12343_v50  ;;  %9821 = vmatprep.subr.mxu1 %v7109_v5 }
 0x4e7   : > { %9822 = vmatpush3.msra.mxu1 %v7109_v5 }
 0x4e8   : > { %9803 = vmatmul.mubr.f32.gmra.mxu1 %v11895_v46  ;;  %9823 = vmatprep.subr.mxu1 %v7116_v31 }
 0x4e9   : > { %9784 = vmatpush3.xpose.msra.mxu0 %v12343_v50  ;;  %9824 = vmatpush3.msra.mxu1 %v7116_v31 }
 0x4ea   : > { %9805 = vmatprep.subr.mxu0 %v11932_v15  ;;  %9825 = vmatprep.subr.mxu1 %v7123_v24 }
 0x4eb   : > { %9826 = vmatpush3.msra.mxu1 %v7123_v24  ;;  %v12346_v24 = vld [vmem:[#allocation16_spill] sm:$0xff] }
 0x4ec   : > { %9786 = vmatmul.mubr.f32.vlgmr.msra.gmra.mxu0 %v11876_v3  ;;  %9847 = vmatprep.subr.mxu1 %v11932_v15 }
 0x4ed   : > { %9788 = vmatprep.mubr.f32.mxu0 %v11882_v52  ;;  %9806 = vmatpush3.msra.mxu0 %v11932_v15 }
 0x4ee   : > { %9807 = vmatprep.subr.mxu0 %v11948_v13 }
 0x4ef   : > { %9808 = vmatpush3.msra.mxu0 %v11948_v13 }
 0x4f0   : > { %9789 = vmatmul.mubr.f32.gmra.mxu0 %v11895_v46  ;;  %9809 = vmatprep.subr.mxu0 %v11952_v55 }
 0x4f1   : > { %9810 = vmatpush3.msra.mxu0 %v11952_v55 }
 0x4f2   : > { %9811 = vmatprep.subr.mxu0 %v11956_v11 }
 0x4f3   : > { %9812 = vmatpush3.msra.mxu0 %v11956_v11 }
 0x4f4   : > { %9833 = vmatprep.subr.mxu0 %v11946_v22 }
 0x55d   : > { %v9661_v16 = vpop.f32.mrf.mxu1 }
 0x55f   : > { %v5837_v17 = vpop.f32.mrf.mxu1 }
 0x561   : > { %v9664_v51 = vpop.f32.mrf.mxu1 }
 0x563   : > { %v5849_v57 = vpop.f32.mrf.mxu1 }
 0x565   : > { %v9647_v61 = vpop.f32.mrf.mxu0 }
 0x566   : > { %v5844_v34 = vadd.f32 %v9661_v16, %v9647_v61  ;;  %v9689_v8 = vpop.f32.mrf.mxu1 }
 0x567   : > { %v5716_v32 = vpop.f32.mrf.mxu0 }
 0x568   : > { %v5838_v54 = vadd.f32 %v5837_v17, %v5716_v32  ;;  %v6033_v27 = vpop.f32.mrf.mxu1 }
 0x56b   : > { %v9650_v56 = vpop.f32.mrf.mxu0 }
 0x56c   : > { %v5856_v39 = vadd.f32 %v9664_v51, %v9650_v56  ;;  %v9692_v43 = vpop.f32.mrf.mxu1  ;;  %v12347_v51 = vld [vmem:[#allocation25_spill] sm:$0xff] }
 0x56d   : > { %v5736_v3 = vpop.f32.mrf.mxu0 }
 0x56e   : > { %v5850_v52 = vadd.f32 %v5849_v57, %v5736_v3  ;;  %v6049_v46 = vpop.f32.mrf.mxu1 }
 0x571   : > { %v9675_v48 = vpop.f32.mrf.mxu0 }
 0x572   : > { %v5943_v42 = vadd.f32 %v9675_v48, %v5844_v34  ;;  %v9717_v44 = vpop.f32.mrf.mxu1 }
 0x573   : > { %v5935_v40 = vpop.f32.mrf.mxu0 }
 0x574   : > { %v5936_v7 = vadd.f32 %v5935_v40, %v5838_v54  ;;  %v6042_v49 = vadd.f32 %v9689_v8, %v5943_v42  ;;  %v6233_v18 = vpop.f32.mrf.mxu1 }
 0x576   : > { %v9678_v6 = vpop.f32.mrf.mxu0  ;;  %v6034_v37 = vadd.f32 %v6033_v27, %v5936_v7 }
 0x577   : > { %v5957_v28 = vadd.f32 %v9678_v6, %v5856_v39  ;;  %v9720_v60 = vpop.f32.mrf.mxu1 }
 0x578   : > { %v5949_v63 = vpop.f32.mrf.mxu0 }
 0x579   : > { %v5950_v19 = vadd.f32 %v5949_v63, %v5850_v52  ;;  %v6058_v0 = vadd.f32 %v9692_v43, %v5957_v28  ;;  %v6245_v31 = vpop.f32.mrf.mxu1 }
 0x57b   : > { %v9703_v58 = vpop.f32.mrf.mxu0  ;;  %v6050_v10 = vadd.f32 %v6049_v46, %v5950_v19 }
 0x57c   : > { %v6147_v21 = vadd.f32 %v9703_v58, %v6042_v49 }
 0x57d   : > { %v6140_v2 = vpop.f32.mrf.mxu0 }
 0x57e   : > { %v6240_v23 = vadd.f32 %v9717_v44, %v6147_v21  ;;  %v6141_v38 = vadd.f32 %v6140_v2, %v6034_v37 }
 0x57f   : > { %v9706_v25 = vpop.f32.mrf.mxu0 }
 0x580   : > { %v12023_v62 = vadd.f32 %v6240_v23, %v12344_v33  ;;  %v6234_v29 = vadd.f32 %v6233_v18, %v6141_v38  ;;  %v6159_v14 = vadd.f32 %v9706_v25, %v6058_v0 }
 0x581   : > { %v6152_v20 = vpop.f32.mrf.mxu0 }
 0x582   : > { %v12026_v5 = vadd.f32 %v6234_v29, %v12345_v41  ;;  %v6252_v9 = vadd.f32 %v9720_v60, %v6159_v14  ;;  %v6153_v50 = vadd.f32 %v6152_v20, %v6050_v10 }
 0x583   : > { %v9745_v61 = vpop.f32.mrf.mxu1 }
 0x584   : > { %v12029_v16 = vadd.f32 %v6252_v9, %v12346_v24  ;;  %v6246_v17 = vadd.f32 %v6245_v31, %v6153_v50 }
 0x585   : > { %v6479_v34 = vpop.f32.mrf.mxu1 }
 0x586   : > { %v12032_v57 = vadd.f32 %v6246_v17, %v12347_v51 }
 0x587   : > { %v9748_v32 = vpop.f32.mrf.mxu1 }
 0x589   : > { %v6491_v27 = vpop.f32.mrf.mxu1 }
 0x58b   : > { %v9731_v8 = vpop.f32.mrf.mxu0 }
 0x58c   : > { %v6486_v46 = vadd.f32 %v9745_v61, %v9731_v8 }
 0x58d   : > { %v6358_v54 = vpop.f32.mrf.mxu0 }
 0x58e   : > { %v6480_v49 = vadd.f32 %v6479_v34, %v6358_v54 }
 0x58f   : > { %v9734_v56 = vpop.f32.mrf.mxu0 }
 0x590   : > { %v6498_v44 = vadd.f32 %v9748_v32, %v9734_v56 }
 0x591   : > { %v6378_v3 = vpop.f32.mrf.mxu0 }
 0x592   : > { %v6492_v19 = vadd.f32 %v6491_v27, %v6378_v3 }
 0x594   : > { %v9773_v39 = vpop.f32.mrf.mxu1 }
 0x596   : > { %v6675_v52 = vpop.f32.mrf.mxu1 }
 0x598   : > { %v9776_v48 = vpop.f32.mrf.mxu1 }
 0x59a   : > { %v6691_v40 = vpop.f32.mrf.mxu1 }
 0x59b   : > { %v9759_v43 = vpop.f32.mrf.mxu0 }
 0x59c   : > { %v6585_v6 = vadd.f32 %v9759_v43, %v6486_v46 }
 0x59d   : > { %v6577_v42 = vpop.f32.mrf.mxu0 }
 0x59e   : > { %v6578_v28 = vadd.f32 %v6577_v42, %v6480_v49  ;;  %v6684_v18 = vadd.f32 %v9773_v39, %v6585_v6 }
 0x59f   : > { %v9762_v7 = vpop.f32.mrf.mxu0 }
 0x5a0   : > { %v6599_v0 = vadd.f32 %v9762_v7, %v6498_v44  ;;  %v6676_v23 = vadd.f32 %v6675_v52, %v6578_v28 }
 0x5a1   : > { %v6591_v63 = vpop.f32.mrf.mxu0 }
 0x5a2   : > { %v6592_v21 = vadd.f32 %v6591_v63, %v6492_v19  ;;  %v6700_v33 = vadd.f32 %v9776_v48, %v6599_v0 }
 0x5a4   : > { %v9801_v37 = vpop.f32.mrf.mxu1  ;;  %v6692_v9 = vadd.f32 %v6691_v40, %v6592_v21 }
 0x5a6   : > { %v6875_v58 = vpop.f32.mrf.mxu1 }
 0x5a8   : > { %v9804_v29 = vpop.f32.mrf.mxu1 }
 0x5aa   : > { %v6887_v61 = vpop.f32.mrf.mxu1 }
 0x5ac   : > { %v9787_v10 = vpop.f32.mrf.mxu0 }
 0x5ad   : > { %v6789_v2 = vadd.f32 %v9787_v10, %v6684_v18 }
 0x5ae   : > { %v6782_v38 = vpop.f32.mrf.mxu0 }
 0x5af   : > { %v6882_v60 = vadd.f32 %v9801_v37, %v6789_v2  ;;  %v6783_v25 = vadd.f32 %v6782_v38, %v6676_v23 }
 0x5b0   : > { %v9790_v14 = vpop.f32.mrf.mxu0 }
 0x5b1   : > { %v6876_v20 = vadd.f32 %v6875_v58, %v6783_v25  ;;  %v6801_v41 = vadd.f32 %v9790_v14, %v6700_v33  ;;  %v6898_v31 = vmul.f32 0.17677669, %v6882_v60 }
 0x5b2   : > { %v6794_v50 = vpop.f32.mrf.mxu0 }
 0x5b3   : > { %v6897_v24 = vmul.f32 0.17677669, %v6876_v20  ;;  %v6894_v17 = vadd.f32 %v9804_v29, %v6801_v41  ;;  %v6795_v51 = vadd.f32 %v6794_v50, %v6692_v9  ;;  %v6902_v54 = vadd.f32 %v11775_v4, %v6898_v31 }
 0x5b5   : > { %v6901_v34 = vadd.f32 %v11772_v1, %v6897_v24  ;;  %v6900_v8 = vmul.f32 0.17677669, %v6894_v17  ;;  %v6888_v32 = vadd.f32 %v6887_v61, %v6795_v51  ;;  %v6906_v52 = vsel %vm368_vm0, %v6902_v54, -inf }
 0x5b7   : > { %v6904_v27 = vadd.f32 %v11778_v30, %v6900_v8  ;;  %v6899_v56 = vmul.f32 0.17677669, %v6888_v32  ;;  %v6905_v39 = vsel %vm368_vm0, %v6901_v34, -inf }
 0x5b8   : > { %v6909_v42 = vmax.f32 %v6905_v39, %v6906_v52 }
 0x5b9   : > { %v6903_v3 = vadd.f32 %v11782_v53, %v6899_v56  ;;  %v6908_v43 = vsel %vm368_vm0, %v6904_v27, -inf }
 0x5bb   : > { %v6907_v48 = vsel %vm368_vm0, %v6903_v3, -inf }
 0x5bc   : > { %v6910_v46 = vmax.f32 %v6907_v48, %v6908_v43 }
 0x5be   : > { %v6911_v1 = vmax.f32 %v6909_v42, %v6910_v46 }
 0x5c0   : > { %v6912_v40 = vrot.slane %v6911_v1, 4 }
 0x5c2   : > { %v6913_v7 = vmax.f32 %v6911_v1, %v6912_v40 }
 0x5c4   : > { %v6914_v49 = vrot.slane %v6913_v7, 2 }
 0x5c6   : > { %v6915_v4 = vmax.f32 %v6913_v7, %v6914_v49 }
 0x5c8   : > { %v6916_v6 = vrot.slane %v6915_v4, 1 }
 0x5ca   : > { %v6917_v30 = vmax.f32 %v6915_v4, %v6916_v6 }
 0x5cc   : > { %v6918_v37 = vsub.f32 %v6901_v34, %v6917_v30  ;;  %v6919_v44 = vsub.f32 %v6902_v54, %v6917_v30  ;;  %v6920_v28 = vsub.f32 %v6903_v3, %v6917_v30  ;;  %v6921_v63 = vsub.f32 %v6904_v27, %v6917_v30 }
 0x5ce   : > { %v6922_v53 = vmul.f32 1.442695, %v6918_v37  ;;  %v6924_v19 = vmul.f32 1.442695, %v6919_v44  ;;  %v6926_v0 = vmul.f32 1.442695, %v6920_v28 }
 0x5cf   : > { %v6928_v18 = vmul.f32 1.442695, %v6921_v63 }
 0x5d0   : > { %10097 = vpow2.f32 %v6922_v53 }
 0x5d1   : > { %10099 = vpow2.f32 %v6924_v19 }
 0x5d2   : > { %10101 = vpow2.f32 %v6926_v0 }
 0x5d3   : > { %10103 = vpow2.f32 %v6928_v18 }
 0x5dd   : > { %v10098_v58 = vpop.eup %10097 }
 0x5de   : > { %v10100_v10 = vpop.eup %10099  ;;  %v6930_v21 = vsel %vm368_vm0, %v10098_v58, 0.0 }
 0x5df   : > { %v10102_v2 = vpop.eup %10101  ;;  %v6931_v23 = vsel %vm368_vm0, %v10100_v10, 0.0 }
 0x5e0   : > { %v10104_v38 = vpop.eup %10103  ;;  %v6932_v60 = vadd.f32 %v6931_v23, %v6930_v21  ;;  %v6933_v25 = vsel %vm368_vm0, %v10102_v2, 0.0 }
 0x5e1   : > { %v6935_v29 = vsel %vm368_vm0, %v10104_v38, 0.0 }
 0x5e2   : > { %v6934_v33 = vadd.f32 %v6933_v25, %v6932_v60 }
 0x5e4   : > { %v6936_v14 = vadd.f32 %v6935_v29, %v6934_v33 }
 0x5e6   : > { %v6937_v20 = vrot.slane %v6936_v14, 4 }
 0x5e8   : > { %v6938_v41 = vadd.f32 %v6937_v20, %v6936_v14 }
 0x5ea   : > { %v6939_v9 = vrot.slane %v6938_v41, 2 }
 0x5ec   : > { %v6940_v50 = vadd.f32 %v6939_v9, %v6938_v41 }
 0x5ee   : > { %v6941_v31 = vrot.slane %v6940_v50, 1 }
 0x5f0   : > { %v6942_v24 = vadd.f32 %v6941_v31, %v6940_v50 }
 0x5f2   : > { %10105 = vrcp.f32 %v6942_v24 }
 0x5ff   : > { %v10106_v17 = vpop.eup %10105 }
 0x600   : > { %v6944_v51 = vmul.f32 %v10106_v17, %v10098_v58  ;;  %v6945_v61 = vmul.f32 %v10106_v17, %v10100_v10  ;;  %v6946_v34 = vmul.f32 %v10106_v17, %v10102_v2  ;;  %v6947_v8 = vmul.f32 %v10106_v17, %v10104_v38 }
 0x602   : > { %v6953_v32 = vsel %vm368_vm0, %v6944_v51, 0  ;;  %v6956_v54 = vsel %vm368_vm0, %v6945_v61, 0  ;;  %v6959_v27 = vsel %vm368_vm0, %v6946_v34, 0  ;;  %v6962_v56 = vsel %vm368_vm0, %v6947_v8, 0 }
 0x603   : > { %v12050_v39 = vand.u32 4294901760, %v6953_v32  ;;  %v12052_v3 = vand.u32 4294901760, %v6956_v54  ;;  %v12054_v52 = vand.u32 4294901760, %v6959_v27  ;;  %v12056_v43 = vand.u32 4294901760, %v6962_v56 }
 0x605   : > { %9827 = vmatprep.mubr.f32.mxu1 %v12050_v39  ;;  %v7044_v48 = vsub.f32 %v6956_v54, %v12052_v3  ;;  %v7034_v42 = vsub.f32 %v6953_v32, %v12050_v39  ;;  %v7054_v46 = vsub.f32 %v6959_v27, %v12054_v52  ;;  %v7064_v1 = vsub.f32 %v6962_v56, %v12056_v43 }
 0x606   : > { %9828 = vmatmul.mubr.f32.vlgmr.msra.gmra.mxu1 %v12052_v3 }
 0x607   : > { %9848 = vmatpush3.msra.mxu1 %v11932_v15  ;;  %9830 = vmatprep.mubr.f32.mxu1 %v12054_v52  ;;  %v7035_v40 = vand.u32 4294901760, %v7034_v42  ;;  %v7045_v7 = vand.u32 4294901760, %v7044_v48  ;;  %v7055_v49 = vand.u32 4294901760, %v7054_v46  ;;  %v7065_v37 = vand.u32 4294901760, %v7064_v1 }
 0x608   : > { %9849 = vmatprep.subr.mxu1 %v11948_v13 }
 0x609   : > { %9850 = vmatpush3.msra.mxu1 %v11948_v13  ;;  %v7036_v4 = vsub.f32 %v7034_v42, %v7035_v40  ;;  %v7046_v6 = vsub.f32 %v7044_v48, %v7045_v7  ;;  %v7056_v30 = vsub.f32 %v7054_v46, %v7055_v49  ;;  %v7066_v53 = vsub.f32 %v7064_v1, %v7065_v37 }
 0x60a   : > { %9851 = vmatprep.subr.mxu1 %v11952_v55  ;;  %9831 = vmatmul.mubr.f32.gmra.mxu1 %v12056_v43 }
 0x60b   : > { %9852 = vmatpush3.msra.mxu1 %v11952_v55  ;;  %9855 = vmatprep.mubr.f32.mxu1 %v7035_v40  ;;  %v7037_v44 = vand.u32 4294901760, %v7036_v4  ;;  %v7047_v28 = vand.u32 4294901760, %v7046_v6  ;;  %v7057_v63 = vand.u32 4294901760, %v7056_v30  ;;  %v7067_v19 = vand.u32 4294901760, %v7066_v53 }
 0x60c   : > { %9853 = vmatprep.subr.mxu1 %v11956_v11 }
 0x60d   : > { %9854 = vmatpush3.msra.mxu1 %v11956_v11  ;;  %9813 = vmatprep.mubr.f32.mxu0 %v7037_v44 }
 0x60e   : > { %9875 = vmatprep.subr.mxu1 %v11932_v15  ;;  %9814 = vmatmul.mubr.f32.vlgmr.msra.gmra.mxu0 %v7047_v28 }
 0x60f   : > { %9834 = vmatpush3.msra.mxu0 %v11946_v22  ;;  %9856 = vmatmul.mubr.f32.vlgmr.msra.gmra.mxu1 %v7045_v7 }
 0x610   : > { %9876 = vmatpush3.msra.mxu1 %v11932_v15  ;;  %9816 = vmatprep.mubr.f32.mxu0 %v7057_v63  ;;  %v7585_v15 = vld [vmem:[#allocation7 + $0x18] sm:$0xff] }
 0x611   : > { %9835 = vmatprep.subr.mxu0 %v11959_v35  ;;  %9858 = vmatprep.mubr.f32.mxu1 %v7055_v49  ;;  %v12104_v22 = vand.u32 4294901760, %v7585_v15 }
 0x612   : > { %9877 = vmatprep.subr.mxu1 %v11948_v13  ;;  %9836 = vmatpush3.msra.mxu0 %v11959_v35  ;;  %v7583_v35 = vld [vmem:[#allocation7 + $0x8] sm:$0xff] }
 0x613   : > { %9878 = vmatpush3.msra.mxu1 %v11948_v13  ;;  %9837 = vmatprep.subr.mxu0 %v11968_v26  ;;  %v7584_v13 = vld [vmem:[#allocation7 + $0x10] sm:$0xff] }
 0x614   : > { %9879 = vmatprep.subr.mxu1 %v11952_v55  ;;  %9817 = vmatmul.mubr.f32.gmra.mxu0 %v7067_v19 }
 0x615   : > { %9838 = vmatpush3.msra.mxu0 %v11968_v26  ;;  %9859 = vmatmul.mubr.f32.gmra.mxu1 %v7065_v37 }
 0x616   : > { %9880 = vmatpush3.msra.mxu1 %v11952_v55  ;;  %9839 = vmatprep.subr.mxu0 %v11974_v12  ;;  %v12107_v55 = vsub.f32 %v7585_v15, %v12104_v22 }
 0x617   : > { %9841 = vmatprep.mubr.f32.mxu0 %v7034_v42  ;;  %9881 = vmatprep.subr.mxu1 %v11956_v11 }
 0x618   : > { %9883 = vmatprep.mubr.f32.mxu1 %v12050_v39  ;;  %9840 = vmatpush3.msra.mxu0 %v11974_v12  ;;  %v12119_v12 = vand.u32 4294901760, %v7583_v35 }
 0x619   : > { %9882 = vmatpush3.msra.mxu1 %v11956_v11  ;;  %9861 = vmatprep.subr.mxu0 %v11963_v47  ;;  %v12109_v11 = vand.u32 4294901760, %v7584_v13 }
 0x61a   : > { %9842 = vmatmul.mubr.f32.vlgmr.msra.gmra.mxu0 %v7044_v48  ;;  %9884 = vmatmul.mubr.f32.vlgmr.msra.gmra.mxu1 %v12052_v3  ;;  %v12129_v0 = vsub.f32 %v7583_v35, %v12119_v12 }
 0x61b   : > { %9862 = vmatpush3.msra.mxu0 %v11963_v47  ;;  %9844 = vmatprep.mubr.f32.mxu0 %v7054_v46  ;;  %v12114_v47 = vand.u32 4294901760, %v12107_v55  ;;  %v12117_v26 = vsub.f32 %v7584_v13, %v12109_v11 }
 0x61c   : > { %9863 = vmatprep.subr.mxu0 %v11981_v36  ;;  %9886 = vmatprep.mubr.f32.mxu1 %v12054_v52  ;;  %v12138_v21 = vand.u32 4294901760, %v12129_v0 }
 0x61d   : > { %9864 = vmatpush3.msra.mxu0 %v11981_v36  ;;  %v7582_v36 = vld [vmem:[#allocation7] sm:$0xff] }
 0x61e   : > { %9865 = vmatprep.subr.mxu0 %v11987_v45  ;;  %9845 = vmatmul.mubr.f32.gmra.mxu0 %v7064_v1  ;;  %v12131_v18 = vand.u32 4294901760, %v7582_v36  ;;  %v7756_v38 = vsub.f32 %v12129_v0, %v12138_v21 }
 0x61f   : > { %9866 = vmatpush3.msra.mxu0 %v11987_v45  ;;  %9887 = vmatmul.mubr.f32.gmra.mxu1 %v12056_v43  ;;  %v7742_v45 = vsub.f32 %v12107_v55, %v12114_v47 }
 0x620   : > { %9867 = vmatprep.subr.mxu0 %v11995_v59  ;;  %9869 = vmatprep.mubr.f32.mxu0 %v12050_v39  ;;  %v12141_v2 = vsub.f32 %v7582_v36, %v12131_v18  ;;  %v7757_v25 = vand.u32 4294901760, %v7756_v38 }
 0x621   : > { %9868 = vmatpush3.msra.mxu0 %v11995_v59  ;;  %v12126_v59 = vand.u32 4294901760, %v12117_v26  ;;  %v7743_v58 = vand.u32 4294901760, %v7742_v45 }
 0x622   : > { %9870 = vmatmul.mubr.f32.vlgmr.msra.gmra.mxu0 %v12052_v3  ;;  %9889 = vmatprep.subr.mxu0 %v12104_v22  ;;  %v12148_v60 = vand.u32 4294901760, %v12141_v2 }
 0x623   : > { %9872 = vmatprep.mubr.f32.mxu0 %v12054_v52  ;;  %9890 = vmatpush3.msra.mxu0 %v12104_v22  ;;  %v7749_v10 = vsub.f32 %v12117_v26, %v12126_v59 }
 0x624   : > { %9891 = vmatprep.subr.mxu0 %v12109_v11  ;;  %9903 = vmatprep.subr.mxu1 %v7743_v58  ;;  %v7763_v33 = vsub.f32 %v12141_v2, %v12148_v60 }
 0x625   : > { %9892 = vmatpush3.msra.mxu0 %v12109_v11  ;;  %v7750_v23 = vand.u32 4294901760, %v7749_v10  ;;  %9904 = vmatpush3.msra.mxu1 %v7743_v58 }
 0x626   : > { %9873 = vmatmul.mubr.f32.gmra.mxu0 %v12056_v43  ;;  %9893 = vmatprep.subr.mxu0 %v12119_v12  ;;  %v7764_v29 = vand.u32 4294901760, %v7763_v33 }
 0x627   : > { %9894 = vmatpush3.msra.mxu0 %v12119_v12  ;;  %9905 = vmatprep.subr.mxu1 %v7750_v23 }
 0x628   : > { %9895 = vmatprep.subr.mxu0 %v12131_v18  ;;  %9906 = vmatpush3.msra.mxu1 %v7750_v23 }
 0x629   : > { %9896 = vmatpush3.msra.mxu0 %v12131_v18  ;;  %9907 = vmatprep.subr.mxu1 %v7757_v25 }
 0x62a   : > { %9917 = vmatprep.subr.mxu0 %v12107_v55  ;;  %9908 = vmatpush3.msra.mxu1 %v7757_v25 }
 0x62b   : > { %9909 = vmatprep.subr.mxu1 %v7764_v29 }
 0x62c   : > { %9910 = vmatpush3.msra.mxu1 %v7764_v29 }
 0x62d   : > { %9931 = vmatprep.subr.mxu1 %v12104_v22 }
 0x6c6   : > { %v9829_v14 = vpop.f32.mrf.mxu1 }
 0x6c8   : > { %v7160_v20 = vpop.f32.mrf.mxu1 }
 0x6ca   : > { %v9832_v41 = vpop.f32.mrf.mxu1 }
 0x6cc   : > { %v7172_v9 = vpop.f32.mrf.mxu1 }
 0x6ce   : > { %v9815_v50 = vpop.f32.mrf.mxu0 }
 0x6cf   : > { %v9857_v31 = vpop.f32.mrf.mxu1  ;;  %v7167_v54 = vadd.f32 %v9829_v14, %v9815_v50 }
 0x6d0   : > { %v7039_v24 = vpop.f32.mrf.mxu0 }
 0x6d1   : > { %v7356_v17 = vpop.f32.mrf.mxu1  ;;  %v7161_v56 = vadd.f32 %v7160_v20, %v7039_v24 }
 0x6d4   : > { %v9818_v51 = vpop.f32.mrf.mxu0 }
 0x6d5   : > { %v9860_v61 = vpop.f32.mrf.mxu1  ;;  %v7179_v43 = vadd.f32 %v9832_v41, %v9818_v51 }
 0x6d6   : > { %v7059_v34 = vpop.f32.mrf.mxu0 }
 0x6d7   : > { %v7372_v8 = vpop.f32.mrf.mxu1  ;;  %v7173_v46 = vadd.f32 %v7172_v9, %v7059_v34 }
 0x6da   : > { %v9843_v32 = vpop.f32.mrf.mxu0  ;;  %v9885_v3 = vpop.f32.mrf.mxu1 }
 0x6db   : > { %v7266_v39 = vadd.f32 %v9843_v32, %v7167_v54 }
 0x6dc   : > { %v7258_v27 = vpop.f32.mrf.mxu0  ;;  %v7556_v7 = vpop.f32.mrf.mxu1 }
 0x6dd   : > { %v7259_v48 = vadd.f32 %v7258_v27, %v7161_v56  ;;  %v7365_v40 = vadd.f32 %v9857_v31, %v7266_v39 }
 0x6de   : > { %v9846_v52 = vpop.f32.mrf.mxu0 }
 0x6df   : > { %v7280_v1 = vadd.f32 %v9846_v52, %v7179_v43  ;;  %v7357_v30 = vadd.f32 %v7356_v17, %v7259_v48  ;;  %v9888_v53 = vpop.f32.mrf.mxu1 }
 0x6e0   : > { %v7272_v42 = vpop.f32.mrf.mxu0 }
 0x6e1   : > { %v7273_v4 = vadd.f32 %v7272_v42, %v7173_v46  ;;  %v7381_v63 = vadd.f32 %v9860_v61, %v7280_v1  ;;  %v7568_v25 = vpop.f32.mrf.mxu1 }
 0x6e2   : > { %v9871_v49 = vpop.f32.mrf.mxu0 }
 0x6e3   : > { %v7470_v6 = vadd.f32 %v9871_v49, %v7365_v40  ;;  %v7373_v36 = vadd.f32 %v7372_v8, %v7273_v4 }
 0x6e4   : > { %v7463_v37 = vpop.f32.mrf.mxu0 }
 0x6e5   : > { %v7563_v44 = vadd.f32 %v9885_v3, %v7470_v6  ;;  %v7464_v28 = vadd.f32 %v7463_v37, %v7357_v30 }
 0x6e6   : > { %v9874_v19 = vpop.f32.mrf.mxu0 }
 0x6e7   : > { %v7579_v15 = vadd.f32 %v7563_v44, %v12023_v62  ;;  %v7557_v13 = vadd.f32 %v7556_v7, %v7464_v28  ;;  %v7482_v35 = vadd.f32 %v9874_v19, %v7381_v63 }
 0x6e8   : > { %v7475_v45 = vpop.f32.mrf.mxu0 }
 0x6e9   : > { %v7597_v58 = vsel %vm368_vm0, %v7579_v15, 0  ;;  %v7578_v10 = vadd.f32 %v7557_v13, %v12026_v5  ;;  %v7575_v23 = vadd.f32 %v9888_v53, %v7482_v35  ;;  %v7476_v38 = vadd.f32 %v7475_v45, %v7373_v36 }
 0x6ea   : > { %v12157_v33 = vand.u32 4294901760, %v7597_v58 }
 0x6eb   : > { %v7594_v29 = vsel %vm368_vm0, %v7578_v10, 0  ;;  %v7581_v14 = vadd.f32 %v7575_v23, %v12029_v16  ;;  %v7569_v20 = vadd.f32 %v7568_v25, %v7476_v38 }
 0x6ec   : > { %v7685_v62 = vsub.f32 %v7597_v58, %v12157_v33  ;;  %v12162_v41 = vand.u32 4294901760, %v7594_v29 }
 0x6ed   : > { %v7603_v9 = vsel %vm368_vm0, %v7581_v14, 0  ;;  %v7580_v50 = vadd.f32 %v7569_v20, %v12032_v57 }
 0x6ee   : > { %v7686_v31 = vand.u32 4294901760, %v7685_v62  ;;  %v7675_v5 = vsub.f32 %v7594_v29, %v12162_v41  ;;  %v12167_v24 = vand.u32 4294901760, %v7603_v9  ;;  %9911 = vmatprep.mubr.f32.mxu1 %v12162_v41 }
 0x6ef   : > { %v7600_v17 = vsel %vm368_vm0, %v7580_v50, 0  ;;  %9912 = vmatmul.mubr.f32.vlgmr.msra.gmra.mxu1 %v12157_v33 }
 0x6f0   : > { %v7705_v16 = vsub.f32 %v7603_v9, %v12167_v24  ;;  %v7694_v51 = vand.u32 4294901760, %v7600_v17  ;;  %9932 = vmatpush3.msra.mxu1 %v12104_v22  ;;  %v7676_v61 = vand.u32 4294901760, %v7675_v5  ;;  %v7687_v34 = vsub.f32 %v7685_v62, %v7686_v31 }
 0x6f1   : > { %9933 = vmatprep.subr.mxu1 %v12109_v11 }
 0x6f2   : > { %v7695_v57 = vsub.f32 %v7600_v17, %v7694_v51  ;;  %9914 = vmatprep.mubr.f32.mxu1 %v7694_v51  ;;  %9934 = vmatpush3.msra.mxu1 %v12109_v11  ;;  %v7677_v8 = vsub.f32 %v7675_v5, %v7676_v61  ;;  %v7706_v32 = vand.u32 4294901760, %v7705_v16  ;;  %v7688_v56 = vand.u32 4294901760, %v7687_v34 }
 0x6f3   : > { %9915 = vmatmul.mubr.f32.gmra.mxu1 %v12167_v24  ;;  %9935 = vmatprep.subr.mxu1 %v12119_v12 }
 0x6f4   : > { %9936 = vmatpush3.msra.mxu1 %v12119_v12  ;;  %9939 = vmatprep.mubr.f32.mxu1 %v7676_v61  ;;  %v7678_v54 = vand.u32 4294901760, %v7677_v8  ;;  %v7696_v27 = vand.u32 4294901760, %v7695_v57  ;;  %v7707_v3 = vsub.f32 %v7705_v16, %v7706_v32 }
 0x6f5   : > { %9937 = vmatprep.subr.mxu1 %v12131_v18 }
 0x6f6   : > { %9897 = vmatprep.mubr.f32.mxu0 %v7678_v54  ;;  %9938 = vmatpush3.msra.mxu1 %v12131_v18  ;;  %v7697_v39 = vsub.f32 %v7695_v57, %v7696_v27  ;;  %v7708_v43 = vand.u32 4294901760, %v7707_v3 }
 0x6f7   : > { %9898 = vmatmul.mubr.f32.vlgmr.msra.gmra.mxu0 %v7688_v56  ;;  %9940 = vmatmul.mubr.f32.vlgmr.msra.gmra.mxu1 %v7686_v31 }
 0x6f8   : > { %9959 = vmatprep.subr.mxu1 %v12104_v22  ;;  %9918 = vmatpush3.msra.mxu0 %v12107_v55  ;;  %v7698_v52 = vand.u32 4294901760, %v7697_v39 }
 0x6f9   : > { %9942 = vmatprep.mubr.f32.mxu1 %v7696_v27  ;;  %9960 = vmatpush3.msra.mxu1 %v12104_v22 }
 0x6fa   : > { %9919 = vmatprep.subr.mxu0 %v12117_v26  ;;  %9961 = vmatprep.subr.mxu1 %v12109_v11 }
 0x6fb   : > { %9900 = vmatprep.mubr.f32.mxu0 %v7698_v52  ;;  %9920 = vmatpush3.msra.mxu0 %v12117_v26 }
 0x6fc   : > { %9962 = vmatpush3.msra.mxu1 %v12109_v11  ;;  %9901 = vmatmul.mubr.f32.gmra.mxu0 %v7708_v43 }
 0x6fd   : > { %9921 = vmatprep.subr.mxu0 %v12129_v0  ;;  %9943 = vmatmul.mubr.f32.gmra.mxu1 %v7706_v32 }
 0x6fe   : > { %9963 = vmatprep.subr.mxu1 %v12119_v12  ;;  %9922 = vmatpush3.msra.mxu0 %v12129_v0 }
 0x6ff   : > { %9925 = vmatprep.mubr.f32.mxu0 %v7675_v5  ;;  %9964 = vmatpush3.msra.mxu1 %v12119_v12 }
 0x700   : > { %9967 = vmatprep.mubr.f32.mxu1 %v12162_v41  ;;  %9923 = vmatprep.subr.mxu0 %v12141_v2 }
 0x701   : > { %9965 = vmatprep.subr.mxu1 %v12131_v18  ;;  %9924 = vmatpush3.msra.mxu0 %v12141_v2 }
 0x702   : > { %9966 = vmatpush3.msra.mxu1 %v12131_v18  ;;  %9926 = vmatmul.mubr.f32.vlgmr.msra.gmra.mxu0 %v7685_v62 }
 0x703   : > { %9945 = vmatprep.subr.mxu0 %v12114_v47  ;;  %9968 = vmatmul.mubr.f32.vlgmr.msra.gmra.mxu1 %v12157_v33 }
 0x704   : > { %9928 = vmatprep.mubr.f32.mxu0 %v7695_v57  ;;  %9946 = vmatpush3.msra.mxu0 %v12114_v47 }
 0x705   : > { %9970 = vmatprep.mubr.f32.mxu1 %v7694_v51  ;;  %9947 = vmatprep.subr.mxu0 %v12126_v59 }
 0x706   : > { %9948 = vmatpush3.msra.mxu0 %v12126_v59 }
 0x707   : > { %9929 = vmatmul.mubr.f32.gmra.mxu0 %v7705_v16  ;;  %9949 = vmatprep.subr.mxu0 %v12138_v21 }
 0x708   : > { %9971 = vmatmul.mubr.f32.gmra.mxu1 %v12167_v24  ;;  %9950 = vmatpush3.msra.mxu0 %v12138_v21  ;;  %v8382_v21 = vld [vmem:[#allocation8] ss:$0 sm:$0xff] }
 0x709   : > { %9953 = vmatprep.mubr.f32.mxu0 %v12162_v41  ;;  %9951 = vmatprep.subr.mxu0 %v12148_v60 }
 0x70a   : > { %9952 = vmatpush3.msra.mxu0 %v12148_v60 }
 0x70b   : > { %9954 = vmatmul.mubr.f32.vlgmr.msra.gmra.mxu0 %v12157_v33 }
 0x70c   : > { %9956 = vmatprep.mubr.f32.mxu0 %v7694_v51 }
 0x70f   : > { %9957 = vmatmul.mubr.f32.gmra.mxu0 %v12167_v24 }
 0x7af   : > { %v9913_v22 = vpop.f32.mrf.mxu1 }
 0x7b1   : > { %v7801_v55 = vpop.f32.mrf.mxu1 }
 0x7b3   : > { %v9916_v11 = vpop.f32.mrf.mxu1 }
 0x7b5   : > { %v7813_v47 = vpop.f32.mrf.mxu1 }
 0x7b7   : > { %v9899_v26 = vpop.f32.mrf.mxu0  ;;  %v9941_v12 = vpop.f32.mrf.mxu1 }
 0x7b8   : > { %v7691_v42 = vadd.f32 %v9899_v26, %v8382_v21 }
 0x7b9   : > { %v7680_v59 = vpop.f32.mrf.mxu0  ;;  %v7997_v0 = vpop.f32.mrf.mxu1 }
 0x7ba   : > { %v7681_v46 = vadd.f32 %v8382_v21, %v7680_v59  ;;  %v7808_v7 = vadd.f32 %v9913_v22, %v7691_v42 }
 0x7bc   : > { %v9902_v18 = vpop.f32.mrf.mxu0  ;;  %v7802_v30 = vadd.f32 %v7801_v55, %v7681_v46 }
 0x7bd   : > { %v9944_v48 = vpop.f32.mrf.mxu1  ;;  %v7711_v40 = vadd.f32 %v9902_v18, %v8382_v21 }
 0x7be   : > { %v7700_v2 = vpop.f32.mrf.mxu0 }
 0x7bf   : > { %v8013_v1 = vpop.f32.mrf.mxu1  ;;  %v7701_v4 = vadd.f32 %v8382_v21, %v7700_v2  ;;  %v7820_v63 = vadd.f32 %v9916_v11, %v7711_v40 }
 0x7c1   : > { %v7814_v15 = vadd.f32 %v7813_v47, %v7701_v4 }
 0x7c2   : > { %v9927_v60 = vpop.f32.mrf.mxu0 }
 0x7c3   : > { %v7907_v6 = vadd.f32 %v9927_v60, %v7808_v7  ;;  %v9969_v37 = vpop.f32.mrf.mxu1 }
 0x7c4   : > { %v7899_v49 = vpop.f32.mrf.mxu0 }
 0x7c5   : > { %v7900_v28 = vadd.f32 %v7899_v49, %v7802_v30  ;;  %v8006_v13 = vadd.f32 %v9941_v12, %v7907_v6  ;;  %v8197_v35 = vpop.f32.mrf.mxu1 }
 0x7c7   : > { %v9930_v44 = vpop.f32.mrf.mxu0  ;;  %v7998_v10 = vadd.f32 %v7997_v0, %v7900_v28 }
 0x7c8   : > { %v7921_v19 = vadd.f32 %v9930_v44, %v7820_v63  ;;  %v9972_v29 = vpop.f32.mrf.mxu1 }
 0x7c9   : > { %v7913_v53 = vpop.f32.mrf.mxu0 }
 0x7ca   : > { %v7914_v45 = vadd.f32 %v7913_v53, %v7814_v15  ;;  %v8022_v33 = vadd.f32 %v9944_v48, %v7921_v19  ;;  %v8209_v5 = vpop.f32.mrf.mxu1 }
 0x7cb   : > { %v9955_v36 = vpop.f32.mrf.mxu0 }
 0x7cc   : > { %v8111_v58 = vadd.f32 %v9955_v36, %v8006_v13  ;;  %v8014_v41 = vadd.f32 %v8013_v1, %v7914_v45 }
 0x7cd   : > { %v8104_v23 = vpop.f32.mrf.mxu0 }
 0x7ce   : > { %v8204_v38 = vadd.f32 %v9969_v37, %v8111_v58  ;;  %v8105_v25 = vadd.f32 %v8104_v23, %v7998_v10 }
 0x7cf   : > { %v9958_v14 = vpop.f32.mrf.mxu0 }
 0x7d0   : > { %8220 = vst.msk [vmem:[%s352_s16 + $0x8] sm:$0xff] %vm368_vm0, %v8204_v38  ;;  %v8198_v20 = vadd.f32 %v8197_v35, %v8105_v25  ;;  %v8123_v62 = vadd.f32 %v9958_v14, %v8022_v33 }
 0x7d1   : > { %v8116_v9 = vpop.f32.mrf.mxu0 }
 0x7d2   : > { %8219 = vst.msk [vmem:[%s352_s16] sm:$0xff] %vm368_vm0, %v8198_v20  ;;  %v8216_v50 = vadd.f32 %v9972_v29, %v8123_v62  ;;  %v8117_v31 = vadd.f32 %v8116_v9, %v8014_v41 }
 0x7d4   : > { %8222 = vst.msk [vmem:[%s352_s16 + $0x18] sm:$0xff] %vm368_vm0, %v8216_v50  ;;  %v8210_v24 = vadd.f32 %v8209_v5, %v8117_v31 }
 0x7d6   : > { %8221 = vst.msk [vmem:[%s352_s16 + $0x10] sm:$0xff] %vm368_vm0, %v8210_v24 }
 0x7d7   : > { %10257 = shalt.err (!%p10254_p5)
}
 0x7d8   : > { %s10258_s11 = scalar_lea.hbm %s12219_s19, 512  ;;  %s10262_s14 = scalar_lea.hbm %s12271_s7, 1024 }
 0x7d9   : > { %p10259_p6 = scmp.ne.s32.totalorder %s12219_s19, %s10258_s11  ;;  %p10263_p11 = scmp.lt.s32.totalorder %s12219_s19, %s12271_s7 }
 0x7da   : > { %p10264_p3 = scmp.lt.s32.totalorder %s10262_s14, %s10258_s11 }
 0x7db   : > { %p10260_p8 = pnand %p10259_p6, %p12348_p9 }
 0x7dc   : > { %p10265_p7 = por %p10264_p3, %p10263_p11 }
 0x7dd   : > { %p10261_p10 = pneg %p10260_p8 }
 0x7df   : > { %p10266_p12 = pnand %p10265_p7, %p10261_p10 }
 0x7e1   : > { %10269 = shalt.err (!%p10266_p12)
}
 0x7e2   : > { %s10326_s13 = smov 128   ;;  %s10327_s21 = smov 8  }
 0x7e3   : > { %9994 = dma.vmem_to_hbm [thread:$0]  (%p12348_p9), %s12213_s12, 512, %s12219_s19, %s8224_s28, %s10326_s13, %s10326_s13, %s10327_s21  }
 0x7e4 PF: > { %s8252_s1 = sand.u32 1, %s10304_s24   ;;  %p12349_p13 = scmp.ne.s32.totalorder %s12302_s8, 0 }
 0x7e5   : > { %p12350_p0 = scmp.ge.s32.totalorder %s10316_s27, 2  ;;  %s8253_s18 = scalar_lea.sflag [#allocation4], %s8252_s1 }
 0x7e7   : > { %p10014_p1 = pnand %p12350_p0, %p12349_p13 }
 0x7e9   : > { %p10015_p2 = pneg %p10014_p1 }
 0x7eb   : > { %10299 = dma.done.wait (%p10015_p2), %s8253_s18, 512  }
 0x7ec   : > { %10301 = vsyncadd (%p10015_p2), %s8253_s18, 4294966784  ;;  %p22_p4 = scmp.ge.s32.totalorder %s10465_s22, 4   ;;  %s12351_s24 = smov %s10308_s25 }
 0x7ed   : > { %s12352_s25 = smov %s10312_s26  ;;  %s12353_s26 = smov %s10481_s10 }
 0x7ee   : > { %s12354_s27 = smov %s10465_s22  ;;  %24 = sbr.rel (!%p22_p4) target bundleno = 9 (0x9), region = 118 }
 0x7f3   :  { %8258 = vsyncpa [#allocation3], 1 }
 0x7f4   :  { %8260 = vsyncpa [#allocation3 + $0x1], 1 }
 0x7f5   :  { %8261 = vsyncpa [#allocation6], 1 }
 0x7f6   :  { %8262 = vsyncpa [#allocation9], 1 }
 0x7f7   :  { %8263 = vsyncpa [#allocation4], 1 }
 0x7f8   :  { %8265 = vsyncpa [#allocation4 + $0x1], 1 }

</bundles_post_ra>
